<compile_context>
chip_gen: v5e
topology: v5e:2x2
jax: 0.10.0
libtpu: 0.0.40
codegen_flags: <defaults>
</compile_context>

<pallas_src>
import numpy as np
import jax
import jax.numpy as jnp
from jax.experimental import pallas as pl
from jax.experimental.pallas import tpu as pltpu

_SENTINEL = 1.0e6   # coordinate written into invalid/padded points (d ~ 3e12, finite f32)
_BIG = 1.0e30       # running-min init (plain Python float -> no captured constants)


def _make_chamfer_kernel(ni, nj):
    """Chamfer-distance kernel factory (ni / nj = #pred / #gt tiles, static)."""

    def kernel(p_ref, g_ref, vp_ref, vg_ref, o_ref, d1_acc, d2_acc):
        # p_ref : (1, 8, TQ)  fused pred slab  [x, y, z, ||p||^2, 1, 0, 0, 0]
        # g_ref : (1, 8, TK)  fused gt slab    [-2x, -2y, -2z, 1, ||g||^2, 0, 0, 0]
        # vp_ref: (1, 1, TQ)  1.0 where pred point is valid (lane-dense)
        # vg_ref: (1, 1, TK)  1.0 where gt point is valid (lane-dense)
        # o_ref : (1, 1, 128) per-batch chamfer sum (resident accumulator)
        # d1_acc: (TQ, 128)   deferred per-pred-point running min (over gt tiles)
        # d2_acc: (nj, TK)    per-gt-point running min (over pred tiles)
        i = pl.program_id(1)
        j = pl.program_id(2)

        # per-batch init (output block + dist2 accumulator persist across (i, j))
        @pl.when(jnp.logical_and(i == 0, j == 0))
        def _():
            o_ref[...] = jnp.zeros_like(o_ref)
            d2_acc[...] = jnp.full_like(d2_acc, _BIG)

        # per-pred-tile init of the dist1 running min
        @pl.when(j == 0)
        def _():
            d1_acc[...] = jnp.full_like(d1_acc, _BIG)

        p = p_ref[0]                          # (8, TQ)
        g = g_ref[0]                          # (8, TK)

        # Squared distances straight off the MXU: p^T @ g == ||p||^2 + ||g||^2 - 2<p,g>
        # (K-on-sublane contraction over the 8 fused channels).
        d = jax.lax.dot_general(
            p, g, dimension_numbers=(((0,), (0,)), ((), ())),
            precision=jax.lax.Precision.HIGHEST,
            preferred_element_type=jnp.float32)            # (TQ, TK)
        d = jnp.maximum(d, 0.0)

        tk = d.shape[1]

        # dist1: cheap VPU minimums over the TK/128 lane chunks each step; the
        # 128->1 cross-lane (XLU) reduce is deferred to the per-pred-tile finalize.
        folded = d[:, 0:128]
        for c in range(1, tk // 128):
            folded = jnp.minimum(folded, d[:, c * 128:(c + 1) * 128])
        d1_acc[...] = jnp.minimum(d1_acc[...], folded)

        # dist2: running column-min for gt tile j, persistent across pred tiles.
        col_min = jnp.min(d, axis=0, keepdims=True)        # (1, TK)
        if nj == 1:
            d2_new = jnp.minimum(d2_acc[...], col_min)
            d2_acc[...] = d2_new
        else:
            d2_new = jnp.minimum(d2_acc[pl.ds(j, 1), :], col_min)
            d2_acc[pl.ds(j, 1), :] = d2_new

        # finalize dist1 for pred tile i once every gt tile has been visited
        @pl.when(j == nj - 1)
        def _():
            m1 = jnp.min(d1_acc[...], axis=1, keepdims=True)       # (TQ, 1), XLU
            # masked sum over pred points via a tiny MXU contraction — avoids a
            # sublane<->lane transpose of the lane-dense validity mask.
            s1 = jax.lax.dot_general(
                vp_ref[0], m1, dimension_numbers=(((1,), (0,)), ((), ())),
                precision=jax.lax.Precision.HIGHEST,
                preferred_element_type=jnp.float32)                # (1, 1)
            o_ref[...] = o_ref[...] + jnp.broadcast_to(
                jnp.reshape(s1, (1, 1, 1)), o_ref.shape)

        # finalize dist2 for gt tile j once every pred tile has been visited
        @pl.when(i == ni - 1)
        def _():
            s2 = jnp.sum(jnp.where(vg_ref[0] > 0.0, d2_new, 0.0),
                         axis=1, keepdims=True)                    # (1, 1)
            o_ref[...] = o_ref[...] + jnp.broadcast_to(
                jnp.reshape(s2, (1, 1, 1)), o_ref.shape)

    return kernel


def _vmem_capacity_bytes():
    try:
        cap = int(getattr(pltpu.get_tpu_info(), "vmem_capacity_bytes", 0) or 0)
        if cap > 0:
            return cap
    except Exception:
        pass
    return 64 * 1024 * 1024   # conservative (v7x-sized) fallback


def get_xyz(depth, fx, fy, cx, cy):
    """Back-project a (B,1,H,W) depth map to (B,3,H,W) camera-frame xyz (pinhole)."""
    _, _, h, w = depth.shape
    u = jnp.arange(w, dtype=jnp.float32).reshape(1, 1, 1, w)
    v = jnp.arange(h, dtype=jnp.float32).reshape(1, 1, h, 1)
    z = depth.astype(jnp.float32)
    x = (u - cx) * z / fx
    y = (v - cy) * z / fy
    return jnp.concatenate([x, y, z], axis=1)


def pt_gridding_loss(pred, gt_xyz, mask, camera, tile=None):
    """pred: (B,1,H,W) depth; gt_xyz: (B,3,H,W); mask: (B,1,H,W); camera: dict."""
    b, _, h, w = pred.shape
    n = h * w

    pred_xyz = get_xyz(pred, camera["fx"], camera["fy"],
                       camera["cx"], camera["cy"]).astype(jnp.float32)
    pred_flat = pred_xyz.reshape(b, 3, n)                 # (B, 3, N) lane-dense
    gt_flat = gt_xyz.astype(jnp.float32).reshape(b, 3, n)
    m_flat = mask.reshape(b, n) > 0

    # ChamferDistance(ignore_zeros=True) additionally drops points whose
    # coordinate sum == 0 (batch size is 1 inside the per-sample loop).
    valid_p = jnp.logical_and(m_flat, jnp.sum(pred_flat, axis=1) != 0.0)   # (B, N)
    valid_g = jnp.logical_and(m_flat, jnp.sum(gt_flat, axis=1) != 0.0)     # (B, N)

    # ---- generation-aware tile / VMEM-limit selection ----
    vmem_cap = _vmem_capacity_bytes()
    if tile is None:
        # 128 MiB parts (v5e/v6e) comfortably hold a (2048,2048) f32 distance
        # tile; 64 MiB parts (v7x) stay at 1024.
        tile = 2048 if vmem_cap >= 100 * 1024 * 1024 else 1024
    vmem_limit = int(min(vmem_cap * 3 // 4, 96 * 1024 * 1024))

    n128 = ((n + 127) // 128) * 128
    tq = min(tile, n128)
    n_pad = ((n + tq - 1) // tq) * tq
    # Small point sets: keep the whole gt slab resident (nj == 1) so the grid
    # collapses to (b, ni) and the dist2 scratch is a single row.
    tk = n_pad if n_pad <= 4096 else tq
    pad = n_pad - n

    pred_pad = jnp.pad(pred_flat, ((0, 0), (0, 0), (0, pad)))
    gt_pad = jnp.pad(gt_flat, ((0, 0), (0, 0), (0, pad)))
    vp = jnp.pad(valid_p, ((0, 0), (0, pad)))
    vg = jnp.pad(valid_g, ((0, 0), (0, pad)))

    # Bake validity into the coordinates: invalid/padded points -> sentinel, so
    # their pairwise distances are huge and no (N,N) mask select is needed.
    pred_s = jnp.where(vp[:, None, :], pred_pad, _SENTINEL)
    gt_s = jnp.where(vg[:, None, :], gt_pad, _SENTINEL)

    p2 = jnp.sum(pred_s * pred_s, axis=1, keepdims=True)   # (B, 1, N_pad)
    g2 = jnp.sum(gt_s * gt_s, axis=1, keepdims=True)       # (B, 1, N_pad)
    ones = jnp.ones_like(p2)
    zeros3 = jnp.zeros((b, 3, n_pad), jnp.float32)

    # Fused slabs: contraction over the 8 channels yields the squared distance
    # directly (norms and -2 folded in; 3 zero channels pad to a full sublane).
    pred8 = jnp.concatenate([pred_s, p2, ones, zeros3], axis=1)       # (B, 8, N_pad)
    gt8 = jnp.concatenate([-2.0 * gt_s, ones, g2, zeros3], axis=1)    # (B, 8, N_pad)

    vp_f = vp.astype(jnp.float32)[:, None, :]              # (B, 1, N_pad) lane-dense
    vg_f = vg.astype(jnp.float32)[:, None, :]              # (B, 1, N_pad) lane-dense

    ni = n_pad // tq
    nj = n_pad // tk

    flops = int(b * ni * nj * (2 * 8 + 4) * tq * tk)
    bytes_accessed = int(b * ni * nj * 4 * 9 * (tq + tk) + b * 128 * 4)

    # TODO(synk): v7x with B==1 leaves one TensorCore idle; split the pred-tile
    # axis across the 2 cores (partial dist1 sums + per-gt-tile dist2 mins
    # combined in the wrapper) for ~2x on small batch.
    out = pl.pallas_call(
        _make_chamfer_kernel(ni, nj),
        out_shape=jax.ShapeDtypeStruct((b, 1, 128), jnp.float32),
        grid_spec=pltpu.PrefetchScalarGridSpec(
            num_scalar_prefetch=0,
            grid=(b, ni, nj),
            in_specs=[
                pl.BlockSpec((1, 8, tq), lambda bb, i, j: (bb, 0, i)),   # pred slab
                pl.BlockSpec((1, 8, tk), lambda bb, i, j: (bb, 0, j)),   # gt slab
                pl.BlockSpec((1, 1, tq), lambda bb, i, j: (bb, 0, i)),   # valid pred
                pl.BlockSpec((1, 1, tk), lambda bb, i, j: (bb, 0, j)),   # valid gt
            ],
            out_specs=pl.BlockSpec((1, 1, 128), lambda bb, i, j: (bb, 0, 0)),
            scratch_shapes=[
                pltpu.VMEM((tq, 128), jnp.float32),   # deferred dist1 running min
                pltpu.VMEM((nj, tk), jnp.float32),    # dist2 running min (lane-dense)
            ],
        ),
        compiler_params=pltpu.CompilerParams(
            dimension_semantics=("parallel", "arbitrary", "arbitrary"),
            vmem_limit_bytes=vmem_limit,
        ),
        cost_estimate=pl.CostEstimate(flops=flops, transcendentals=0,
                                      bytes_accessed=bytes_accessed),
    )(pred8, gt8, vp_f, vg_f)

    # Reference skips a sample entirely when either point set is empty.
    n_p = jnp.sum(valid_p, axis=1)
    n_g = jnp.sum(valid_g, axis=1)
    keep = jnp.logical_and(n_p > 0, n_g > 0).astype(jnp.float32)
    return jnp.sum(out[:, 0, 0] * keep) / b


def _reference_loss(pred, gt_xyz, mask, camera):
    """Pure numpy reference matching the PyTorch forward semantics."""
    pred_xyz = np.asarray(get_xyz(pred, camera["fx"], camera["fy"],
                                  camera["cx"], camera["cy"]), dtype=np.float32)
    gt = np.asarray(gt_xyz, dtype=np.float32)
    msk = np.asarray(mask)
    b = pred.shape[0]
    res = 0.0
    for i in range(b):
        bm = msk[i, 0] > 0
        p = pred_xyz[i].transpose(1, 2, 0)[bm]
        g = gt[i].transpose(1, 2, 0)[bm]
        p = p[p.sum(-1) != 0]  # ignore_zeros
        g = g[g.sum(-1) != 0]
        if p.shape[0] == 0 or g.shape[0] == 0:
            continue
        d = ((p[:, None, :] - g[None, :, :]) ** 2).sum(-1)
        res += d.min(1).sum() + d.min(0).sum()
    return res / b


if __name__ == "__main__":
    key = jax.random.PRNGKey(0)
    k1, k2, k3 = jax.random.split(key, 3)
    B, H, W = 2, 16, 16
    pred = jax.random.uniform(k1, (B, 1, H, W), jnp.float32, 0.5, 2.0)   # depth
    gt_xyz = jax.random.normal(k2, (B, 3, H, W), jnp.float32)
    mask = (jax.random.uniform(k3, (B, 1, H, W)) > 0.4).astype(jnp.float32)
    camera = {"fx": 50.0, "fy": 55.0, "cx": (W - 1) / 2.0, "cy": (H - 1) / 2.0}

    loss = jax.block_until_ready(pt_gridding_loss(pred, gt_xyz, mask, camera))
    ref = _reference_loss(pred, gt_xyz, mask, camera)
    assert np.isfinite(float(loss))
    np.testing.assert_allclose(float(loss), float(ref), rtol=2e-3, atol=1e-3)
    print("KERNEL_OK")
</pallas_src>

<mosaic_0001>
module attributes {stable_mosaic.version = 11 : i64} {
  func.func @kernel(%arg0: i32, %arg1: i32, %arg2: i32, %arg3: memref<1x8x256xf32, #tpu.memory_space<vmem>>, %arg4: memref<1x8x256xf32, #tpu.memory_space<vmem>>, %arg5: memref<1x1x256xf32, #tpu.memory_space<vmem>>, %arg6: memref<1x1x256xf32, #tpu.memory_space<vmem>>, %arg7: memref<1x1x128xf32, #tpu.memory_space<vmem>>, %arg8: memref<256x128xf32, #tpu.memory_space<vmem>>, %arg9: memref<1x256xf32, #tpu.memory_space<vmem>>) attributes {dimension_semantics = [#tpu.dimension_semantics<parallel>, #tpu.dimension_semantics<arbitrary>, #tpu.dimension_semantics<arbitrary>], iteration_bounds = array<i64: 2, 1, 1>, scalar_prefetch = 0 : i64, scratch_operands = 2 : i64, tpu.core_type = #tpu.core_type<tc>, window_params = [{transform_indices = @transform_0, window_bounds = array<i64: 1, 8, 256>}, {transform_indices = @transform_1, window_bounds = array<i64: 1, 8, 256>}, {transform_indices = @transform_2, window_bounds = array<i64: 1, 1, 256>}, {transform_indices = @transform_3, window_bounds = array<i64: 1, 1, 256>}, {transform_indices = @transform_4, window_bounds = array<i64: 1, 1, 128>}]} {
    %c0_i32 = arith.constant 0 : i32
    %0 = arith.cmpi eq, %arg1, %c0_i32 : i32
    %c0_i32_0 = arith.constant 0 : i32
    %1 = arith.cmpi eq, %arg2, %c0_i32_0 : i32
    %2 = arith.andi %0, %1 : i1
    %3 = arith.extui %2 : i1 to i32
    %c0_i32_1 = arith.constant 0 : i32
    %4 = arith.cmpi ne, %3, %c0_i32_1 : i32
    scf.if %4 {
      %cst_23 = arith.constant 0.000000e+00 : f32
      %32 = vector.broadcast %cst_23 : f32 to vector<1x1x128xf32>
      %c0_24 = arith.constant 0 : index
      %c0_25 = arith.constant 0 : index
      %c0_26 = arith.constant 0 : index
      %33 = vector.load %arg7[%c0_24, %c0_25, %c0_26] : memref<1x1x128xf32, #tpu.memory_space<vmem>>, vector<1x1x128xf32>
      tpu.vector_store %arg7[%c0_24, %c0_25, %c0_26], %32 {strides = array<i32>} : memref<1x1x128xf32, #tpu.memory_space<vmem>>, vector<1x1x128xf32>,
      %cst_27 = arith.constant 1.000000e+30 : f32
      %34 = vector.broadcast %cst_27 : f32 to vector<1x256xf32>
      %c0_28 = arith.constant 0 : index
      %c0_29 = arith.constant 0 : index
      %35 = vector.load %arg9[%c0_28, %c0_29] : memref<1x256xf32, #tpu.memory_space<vmem>>, vector<1x256xf32>
      tpu.vector_store %arg9[%c0_28, %c0_29], %34 {strides = array<i32>} : memref<1x256xf32, #tpu.memory_space<vmem>>, vector<1x256xf32>,
    } else {
    }
    %c0_i32_2 = arith.constant 0 : i32
    %5 = arith.cmpi eq, %arg2, %c0_i32_2 : i32
    %6 = arith.extui %5 : i1 to i32
    %c0_i32_3 = arith.constant 0 : i32
    %7 = arith.cmpi ne, %6, %c0_i32_3 : i32
    scf.if %7 {
      %cst_23 = arith.constant 1.000000e+30 : f32
      %32 = vector.broadcast %cst_23 : f32 to vector<256x128xf32>
      %c0_24 = arith.constant 0 : index
      %c0_25 = arith.constant 0 : index
      %33 = vector.load %arg8[%c0_24, %c0_25] : memref<256x128xf32, #tpu.memory_space<vmem>>, vector<256x128xf32>
      tpu.vector_store %arg8[%c0_24, %c0_25], %32 {strides = array<i32>} : memref<256x128xf32, #tpu.memory_space<vmem>>, vector<256x128xf32>,
    } else {
    }
    %c0 = arith.constant 0 : index
    %c0_4 = arith.constant 0 : index
    %c0_5 = arith.constant 0 : index
    %8 = vector.load %arg3[%c0, %c0_4, %c0_5] : memref<1x8x256xf32, #tpu.memory_space<vmem>>, vector<1x8x256xf32>
    %9 = vector.shape_cast %8 : vector<1x8x256xf32> to vector<8x256xf32>
    %c0_6 = arith.constant 0 : index
    %c0_7 = arith.constant 0 : index
    %c0_8 = arith.constant 0 : index
    %10 = vector.load %arg4[%c0_6, %c0_7, %c0_8] : memref<1x8x256xf32, #tpu.memory_space<vmem>>, vector<1x8x256xf32>
    %11 = vector.shape_cast %10 : vector<1x8x256xf32> to vector<8x256xf32>
    %cst = arith.constant dense<0.000000e+00> : vector<256x256xf32>
    %12 = tpu.matmul %9, %11, %cst {dimension_numbers = #tpu.dot_dimension_numbers<[0], [0], [1], [1], [0, 1, 1, 1], [], []>, precision = #tpu.contract_precision<fp32>} : vector<8x256xf32>, vector<8x256xf32>, vector<256x256xf32> -> vector<256x256xf32>
    %cst_9 = arith.constant 0.000000e+00 : f32
    %13 = vector.broadcast %cst_9 : f32 to vector<256x256xf32>
    %14 = arith.maximumf %12, %13 : vector<256x256xf32>
    %15 = vector.extract_strided_slice %14 {offsets = [0, 0], sizes = [256, 128], strides = [1, 1]} : vector<256x256xf32> to vector<256x128xf32>
    %16 = vector.extract_strided_slice %14 {offsets = [0, 128], sizes = [256, 128], strides = [1, 1]} : vector<256x256xf32> to vector<256x128xf32>
    %17 = arith.minimumf %15, %16 : vector<256x128xf32>
    %c0_10 = arith.constant 0 : index
    %c0_11 = arith.constant 0 : index
    %18 = vector.load %arg8[%c0_10, %c0_11] : memref<256x128xf32, #tpu.memory_space<vmem>>, vector<256x128xf32>
    %19 = arith.minimumf %18, %17 : vector<256x128xf32>
    %c0_12 = arith.constant 0 : index
    %c0_13 = arith.constant 0 : index
    %20 = vector.load %arg8[%c0_12, %c0_13] : memref<256x128xf32, #tpu.memory_space<vmem>>, vector<256x128xf32>
    tpu.vector_store %arg8[%c0_12, %c0_13], %19 {strides = array<i32>} : memref<256x128xf32, #tpu.memory_space<vmem>>, vector<256x128xf32>,
    %cst_14 = arith.constant dense<0x7F800000> : vector<256xf32>
    %21 = vector.multi_reduction <minimumf>, %14, %cst_14 [0] : vector<256x256xf32> to vector<256xf32>
    %22 = vector.shape_cast %21 : vector<256xf32> to vector<1x256xf32>
    %c0_15 = arith.constant 0 : index
    %c0_16 = arith.constant 0 : index
    %23 = vector.load %arg9[%c0_15, %c0_16] : memref<1x256xf32, #tpu.memory_space<vmem>>, vector<1x256xf32>
    %24 = arith.minimumf %23, %22 : vector<1x256xf32>
    %c0_17 = arith.constant 0 : index
    %c0_18 = arith.constant 0 : index
    %25 = vector.load %arg9[%c0_17, %c0_18] : memref<1x256xf32, #tpu.memory_space<vmem>>, vector<1x256xf32>
    tpu.vector_store %arg9[%c0_17, %c0_18], %24 {strides = array<i32>} : memref<1x256xf32, #tpu.memory_space<vmem>>, vector<1x256xf32>,
    %c0_i32_19 = arith.constant 0 : i32
    %26 = arith.cmpi eq, %arg2, %c0_i32_19 : i32
    %27 = arith.extui %26 : i1 to i32
    %c0_i32_20 = arith.constant 0 : i32
    %28 = arith.cmpi ne, %27, %c0_i32_20 : i32
    scf.if %28 {
      %c0_23 = arith.constant 0 : index
      %c0_24 = arith.constant 0 : index
      %32 = vector.load %arg8[%c0_23, %c0_24] : memref<256x128xf32, #tpu.memory_space<vmem>>, vector<256x128xf32>
      %cst_25 = arith.constant dense<0x7F800000> : vector<256xf32>
      %33 = vector.multi_reduction <minimumf>, %32, %cst_25 [1] : vector<256x128xf32> to vector<256xf32>
      %34 = vector.shape_cast %33 : vector<256xf32> to vector<256x1xf32>
      %c0_26 = arith.constant 0 : index
      %c0_27 = arith.constant 0 : index
      %c0_28 = arith.constant 0 : index
      %35 = vector.load %arg5[%c0_26, %c0_27, %c0_28] : memref<1x1x256xf32, #tpu.memory_space<vmem>>, vector<1x1x256xf32>
      %36 = vector.shape_cast %35 : vector<1x1x256xf32> to vector<1x256xf32>
      %cst_29 = arith.constant dense<0.000000e+00> : vector<1x1xf32>
      %37 = tpu.matmul %36, %34, %cst_29 {dimension_numbers = #tpu.dot_dimension_numbers<[1], [0], [0], [1], [0, 0, 1, 1], [], []>, precision = #tpu.contract_precision<fp32>} : vector<1x256xf32>, vector<256x1xf32>, vector<1x1xf32> -> vector<1x1xf32>
      %c0_30 = arith.constant 0 : index
      %c0_31 = arith.constant 0 : index
      %c0_32 = arith.constant 0 : index
      %38 = vector.load %arg7[%c0_30, %c0_31, %c0_32] : memref<1x1x128xf32, #tpu.memory_space<vmem>>, vector<1x1x128xf32>
      %39 = vector.shape_cast %37 : vector<1x1xf32> to vector<1x1x1xf32>
      %40 = vector.shape_cast %39 : vector<1x1x1xf32> to vector<1x1x1xf32>
      %41 = vector.broadcast %40 : vector<1x1x1xf32> to vector<1x1x128xf32>
      %42 = arith.addf %38, %41 : vector<1x1x128xf32>
      %c0_33 = arith.constant 0 : index
      %c0_34 = arith.constant 0 : index
      %c0_35 = arith.constant 0 : index
      %43 = vector.load %arg7[%c0_33, %c0_34, %c0_35] : memref<1x1x128xf32, #tpu.memory_space<vmem>>, vector<1x1x128xf32>
      tpu.vector_store %arg7[%c0_33, %c0_34, %c0_35], %42 {strides = array<i32>} : memref<1x1x128xf32, #tpu.memory_space<vmem>>, vector<1x1x128xf32>,
    } else {
    }
    %c0_i32_21 = arith.constant 0 : i32
    %29 = arith.cmpi eq, %arg1, %c0_i32_21 : i32
    %30 = arith.extui %29 : i1 to i32
    %c0_i32_22 = arith.constant 0 : i32
    %31 = arith.cmpi ne, %30, %c0_i32_22 : i32
    scf.if %31 {
      %c0_23 = arith.constant 0 : index
      %c0_24 = arith.constant 0 : index
      %c0_25 = arith.constant 0 : index
      %32 = vector.load %arg6[%c0_23, %c0_24, %c0_25] : memref<1x1x256xf32, #tpu.memory_space<vmem>>, vector<1x1x256xf32>
      %33 = vector.shape_cast %32 : vector<1x1x256xf32> to vector<1x256xf32>
      %cst_26 = arith.constant 0.000000e+00 : f32
      %34 = vector.broadcast %cst_26 : f32 to vector<1x256xf32>
      %35 = arith.cmpf ogt, %33, %34 : vector<1x256xf32>
      %cst_27 = arith.constant 0.000000e+00 : f32
      %36 = vector.broadcast %cst_27 : f32 to vector<1x256xf32>
      %37 = arith.select %35, %24, %36 : vector<1x256xi1>, vector<1x256xf32>
      %cst_28 = arith.constant dense<0.000000e+00> : vector<1xf32>
      %38 = vector.multi_reduction <add>, %37, %cst_28 [1] : vector<1x256xf32> to vector<1xf32>
      %39 = vector.shape_cast %38 : vector<1xf32> to vector<1x1xf32>
      %c0_29 = arith.constant 0 : index
      %c0_30 = arith.constant 0 : index
      %c0_31 = arith.constant 0 : index
      %40 = vector.load %arg7[%c0_29, %c0_30, %c0_31] : memref<1x1x128xf32, #tpu.memory_space<vmem>>, vector<1x1x128xf32>
      %41 = vector.shape_cast %39 : vector<1x1xf32> to vector<1x1x1xf32>
      %42 = vector.shape_cast %41 : vector<1x1x1xf32> to vector<1x1x1xf32>
      %43 = vector.broadcast %42 : vector<1x1x1xf32> to vector<1x1x128xf32>
      %44 = arith.addf %40, %43 : vector<1x1x128xf32>
      %c0_32 = arith.constant 0 : index
      %c0_33 = arith.constant 0 : index
      %c0_34 = arith.constant 0 : index
      %45 = vector.load %arg7[%c0_32, %c0_33, %c0_34] : memref<1x1x128xf32, #tpu.memory_space<vmem>>, vector<1x1x128xf32>
      tpu.vector_store %arg7[%c0_32, %c0_33, %c0_34], %44 {strides = array<i32>} : memref<1x1x128xf32, #tpu.memory_space<vmem>>, vector<1x1x128xf32>,
    } else {
    }
    return
  }
  func.func @transform_0(%arg0: i32, %arg1: i32, %arg2: i32) -> (i32, i32, i32) {
    %c0_i32 = arith.constant 0 : i32
    %c0_i32_0 = arith.constant 0 : i32
    return %arg0, %c0_i32, %arg1 : i32, i32, i32
  }
  func.func @transform_1(%arg0: i32, %arg1: i32, %arg2: i32) -> (i32, i32, i32) {
    %c0_i32 = arith.constant 0 : i32
    %c0_i32_0 = arith.constant 0 : i32
    return %arg0, %c0_i32, %arg2 : i32, i32, i32
  }
  func.func @transform_2(%arg0: i32, %arg1: i32, %arg2: i32) -> (i32, i32, i32) {
    %c0_i32 = arith.constant 0 : i32
    %c0_i32_0 = arith.constant 0 : i32
    return %arg0, %c0_i32, %arg1 : i32, i32, i32
  }
  func.func @transform_3(%arg0: i32, %arg1: i32, %arg2: i32) -> (i32, i32, i32) {
    %c0_i32 = arith.constant 0 : i32
    %c0_i32_0 = arith.constant 0 : i32
    return %arg0, %c0_i32, %arg2 : i32, i32, i32
  }
  func.func @transform_4(%arg0: i32, %arg1: i32, %arg2: i32) -> (i32, i32, i32) {
    %c0_i32 = arith.constant 0 : i32
    %c0_i32_0 = arith.constant 0 : i32
    %c0_i32_1 = arith.constant 0 : i32
    return %arg0, %c0_i32, %c0_i32_0 : i32, i32, i32
  }
}

</mosaic_0001>

<bundles_post_ra>
// kernel: tpu_custom_call.1
= control target key start
LH: loop header
LB: loop body
LE: loop exit
PB: predicated region body
PF: predicated region fallthrough
CT: control target
= control target key end

     0   :  { %s6352_s0 = inlined_call_operand.hbm [shape: f32[2,8,256], index: 0, kind: input, shape index: {}]   ;;  %s6353_s1 = inlined_call_operand.hbm [shape: f32[2,8,256], index: 1, kind: input, shape index: {}]   ;;  %s6354_s2 = inlined_call_operand.hbm [shape: f32[2,1,256], index: 2, kind: input, shape index: {}]   ;;  %s6355_s3 = inlined_call_operand.hbm [shape: f32[2,1,256], index: 3, kind: input, shape index: {}]   ;;  %s6356_s4 = inlined_call_operand.hbm [shape: f32[2,1,128], index: 4, kind: output, shape index: {}]  }
   0x1   :  { %6505 = sst [smem:[#allocation124_spill]] %s6353_s1 }
   0x2   :  { %9 = vsyncpa [#allocation5], 0 }
   0x3   :  { %11 = vsyncpa [#allocation5 + $0x1], 0 }
   0x4   :  { %12 = vsyncpa [#allocation8], 0 }
   0x5   :  { %14 = vsyncpa [#allocation8 + $0x1], 0 }
   0x6   :  { %15 = vsyncpa [#allocation11], 0 }
   0x7   :  { %17 = vsyncpa [#allocation11 + $0x1], 0 }
   0x8   :  { %18 = vsyncpa [#allocation6], 0 }
   0x9   :  { %20 = vsyncpa [#allocation6 + $0x1], 0  ;;  %s4399_s15 = smov 0   ;;  %s4401_s16 = smov 0  }
   0xa   :  { %s4403_s17 = smov 0   ;;  %s4405_s18 = smov 0  }
   0xb   :  { %s4407_s19 = smov 0   ;;  %s4409_s20 = smov 0  }
   0xc LB: > { %6506 = sst [smem:[#allocation17_spill]] %s4357_s17  ;;  %s4430_s21 = sadd.s32 4294967295, %s4369_s20   ;;  %s4369_s20 = sphi %s4409_s20, %s26_s20   ;;  %s4365_s19 = sphi %s4407_s19, %s6812_s19   ;;  %s4361_s18 = sphi %s4405_s18, %s6811_s18   ;;  %s4357_s17 = sphi %s4403_s17, %s6807_s17   ;;  %s4353_s16 = sphi %s4401_s16, %s6810_s16   ;;  %s4349_s15 = sphi %s4399_s15, %s6809_s15  }
   0xd   : > { %6507 = sst [smem:[#allocation18_spill]] %s4369_s20  ;;  %s4055_s22 = sadd.s32 4294967294, %s4369_s20  }
   0xe   : > { %s45_s23 = sadd.s32 1, %s4365_s19  ;;  %s54_s24 = sadd.s32 1, %s4357_s17 }
   0xf   : > { %p47_p0 = scmp.ge.s32.totalorder %s45_s23, 2  ;;  %p61_p1 = scmp.ne.s32.totalorder %s4357_s17, %s4353_s16 }
  0x10   : > { %p62_p2 = scmp.eq.s32.totalorder %s4369_s20, 0  ;;  %p67_p3 = scmp.ne.s32.totalorder %s4353_s16, %s4349_s15 }
  0x11   : > { %s6814_s23 = smov (%p47_p0, %s45_s23), 0  ;;  %p68_p5 = scmp.eq.s32.totalorder %s4430_s21, 0 }
  0x12   : > { %6508 = sst [smem:[#allocation19_spill]] %s6814_s23  ;;  %p4442_p4 = por %p62_p2, %p61_p1 }
  0x13   : > { %s49_s26 = ssub.s32 %s4365_s19, %s6814_s23  ;;  %p175_p6 = scmp.eq.s32.totalorder %s4430_s21, 1 }
  0x14   : > { %p52_p7 = scmp.eq.s32.totalorder %s49_s26, 0  ;;  %p4450_p8 = por %p68_p5, %p67_p3 }
  0x15   : > { %p4454_p9 = por %p175_p6, %p61_p1  ;;  %p181_p10 = scmp.eq.s32.totalorder %s4055_s22, 1 }
  0x16   : > { %s4459_s29 = scalar_select %p52_p7, %s4357_s17, %s54_s24  }
  0x17   : > { %p4461_p11 = por %p181_p10, %p67_p3  ;;  %p4057_p12 = scmp.ge.s32.totalorder %s4369_s20, 2 }
  0x18   : > { %6512 = sst [smem:[#allocation20_spill]] %s4459_s29  ;;  %p4104_p13 = scmp.lt.s32.totalorder %s4369_s20, 2 }
  0x19   : > { %s4468_s5 = sand.u32 1, %s4357_s17   ;;  %s4075_s7 = sshll.u32 %s4365_s19, 4 }
  0x1a   : > { %s4058_s6 = sshll.u32 %s4468_s5, 4  ;;  %p4474_p0 = pnand %p4104_p13, %p4442_p4 }
  0x1b   : > { %s223_s9 = sand.u32 1, %s4369_s20   ;;  %s6515_s1 = sld [smem:[#allocation124_spill]] }
  0x1c   : > { %s227_s14 = scalar_lea.vmem [#allocation7], %s4058_s6  ;;  %s224_s24 = scalar_lea.sflag [#allocation8], %s223_s9 }
  0x1d   : > { %s238_s22 = sshll.u32 %s227_s14, 4  ;;  %p4068_p1 = scmp.ge.s32.totalorder %s4369_s20, 1  ;;  %s239_s22 = int_to_ptr.vmem [resolvable:$true] %s238_s22 }
  0x1e   : > { %p285_p2 = scmp.lt.s32.totalorder %s4369_s20, 3  ;;  %s212_s11 = scalar_lea.hbm %s6352_s0, %s4075_s7 }
  0x1f   : > { %s205_s14 = scalar_lea.vmem [#allocation4], %s4058_s6  ;;  %s202_s23 = scalar_lea.sflag [#allocation5], %s4468_s5 }
  0x20   : > { %p4486_p3 = pnand %p4068_p1, %p285_p2  ;;  %s4064_s9 = sshll.u32 %s4468_s5, 1 }
  0x21   : > { %s234_s12 = scalar_lea.hbm %s6515_s1, %s4075_s7  ;;  %s216_s1 = sshll.u32 %s205_s14, 4  ;;  %s217_s1 = int_to_ptr.vmem [resolvable:$true] %s216_s1 }
  0x22   : > { %s236_s13 = sshll.u32 %s234_s12, 4  ;;  %s214_s12 = sshll.u32 %s212_s11, 4  ;;  %s237_s13 = int_to_ptr.hbm [resolvable:$true] %s236_s13  ;;  %s215_s12 = int_to_ptr.hbm [resolvable:$true] %s214_s12 }
  0x23   : > { %4093 = dma.hbm_to_vmem [thread:$0]  (!%p4474_p0), %s237_s13, 256, %s239_s22, %s224_s24  }
  0x24   : > { %4090 = dma.hbm_to_vmem [thread:$0]  (!%p4474_p0), %s215_s12, 256, %s217_s1, %s202_s23  }
  0x25   : > { %s4065_s13 = sshll.u32 %s4365_s19, 1  ;;  %s249_s26 = scalar_lea.vmem [#allocation9], %s4064_s9 }
  0x26   : > { %s255_s17 = scalar_lea.hbm %s6354_s2, %s4065_s13  ;;  %s259_s7 = sshll.u32 %s249_s26, 4  ;;  %s260_s7 = int_to_ptr.vmem [resolvable:$true] %s259_s7 }
  0x27   : > { %s257_s20 = sshll.u32 %s255_s17, 4  ;;  %s276_s11 = scalar_lea.hbm %s6355_s3, %s4065_s13  ;;  %s258_s20 = int_to_ptr.hbm [resolvable:$true] %s257_s20 }
  0x28   : > { %4096 = dma.hbm_to_vmem [thread:$0]  (!%p4474_p0), %s258_s20, 32, %s260_s7, %s224_s24  }
  0x29   : > { %s270_s1 = scalar_lea.vmem [#allocation10], %s4064_s9  ;;  %s278_s12 = sshll.u32 %s276_s11, 4  ;;  %s279_s12 = int_to_ptr.hbm [resolvable:$true] %s278_s12 }
  0x2a   : > { %s280_s23 = sshll.u32 %s270_s1, 4  ;;  %s267_s14 = scalar_lea.sflag [#allocation11], %s4468_s5  ;;  %s281_s23 = int_to_ptr.vmem [resolvable:$true] %s280_s23 }
  0x2b   : > { %4099 = dma.hbm_to_vmem [thread:$0]  (!%p4474_p0), %s279_s12, 32, %s281_s23, %s267_s14  }
  0x2c   : > { %289 = sbr.rel (%p4486_p3) target bundleno = 1596 (0x63c), region = 36 }
  0x31   : > { %s4512_s17 = sand.u32 1, %s4353_s16  }
  0x32   : > { %s4069_s20 = sshll.u32 %s4512_s17, 4  ;;  %s292_s29 = scalar_lea.sflag [#allocation5], %s4512_s17 }
  0x33   : > { %s295_s24 = scalar_lea.vmem [#allocation4], %s4069_s20 }
  0x34   : > { %4332 = dma.done.wait (%p4450_p8), %s292_s29, 256  }
  0x35   : > { %4334 = vsyncadd (%p4450_p8), %s292_s29, 4294967040  ;;  %s301_s5 = sand.u32 1, %s4430_s21   ;;  %s4521_s25 = scalar_lea.vmem [#allocation7], %s4069_s20 }
  0x36   : > { %s302_s8 = scalar_lea.sflag [#allocation8], %s301_s5 }
  0x37   : > { %4336 = dma.done.wait (%p4450_p8), %s302_s8, 288  }
  0x38   : > { %4338 = vsyncadd (%p4450_p8), %s302_s8, 4294967008  ;;  %s4071_s9 = sshll.u32 %s4512_s17, 1  ;;  %s322_s22 = scalar_lea.sflag [#allocation11], %s4512_s17 }
  0x39   : > { %s4528_s13 = scalar_lea.vmem [#allocation9], %s4071_s9  ;;  %s4531_s26 = scalar_lea.vmem [#allocation10], %s4071_s9 }
  0x3a   : > { %4340 = dma.done.wait (%p4450_p8), %s322_s22, 32  }
  0x3b   : > { %4342 = vsyncadd (%p4450_p8), %s322_s22, 4294967264  ;;  %v416_v0 = vld [vmem:[%s295_s24] sm:$0xff]  ;;  %v417_v2 = vld [vmem:[%s295_s24 + $0x8] sm:$0xff]  ;;  %vm484_vm0 = vcmask 64512   ;;  %vm3065_vm2 = vcmask 1040384   ;;  %s6306_s21 = scalar_lea.vmem [#allocation12], %s4512_s17  ;;  %s3897_s6 = scalar_lea.hbm %s6356_s4, %s4361_s18 }
  0x3c   : > { %420 = vxpose.xlu0.b32.start.end [1/1] (short) %v416_v0, 128  ;;  %v418_v1 = vld [vmem:[%s4521_s25] sm:$0xff]  ;;  %s3899_s10 = sshll.u32 %s6306_s21, 4  ;;  %s3901_s11 = sshll.u32 %s3897_s6, 4  ;;  %s3900_s10 = int_to_ptr.vmem [resolvable:$true] %s3899_s10  ;;  %s3902_s11 = int_to_ptr.hbm [resolvable:$true] %s3901_s11 }
  0x3d   : > { %v596_v3 = vand.u32 4294901760, %v418_v1  ;;  %s3889_s1 = scalar_lea.sflag [#allocation6], %s4512_s17  ;;  %s4293_s23 = sshra.s32 %s3902_s11, 4  ;;  %s4294_s23 = int_to_ptr.hbm [resolvable:$true] %s4293_s23 }
  0x3e   : > { %s4295_s12 = scalar_lea.hbm %s4294_s23, 1  ;;  %s4299_s18 = scalar_lea.hbm %s6356_s4, 2 }
  0x3f   : > { %v871_v4 = vsub.f32 %v418_v1, %v596_v3  ;;  %1200 = vmatpush.msra.mxu3 %v596_v3  ;;  %597 = vmatpush.msra.mxu0 %v596_v3  ;;  %p4296_p4 = scmp.ne.s32.totalorder %s4294_s23, %s4295_s12  ;;  %p4300_p7 = scmp.lt.s32.totalorder %s4294_s23, %s6356_s4 }
  0x40   : > { %p4301_p8 = scmp.lt.s32.totalorder %s4299_s18, %s4295_s12 }
  0x41   : > { %v872_v5 = vand.u32 4294901760, %v871_v4  ;;  %1022 = vmatpush.msra.mxu2 %v871_v4  ;;  %p4297_p5 = pnand %p4296_p4, %p4454_p9 }
  0x42   : > { %p4302_p10 = por %p4301_p8, %p4300_p7 }
  0x43   : > { %v873_v6 = vsub.f32 %v871_v4, %v872_v5  ;;  %1412 = vmatpush.msrb.mxu0 %v872_v5  ;;  %p4298_p6 = pneg %p4297_p5 }
  0x45   : > { %v874_v7 = vand.u32 4294901760, %v873_v6  ;;  %p4303_p13 = pnand %p4302_p10, %p4298_p6 }
  0x47   : > { %875 = vmatpush.msra.mxu1 %v874_v7 }
  0x49   : > { %1558 = vmatpush.msrb.mxu1 %v596_v3 }
  0xbc   : > { %452 = vxpose.xlu0.b32.start.end [1/1] (short) %v417_v2, 128 }
  0xe0   : > { %v436_v8 = vpop.trf.xlu0 }
  0xe1   : > { %v486_v9 = vsel %vm484_vm0, %v436_v8, 0 }
  0xe2   : > { %v4539_v10 = vand.u32 4294901760, %v486_v9 }
  0xe4   : > { %v4542_v11 = vsub.f32 %v486_v9, %v4539_v10  ;;  %877 = vmatmul.f32.vlgmr.msra.gmra.mxu1 %v4539_v10 }
  0xe6   : > { %6517 = vst [vmem:[#allocation21_spill] sm:$0xff] %v4542_v11  ;;  %1025 = vmatmul.f32.vlgmr.msra.gmra.mxu2 %v4542_v11  ;;  %v4547_v12 = vand.u32 4294901760, %v4542_v11 }
  0xe8   : > { %6518 = vst [vmem:[#allocation22_spill] sm:$0xff] %v4547_v12  ;;  %1204 = vmatmul.f32.vlgmr.msra.gmra.mxu3 %v4547_v12  ;;  %v437_v13 = vpop.trf.xlu0  ;;  %v601_v14 = vsub.f32 %v4542_v11, %v4547_v12 }
  0xe9   : > { %v489_v15 = vsel %vm484_vm0, %v437_v13, 0 }
  0xea   : > { %v4553_v16 = vand.u32 4294901760, %v489_v15  ;;  %v4555_v17 = vand.u32 4294901760, %v601_v14 }
  0xec   : > { %v4558_v18 = vsub.f32 %v489_v15, %v4553_v16  ;;  %603 = vmatmul.f32.vlgmr.msra.gmra.mxu0 %v4555_v17  ;;  %881 = vmatmul.f32.gmra.mxu1 %v4553_v16 }
  0xee   : > { %6519 = vst [vmem:[#allocation23_spill] sm:$0xff] %v4558_v18  ;;  %1030 = vmatmul.f32.gmra.mxu2 %v4558_v18  ;;  %v4564_v19 = vand.u32 4294901760, %v4558_v18 }
  0xf0   : > { %6520 = vst [vmem:[#allocation24_spill] sm:$0xff] %v4564_v19  ;;  %1210 = vmatmul.f32.gmra.mxu3 %v4564_v19  ;;  %v438_v20 = vpop.trf.xlu0  ;;  %v609_v21 = vsub.f32 %v4558_v18, %v4564_v19 }
  0xf1   : > { %v492_v22 = vsel %vm484_vm0, %v438_v20, 0 }
  0xf2   : > { %v4570_v23 = vand.u32 4294901760, %v492_v22  ;;  %v4572_v24 = vand.u32 4294901760, %v609_v21 }
  0xf4   : > { %v4575_v25 = vsub.f32 %v492_v22, %v4570_v23  ;;  %611 = vmatmul.f32.gmra.mxu0 %v4572_v24  ;;  %885 = vmatmul.f32.gmra.mxu1 %v4570_v23 }
  0xf6   : > { %6521 = vst [vmem:[#allocation25_spill] sm:$0xff] %v4575_v25  ;;  %1035 = vmatmul.f32.gmra.mxu2 %v4575_v25  ;;  %v4581_v26 = vand.u32 4294901760, %v4575_v25 }
  0xf8   : > { %6522 = vst [vmem:[#allocation26_spill] sm:$0xff] %v4581_v26  ;;  %1216 = vmatmul.f32.gmra.mxu3 %v4581_v26  ;;  %v439_v27 = vpop.trf.xlu0  ;;  %v617_v28 = vsub.f32 %v4575_v25, %v4581_v26 }
  0xf9   : > { %v495_v29 = vsel %vm484_vm0, %v439_v27, 0 }
  0xfa   : > { %v4587_v30 = vand.u32 4294901760, %v495_v29  ;;  %v4589_v31 = vand.u32 4294901760, %v617_v28 }
  0xfc   : > { %v4592_v32 = vsub.f32 %v495_v29, %v4587_v30  ;;  %619 = vmatmul.f32.gmra.mxu0 %v4589_v31  ;;  %889 = vmatmul.f32.gmra.mxu1 %v4587_v30 }
  0xfe   : > { %6523 = vst [vmem:[#allocation27_spill] sm:$0xff] %v4592_v32  ;;  %1040 = vmatmul.f32.gmra.mxu2 %v4592_v32  ;;  %v4598_v33 = vand.u32 4294901760, %v4592_v32 }
 0x100   : > { %6524 = vst [vmem:[#allocation28_spill] sm:$0xff] %v4598_v33  ;;  %1222 = vmatmul.f32.gmra.mxu3 %v4598_v33  ;;  %v440_v34 = vpop.trf.xlu0  ;;  %v625_v35 = vsub.f32 %v4592_v32, %v4598_v33 }
 0x101   : > { %v498_v36 = vsel %vm484_vm0, %v440_v34, 0 }
 0x102   : > { %v4604_v37 = vand.u32 4294901760, %v498_v36  ;;  %v4606_v38 = vand.u32 4294901760, %v625_v35 }
 0x104   : > { %v4609_v39 = vsub.f32 %v498_v36, %v4604_v37  ;;  %627 = vmatmul.f32.gmra.mxu0 %v4606_v38  ;;  %893 = vmatmul.f32.gmra.mxu1 %v4604_v37 }
 0x106   : > { %6525 = vst [vmem:[#allocation29_spill] sm:$0xff] %v4609_v39  ;;  %1045 = vmatmul.f32.gmra.mxu2 %v4609_v39  ;;  %v4615_v40 = vand.u32 4294901760, %v4609_v39 }
 0x108   : > { %6526 = vst [vmem:[#allocation30_spill] sm:$0xff] %v4615_v40  ;;  %1228 = vmatmul.f32.gmra.mxu3 %v4615_v40  ;;  %v441_v41 = vpop.trf.xlu0  ;;  %v633_v42 = vsub.f32 %v4609_v39, %v4615_v40 }
 0x109   : > { %v501_v43 = vsel %vm484_vm0, %v441_v41, 0 }
 0x10a   : > { %v4621_v44 = vand.u32 4294901760, %v501_v43  ;;  %v4623_v45 = vand.u32 4294901760, %v633_v42 }
 0x10c   : > { %v4626_v46 = vsub.f32 %v501_v43, %v4621_v44  ;;  %635 = vmatmul.f32.gmra.mxu0 %v4623_v45  ;;  %897 = vmatmul.f32.gmra.mxu1 %v4621_v44 }
 0x10e   : > { %6527 = vst [vmem:[#allocation31_spill] sm:$0xff] %v4626_v46  ;;  %1050 = vmatmul.f32.gmra.mxu2 %v4626_v46  ;;  %v4632_v47 = vand.u32 4294901760, %v4626_v46 }
 0x110   : > { %6528 = vst [vmem:[#allocation32_spill] sm:$0xff] %v4632_v47  ;;  %1234 = vmatmul.f32.gmra.mxu3 %v4632_v47  ;;  %v442_v48 = vpop.trf.xlu0  ;;  %v641_v49 = vsub.f32 %v4626_v46, %v4632_v47 }
 0x111   : > { %v504_v50 = vsel %vm484_vm0, %v442_v48, 0  ;;  %v419_v48 = vld [vmem:[%s4521_s25 + $0x8] sm:$0xff] }
 0x112   : > { %v4638_v51 = vand.u32 4294901760, %v504_v50  ;;  %v4640_v52 = vand.u32 4294901760, %v641_v49  ;;  %v1703_v49 = vand.u32 4294901760, %v419_v48 }
 0x114   : > { %v4643_v53 = vsub.f32 %v504_v50, %v4638_v51  ;;  %643 = vmatmul.f32.gmra.mxu0 %v4640_v52  ;;  %901 = vmatmul.f32.gmra.mxu1 %v4638_v51 }
 0x115   : > { %1704 = vmatpush.msrb.mxu2 %v1703_v49  ;;  %2307 = vmatpush.msra.mxu1 %v1703_v49 }
 0x116   : > { %6529 = vst [vmem:[#allocation33_spill] sm:$0xff] %v4643_v53  ;;  %1055 = vmatmul.f32.gmra.mxu2 %v4643_v53  ;;  %v4649_v54 = vand.u32 4294901760, %v4643_v53 }
 0x118   : > { %6530 = vst [vmem:[#allocation34_spill] sm:$0xff] %v4649_v54  ;;  %1240 = vmatmul.f32.gmra.mxu3 %v4649_v54  ;;  %v443_v55 = vpop.trf.xlu0  ;;  %v649_v56 = vsub.f32 %v4643_v53, %v4649_v54 }
 0x119   : > { %v507_v57 = vsel %vm484_vm0, %v443_v55, 0  ;;  %v1978_v55 = vsub.f32 %v419_v48, %v1703_v49 }
 0x11a   : > { %v4655_v58 = vand.u32 4294901760, %v507_v57  ;;  %v4657_v59 = vand.u32 4294901760, %v649_v56 }
 0x11b   : > { %2129 = vmatpush.msra.mxu0 %v1978_v55 }
 0x11c   : > { %v4660_v60 = vsub.f32 %v507_v57, %v4655_v58  ;;  %651 = vmatmul.f32.gmra.mxu0 %v4657_v59  ;;  %905 = vmatmul.f32.gmra.mxu1 %v4655_v58 }
 0x11e   : > { %6531 = vst [vmem:[#allocation35_spill] sm:$0xff] %v4660_v60  ;;  %1060 = vmatmul.f32.gmra.mxu2 %v4660_v60  ;;  %v4666_v61 = vand.u32 4294901760, %v4660_v60 }
 0x120   : > { %6532 = vst [vmem:[#allocation36_spill] sm:$0xff] %v4666_v61  ;;  %1246 = vmatmul.f32.gmra.mxu3 %v4666_v61  ;;  %v444_v62 = vpop.trf.xlu0  ;;  %v657_v63 = vsub.f32 %v4660_v60, %v4666_v61 }
 0x121   : > { %v510_v0 = vsel %vm484_vm0, %v444_v62, 0 }
 0x122   : > { %v4672_v1 = vand.u32 4294901760, %v510_v0  ;;  %v4674_v2 = vand.u32 4294901760, %v657_v63  ;;  %v1979_v63 = vand.u32 4294901760, %v1978_v55 }
 0x124   : > { %v4677_v3 = vsub.f32 %v510_v0, %v4672_v1  ;;  %659 = vmatmul.f32.gmra.mxu0 %v4674_v2  ;;  %909 = vmatmul.f32.gmra.mxu1 %v4672_v1 }
 0x125   : > { %2519 = vmatpush.msra.mxu2 %v1979_v63 }
 0x126   : > { %6533 = vst [vmem:[#allocation37_spill] sm:$0xff] %v4677_v3  ;;  %1065 = vmatmul.f32.gmra.mxu2 %v4677_v3  ;;  %v4683_v4 = vand.u32 4294901760, %v4677_v3 }
 0x128   : > { %6534 = vst [vmem:[#allocation38_spill] sm:$0xff] %v4683_v4  ;;  %1252 = vmatmul.f32.gmra.mxu3 %v4683_v4  ;;  %v445_v5 = vpop.trf.xlu0  ;;  %v665_v6 = vsub.f32 %v4677_v3, %v4683_v4 }
 0x129   : > { %v513_v7 = vsel %vm484_vm0, %v445_v5, 0 }
 0x12a   : > { %v4689_v8 = vand.u32 4294901760, %v513_v7  ;;  %v4691_v9 = vand.u32 4294901760, %v665_v6  ;;  %v1980_v6 = vsub.f32 %v1978_v55, %v1979_v63 }
 0x12c   : > { %v4694_v13 = vsub.f32 %v513_v7, %v4689_v8  ;;  %667 = vmatmul.f32.gmra.mxu0 %v4691_v9  ;;  %913 = vmatmul.f32.gmra.mxu1 %v4689_v8 }
 0x12e   : > { %6535 = vst [vmem:[#allocation39_spill] sm:$0xff] %v4694_v13  ;;  %1070 = vmatmul.f32.gmra.mxu2 %v4694_v13  ;;  %v4700_v14 = vand.u32 4294901760, %v4694_v13 }
 0x130   : > { %6536 = vst [vmem:[#allocation40_spill] sm:$0xff] %v4700_v14  ;;  %1258 = vmatmul.f32.gmra.mxu3 %v4700_v14  ;;  %v446_v15 = vpop.trf.xlu0  ;;  %v673_v20 = vsub.f32 %v4694_v13, %v4700_v14 }
 0x131   : > { %v516_v21 = vsel %vm484_vm0, %v446_v15, 0  ;;  %v1981_v15 = vand.u32 4294901760, %v1980_v6 }
 0x132   : > { %v4706_v22 = vand.u32 4294901760, %v516_v21  ;;  %v4708_v27 = vand.u32 4294901760, %v673_v20 }
 0x133   : > { %1982 = vmatpush.msrb.mxu3 %v1981_v15 }
 0x134   : > { %v4711_v28 = vsub.f32 %v516_v21, %v4706_v22  ;;  %675 = vmatmul.f32.gmra.mxu0 %v4708_v27  ;;  %917 = vmatmul.f32.gmra.mxu1 %v4706_v22 }
 0x135   : > { %2665 = vmatpush.msra.mxu3 %v1703_v49 }
 0x136   : > { %6537 = vst [vmem:[#allocation41_spill] sm:$0xff] %v4711_v28  ;;  %1075 = vmatmul.f32.gmra.mxu2 %v4711_v28  ;;  %v4717_v29 = vand.u32 4294901760, %v4711_v28 }
 0x138   : > { %6538 = vst [vmem:[#allocation42_spill] sm:$0xff] %v4717_v29  ;;  %1264 = vmatmul.f32.gmra.mxu3 %v4717_v29  ;;  %v447_v34 = vpop.trf.xlu0  ;;  %v681_v35 = vsub.f32 %v4711_v28, %v4717_v29 }
 0x139   : > { %v519_v36 = vsel %vm484_vm0, %v447_v34, 0 }
 0x13a   : > { %v4723_v41 = vand.u32 4294901760, %v519_v36  ;;  %v4725_v42 = vand.u32 4294901760, %v681_v35 }
 0x13c   : > { %v4728_v43 = vsub.f32 %v519_v36, %v4723_v41  ;;  %683 = vmatmul.f32.gmra.mxu0 %v4725_v42  ;;  %921 = vmatmul.f32.gmra.mxu1 %v4723_v41 }
 0x13e   : > { %6539 = vst [vmem:[#allocation43_spill] sm:$0xff] %v4728_v43  ;;  %1080 = vmatmul.f32.gmra.mxu2 %v4728_v43  ;;  %v4735_v50 = vand.u32 4294901760, %v4728_v43 }
 0x140   : > { %6540 = vst [vmem:[#allocation44_spill] sm:$0xff] %v4735_v50  ;;  %1270 = vmatmul.f32.gmra.mxu3 %v4735_v50  ;;  %v448_v56 = vpop.trf.xlu0  ;;  %v689_v57 = vsub.f32 %v4728_v43, %v4735_v50 }
 0x141   : > { %v522_v62 = vsel %vm484_vm0, %v448_v56, 0 }
 0x142   : > { %v4741_v0 = vand.u32 4294901760, %v522_v62  ;;  %v4743_v5 = vand.u32 4294901760, %v689_v57 }
 0x144   : > { %v4746_v7 = vsub.f32 %v522_v62, %v4741_v0  ;;  %691 = vmatmul.f32.gmra.mxu0 %v4743_v5  ;;  %925 = vmatmul.f32.gmra.mxu1 %v4741_v0 }
 0x146   : > { %6541 = vst [vmem:[#allocation45_spill] sm:$0xff] %v4746_v7  ;;  %1085 = vmatmul.f32.gmra.mxu2 %v4746_v7  ;;  %v4752_v20 = vand.u32 4294901760, %v4746_v7 }
 0x148   : > { %6542 = vst [vmem:[#allocation46_spill] sm:$0xff] %v4752_v20  ;;  %1276 = vmatmul.f32.gmra.mxu3 %v4752_v20  ;;  %v449_v21 = vpop.trf.xlu0  ;;  %v697_v34 = vsub.f32 %v4746_v7, %v4752_v20 }
 0x149   : > { %v525_v35 = vsel %vm484_vm0, %v449_v21, 0 }
 0x14a   : > { %v4758_v36 = vand.u32 4294901760, %v525_v35  ;;  %v4760_v48 = vand.u32 4294901760, %v697_v34 }
 0x14c   : > { %v4763_v55 = vsub.f32 %v525_v35, %v4758_v36  ;;  %699 = vmatmul.f32.gmra.mxu0 %v4760_v48  ;;  %929 = vmatmul.f32.gmra.mxu1 %v4758_v36 }
 0x14e   : > { %6543 = vst [vmem:[#allocation47_spill] sm:$0xff] %v4763_v55  ;;  %1090 = vmatmul.f32.gmra.mxu2 %v4763_v55  ;;  %v4769_v56 = vand.u32 4294901760, %v4763_v55 }
 0x150   : > { %6544 = vst [vmem:[#allocation48_spill] sm:$0xff] %v4769_v56  ;;  %1282 = vmatmul.f32.gmra.mxu3 %v4769_v56  ;;  %v450_v57 = vpop.trf.xlu0  ;;  %v705_v49 = vsub.f32 %v4763_v55, %v4769_v56 }
 0x151   : > { %v528_v62 = vsel %vm484_vm0, %v450_v57, 0 }
 0x152   : > { %v4775_v63 = vand.u32 4294901760, %v528_v62  ;;  %v4777_v6 = vand.u32 4294901760, %v705_v49 }
 0x154   : > { %v4780_v15 = vsub.f32 %v528_v62, %v4775_v63  ;;  %707 = vmatmul.f32.gmra.mxu0 %v4777_v6  ;;  %933 = vmatmul.f32.gmra.mxu1 %v4775_v63 }
 0x156   : > { %6545 = vst [vmem:[#allocation49_spill] sm:$0xff] %v4780_v15  ;;  %1095 = vmatmul.f32.gmra.mxu2 %v4780_v15  ;;  %v4786_v21 = vand.u32 4294901760, %v4780_v15 }
 0x158   : > { %6546 = vst [vmem:[#allocation50_spill] sm:$0xff] %v4786_v21  ;;  %1288 = vmatmul.f32.gmra.mxu3 %v4786_v21  ;;  %v451_v34 = vpop.trf.xlu0  ;;  %v713_v35 = vsub.f32 %v4780_v15, %v4786_v21 }
 0x159   : > { %v531_v57 = vsel %vm484_vm0, %v451_v34, 0 }
 0x15a   : > { %v4792_v49 = vand.u32 4294901760, %v531_v57  ;;  %v4794_v62 = vand.u32 4294901760, %v713_v35 }
 0x15c   : > { %v4797_v55 = vsub.f32 %v531_v57, %v4792_v49  ;;  %715 = vmatmul.f32.gmra.mxu0 %v4794_v62  ;;  %937 = vmatmul.f32.gmra.mxu1 %v4792_v49 }
 0x15e   : > { %6547 = vst [vmem:[#allocation51_spill] sm:$0xff] %v4797_v55  ;;  %1100 = vmatmul.f32.gmra.mxu2 %v4797_v55  ;;  %v4803_v56 = vand.u32 4294901760, %v4797_v55 }
 0x160   : > { %6548 = vst [vmem:[#allocation52_spill] sm:$0xff] %v4803_v56  ;;  %1294 = vmatmul.f32.gmra.mxu3 %v4803_v56  ;;  %v468_v15 = vpop.trf.xlu0  ;;  %v721_v34 = vsub.f32 %v4797_v55, %v4803_v56 }
 0x161   : > { %v534_v35 = vsel %vm484_vm0, %v468_v15, 0  ;;  %v878_v21 = vpop.f32.mrf.mxu1 }
 0x162   : > { %v4809_v57 = vand.u32 4294901760, %v534_v35  ;;  %v4811_v7 = vand.u32 4294901760, %v721_v34 }
 0x164   : > { %v4814_v20 = vsub.f32 %v534_v35, %v4809_v57  ;;  %723 = vmatmul.f32.gmra.mxu0 %v4811_v7  ;;  %941 = vmatmul.f32.gmra.mxu1 %v4809_v57 }
 0x166   : > { %6549 = vst [vmem:[#allocation53_spill] sm:$0xff] %v4814_v20  ;;  %1105 = vmatmul.f32.gmra.mxu2 %v4814_v20  ;;  %v4820_v43 = vand.u32 4294901760, %v4814_v20 }
 0x168   : > { %6550 = vst [vmem:[#allocation54_spill] sm:$0xff] %v4820_v43  ;;  %1300 = vmatmul.f32.gmra.mxu3 %v4820_v43  ;;  %v469_v15 = vpop.trf.xlu0  ;;  %v729_v55 = vsub.f32 %v4814_v20, %v4820_v43 }
 0x169   : > { %v537_v34 = vsel %vm484_vm0, %v469_v15, 0  ;;  %v604_v56 = vpop.f32.mrf.mxu0  ;;  %v882_v35 = vpop.f32.mrf.mxu1 }
 0x16a   : > { %v4826_v50 = vand.u32 4294901760, %v537_v34  ;;  %v879_v28 = vadd.f32 %v878_v21, %v604_v56  ;;  %v1026_v29 = vpop.f32.mrf.mxu2  ;;  %v4828_v13 = vand.u32 4294901760, %v729_v55 }
 0x16b   : > { %v1205_v14 = vpop.f32.mrf.mxu3 }
 0x16c   : > { %6551 = vst [vmem:[#allocation55_spill] sm:$0xff] %v4826_v50  ;;  %v4831_v3 = vsub.f32 %v537_v34, %v4826_v50  ;;  %v1027_v4 = vadd.f32 %v1026_v29, %v879_v28  ;;  %731 = vmatmul.f32.gmra.mxu0 %v4828_v13  ;;  %945 = vmatmul.f32.gmra.mxu1 %v4826_v50 }
 0x16e   : > { %6552 = vst [vmem:[#allocation56_spill] sm:$0xff] %v4831_v3  ;;  %v4835_v20 = vadd.f32 %v1205_v14, %v1027_v4  ;;  %1110 = vmatmul.f32.gmra.mxu2 %v4831_v3  ;;  %v4839_v15 = vand.u32 4294901760, %v4831_v3 }
 0x170   : > { %6553 = vst [vmem:[#allocation57_spill] sm:$0xff] %v4839_v15  ;;  %1306 = vmatmul.f32.gmra.mxu3 %v4839_v15  ;;  %v470_v55 = vpop.trf.xlu0  ;;  %v737_v56 = vsub.f32 %v4831_v3, %v4839_v15 }
 0x171   : > { %v540_v21 = vsel %vm484_vm0, %v470_v55, 0  ;;  %v612_v28 = vpop.f32.mrf.mxu0  ;;  %v886_v29 = vpop.f32.mrf.mxu1 }
 0x172   : > { %v4845_v34 = vand.u32 4294901760, %v540_v21  ;;  %v883_v43 = vadd.f32 %v882_v35, %v612_v28  ;;  %v1031_v4 = vpop.f32.mrf.mxu2  ;;  %v4847_v14 = vand.u32 4294901760, %v737_v56 }
 0x173   : > { %v1211_v60 = vpop.f32.mrf.mxu3 }
 0x174   : > { %6554 = vst [vmem:[#allocation58_spill] sm:$0xff] %v4845_v34  ;;  %v4850_v61 = vsub.f32 %v540_v21, %v4845_v34  ;;  %v1032_v53 = vadd.f32 %v1031_v4, %v883_v43  ;;  %739 = vmatmul.f32.gmra.mxu0 %v4847_v14  ;;  %949 = vmatmul.f32.gmra.mxu1 %v4845_v34 }
 0x176   : > { %6555 = vst [vmem:[#allocation59_spill] sm:$0xff] %v4850_v61  ;;  %v4854_v3 = vadd.f32 %v1211_v60, %v1032_v53  ;;  %1115 = vmatmul.f32.gmra.mxu2 %v4850_v61  ;;  %v4858_v55 = vand.u32 4294901760, %v4850_v61 }
 0x178   : > { %6556 = vst [vmem:[#allocation60_spill] sm:$0xff] %v4858_v55  ;;  %1312 = vmatmul.f32.gmra.mxu3 %v4858_v55  ;;  %v471_v35 = vpop.trf.xlu0  ;;  %v745_v56 = vsub.f32 %v4850_v61, %v4858_v55 }
 0x179   : > { %v543_v21 = vsel %vm484_vm0, %v471_v35, 0  ;;  %v620_v43 = vpop.f32.mrf.mxu0  ;;  %v890_v28 = vpop.f32.mrf.mxu1 }
 0x17a   : > { %v4864_v4 = vand.u32 4294901760, %v543_v21  ;;  %v887_v15 = vadd.f32 %v886_v29, %v620_v43  ;;  %v1036_v53 = vpop.f32.mrf.mxu2  ;;  %v4866_v60 = vand.u32 4294901760, %v745_v56 }
 0x17b   : > { %v1217_v54 = vpop.f32.mrf.mxu3 }
 0x17c   : > { %6557 = vst [vmem:[#allocation61_spill] sm:$0xff] %v4864_v4  ;;  %v4869_v46 = vsub.f32 %v543_v21, %v4864_v4  ;;  %v1037_v47 = vadd.f32 %v1036_v53, %v887_v15  ;;  %747 = vmatmul.f32.gmra.mxu0 %v4866_v60  ;;  %953 = vmatmul.f32.gmra.mxu1 %v4864_v4 }
 0x17e   : > { %6558 = vst [vmem:[#allocation62_spill] sm:$0xff] %v4869_v46  ;;  %v4873_v61 = vadd.f32 %v1217_v54, %v1037_v47  ;;  %1120 = vmatmul.f32.gmra.mxu2 %v4869_v46  ;;  %v4877_v35 = vand.u32 4294901760, %v4869_v46 }
 0x180   : > { %6559 = vst [vmem:[#allocation63_spill] sm:$0xff] %v4877_v35  ;;  %1318 = vmatmul.f32.gmra.mxu3 %v4877_v35  ;;  %v472_v29 = vpop.trf.xlu0  ;;  %v753_v56 = vsub.f32 %v4869_v46, %v4877_v35 }
 0x181   : > { %v546_v21 = vsel %vm484_vm0, %v472_v29, 0  ;;  %v628_v15 = vpop.f32.mrf.mxu0  ;;  %v894_v43 = vpop.f32.mrf.mxu1 }
 0x182   : > { %v4883_v53 = vand.u32 4294901760, %v546_v21  ;;  %v891_v55 = vadd.f32 %v890_v28, %v628_v15  ;;  %v1041_v47 = vpop.f32.mrf.mxu2  ;;  %v4885_v54 = vand.u32 4294901760, %v753_v56 }
 0x183   : > { %v1223_v39 = vpop.f32.mrf.mxu3 }
 0x184   : > { %6560 = vst [vmem:[#allocation64_spill] sm:$0xff] %v4883_v53  ;;  %v4888_v40 = vsub.f32 %v546_v21, %v4883_v53  ;;  %v1042_v32 = vadd.f32 %v1041_v47, %v891_v55  ;;  %755 = vmatmul.f32.gmra.mxu0 %v4885_v54  ;;  %957 = vmatmul.f32.gmra.mxu1 %v4883_v53 }
 0x186   : > { %6561 = vst [vmem:[#allocation65_spill] sm:$0xff] %v4888_v40  ;;  %v4892_v46 = vadd.f32 %v1223_v39, %v1042_v32  ;;  %1125 = vmatmul.f32.gmra.mxu2 %v4888_v40  ;;  %v4896_v29 = vand.u32 4294901760, %v4888_v40 }
 0x188   : > { %6562 = vst [vmem:[#allocation66_spill] sm:$0xff] %v4896_v29  ;;  %1324 = vmatmul.f32.gmra.mxu3 %v4896_v29  ;;  %v473_v28 = vpop.trf.xlu0  ;;  %v761_v56 = vsub.f32 %v4888_v40, %v4896_v29 }
 0x189   : > { %v549_v21 = vsel %vm484_vm0, %v473_v28, 0  ;;  %v636_v55 = vpop.f32.mrf.mxu0  ;;  %v898_v15 = vpop.f32.mrf.mxu1 }
 0x18a   : > { %v4902_v47 = vand.u32 4294901760, %v549_v21  ;;  %v895_v35 = vadd.f32 %v894_v43, %v636_v55  ;;  %v1046_v32 = vpop.f32.mrf.mxu2  ;;  %v4904_v39 = vand.u32 4294901760, %v761_v56 }
 0x18b   : > { %v1229_v33 = vpop.f32.mrf.mxu3 }
 0x18c   : > { %6563 = vst [vmem:[#allocation67_spill] sm:$0xff] %v4902_v47  ;;  %v4907_v25 = vsub.f32 %v549_v21, %v4902_v47  ;;  %v1047_v26 = vadd.f32 %v1046_v32, %v895_v35  ;;  %763 = vmatmul.f32.gmra.mxu0 %v4904_v39  ;;  %961 = vmatmul.f32.gmra.mxu1 %v4902_v47 }
 0x18e   : > { %6564 = vst [vmem:[#allocation68_spill] sm:$0xff] %v4907_v25  ;;  %v4911_v40 = vadd.f32 %v1229_v33, %v1047_v26  ;;  %1130 = vmatmul.f32.gmra.mxu2 %v4907_v25  ;;  %v4915_v28 = vand.u32 4294901760, %v4907_v25 }
 0x190   : > { %6565 = vst [vmem:[#allocation69_spill] sm:$0xff] %v4915_v28  ;;  %1330 = vmatmul.f32.gmra.mxu3 %v4915_v28  ;;  %v474_v43 = vpop.trf.xlu0  ;;  %v769_v56 = vsub.f32 %v4907_v25, %v4915_v28 }
 0x191   : > { %v552_v21 = vsel %vm484_vm0, %v474_v43, 0  ;;  %v644_v35 = vpop.f32.mrf.mxu0  ;;  %v902_v55 = vpop.f32.mrf.mxu1 }
 0x192   : > { %v4921_v32 = vand.u32 4294901760, %v552_v21  ;;  %v899_v29 = vadd.f32 %v898_v15, %v644_v35  ;;  %v1051_v26 = vpop.f32.mrf.mxu2  ;;  %v4923_v33 = vand.u32 4294901760, %v769_v56 }
 0x193   : > { %v1235_v18 = vpop.f32.mrf.mxu3 }
 0x194   : > { %6566 = vst [vmem:[#allocation70_spill] sm:$0xff] %v4921_v32  ;;  %v4926_v19 = vsub.f32 %v552_v21, %v4921_v32  ;;  %v1052_v11 = vadd.f32 %v1051_v26, %v899_v29  ;;  %771 = vmatmul.f32.gmra.mxu0 %v4923_v33  ;;  %965 = vmatmul.f32.gmra.mxu1 %v4921_v32 }
 0x196   : > { %6567 = vst [vmem:[#allocation71_spill] sm:$0xff] %v4926_v19  ;;  %v4930_v25 = vadd.f32 %v1235_v18, %v1052_v11  ;;  %1135 = vmatmul.f32.gmra.mxu2 %v4926_v19  ;;  %v4934_v43 = vand.u32 4294901760, %v4926_v19 }
 0x198   : > { %6568 = vst [vmem:[#allocation72_spill] sm:$0xff] %v4930_v25  ;;  %1336 = vmatmul.f32.gmra.mxu3 %v4934_v43  ;;  %v475_v15 = vpop.trf.xlu0  ;;  %v777_v56 = vsub.f32 %v4926_v19, %v4934_v43 }
 0x199   : > { %6569 = vst [vmem:[#allocation73_spill] sm:$0xff] %v4934_v43  ;;  %v555_v21 = vsel %vm484_vm0, %v475_v15, 0  ;;  %v652_v29 = vpop.f32.mrf.mxu0  ;;  %v906_v35 = vpop.f32.mrf.mxu1 }
 0x19a   : > { %v4940_v26 = vand.u32 4294901760, %v555_v21  ;;  %v903_v28 = vadd.f32 %v902_v55, %v652_v29  ;;  %v1056_v11 = vpop.f32.mrf.mxu2  ;;  %v4942_v18 = vand.u32 4294901760, %v777_v56 }
 0x19b   : > { %v1241_v12 = vpop.f32.mrf.mxu3 }
 0x19c   : > { %6570 = vst [vmem:[#allocation74_spill] sm:$0xff] %v4940_v26  ;;  %v4945_v32 = vsub.f32 %v555_v21, %v4940_v26  ;;  %v1057_v25 = vadd.f32 %v1056_v11, %v903_v28  ;;  %779 = vmatmul.f32.gmra.mxu0 %v4942_v18  ;;  %969 = vmatmul.f32.gmra.mxu1 %v4940_v26 }
 0x19d   : > { %6571 = vst [vmem:[#allocation75_spill] sm:$0xff] %v4942_v18 }
 0x19e   : > { %6572 = vst [vmem:[#allocation76_spill] sm:$0xff] %v4945_v32  ;;  %v4949_v19 = vadd.f32 %v1241_v12, %v1057_v25  ;;  %1140 = vmatmul.f32.gmra.mxu2 %v4945_v32  ;;  %v4953_v15 = vand.u32 4294901760, %v4945_v32 }
 0x1a0   : > { %6573 = vst [vmem:[#allocation77_spill] sm:$0xff] %v4949_v19  ;;  %1342 = vmatmul.f32.gmra.mxu3 %v4953_v15  ;;  %v476_v55 = vpop.trf.xlu0  ;;  %v785_v56 = vsub.f32 %v4945_v32, %v4953_v15 }
 0x1a1   : > { %6574 = vst [vmem:[#allocation78_spill] sm:$0xff] %v4953_v15  ;;  %v558_v21 = vsel %vm484_vm0, %v476_v55, 0  ;;  %v660_v28 = vpop.f32.mrf.mxu0  ;;  %v910_v29 = vpop.f32.mrf.mxu1 }
 0x1a2   : > { %v4959_v11 = vand.u32 4294901760, %v558_v21  ;;  %v907_v43 = vadd.f32 %v906_v35, %v660_v28  ;;  %v1061_v12 = vpop.f32.mrf.mxu2  ;;  %v4961_v25 = vand.u32 4294901760, %v785_v56 }
 0x1a3   : > { %v1247_v26 = vpop.f32.mrf.mxu3 }
 0x1a4   : > { %6575 = vst [vmem:[#allocation79_spill] sm:$0xff] %v4959_v11  ;;  %v4964_v19 = vsub.f32 %v558_v21, %v4959_v11  ;;  %v1062_v18 = vadd.f32 %v1061_v12, %v907_v43  ;;  %787 = vmatmul.f32.gmra.mxu0 %v4961_v25  ;;  %973 = vmatmul.f32.gmra.mxu1 %v4959_v11 }
 0x1a5   : > { %6576 = vst [vmem:[#allocation80_spill] sm:$0xff] %v4961_v25 }
 0x1a6   : > { %6577 = vst [vmem:[#allocation81_spill] sm:$0xff] %v4964_v19  ;;  %v4968_v32 = vadd.f32 %v1247_v26, %v1062_v18  ;;  %1145 = vmatmul.f32.gmra.mxu2 %v4964_v19  ;;  %v4972_v55 = vand.u32 4294901760, %v4964_v19 }
 0x1a8   : > { %6578 = vst [vmem:[#allocation82_spill] sm:$0xff] %v4968_v32  ;;  %1348 = vmatmul.f32.gmra.mxu3 %v4972_v55  ;;  %v477_v35 = vpop.trf.xlu0  ;;  %v793_v56 = vsub.f32 %v4964_v19, %v4972_v55 }
 0x1a9   : > { %6579 = vst [vmem:[#allocation83_spill] sm:$0xff] %v4972_v55  ;;  %v561_v21 = vsel %vm484_vm0, %v477_v35, 0  ;;  %v668_v43 = vpop.f32.mrf.mxu0  ;;  %v914_v28 = vpop.f32.mrf.mxu1 }
 0x1aa   : > { %v4978_v12 = vand.u32 4294901760, %v561_v21  ;;  %v911_v15 = vadd.f32 %v910_v29, %v668_v43  ;;  %v1066_v26 = vpop.f32.mrf.mxu2  ;;  %v4980_v18 = vand.u32 4294901760, %v793_v56 }
 0x1ab   : > { %v1253_v11 = vpop.f32.mrf.mxu3 }
 0x1ac   : > { %6580 = vst [vmem:[#allocation84_spill] sm:$0xff] %v4978_v12  ;;  %v4983_v32 = vsub.f32 %v561_v21, %v4978_v12  ;;  %v1067_v25 = vadd.f32 %v1066_v26, %v911_v15  ;;  %795 = vmatmul.f32.gmra.mxu0 %v4980_v18  ;;  %977 = vmatmul.f32.gmra.mxu1 %v4978_v12 }
 0x1ad   : > { %6581 = vst [vmem:[#allocation85_spill] sm:$0xff] %v4980_v18 }
 0x1ae   : > { %6582 = vst [vmem:[#allocation86_spill] sm:$0xff] %v4983_v32  ;;  %v4987_v19 = vadd.f32 %v1253_v11, %v1067_v25  ;;  %1150 = vmatmul.f32.gmra.mxu2 %v4983_v32  ;;  %v4991_v35 = vand.u32 4294901760, %v4983_v32 }
 0x1b0   : > { %6583 = vst [vmem:[#allocation87_spill] sm:$0xff] %v4987_v19  ;;  %1354 = vmatmul.f32.gmra.mxu3 %v4991_v35  ;;  %v478_v29 = vpop.trf.xlu0  ;;  %v801_v56 = vsub.f32 %v4983_v32, %v4991_v35 }
 0x1b1   : > { %6584 = vst [vmem:[#allocation88_spill] sm:$0xff] %v4991_v35  ;;  %v564_v21 = vsel %vm484_vm0, %v478_v29, 0  ;;  %v676_v15 = vpop.f32.mrf.mxu0  ;;  %v918_v43 = vpop.f32.mrf.mxu1 }
 0x1b2   : > { %v4997_v26 = vand.u32 4294901760, %v564_v21  ;;  %v915_v55 = vadd.f32 %v914_v28, %v676_v15  ;;  %v1071_v11 = vpop.f32.mrf.mxu2  ;;  %v4999_v25 = vand.u32 4294901760, %v801_v56 }
 0x1b3   : > { %v1259_v12 = vpop.f32.mrf.mxu3 }
 0x1b4   : > { %6585 = vst [vmem:[#allocation89_spill] sm:$0xff] %v4997_v26  ;;  %v5002_v19 = vsub.f32 %v564_v21, %v4997_v26  ;;  %v1072_v18 = vadd.f32 %v1071_v11, %v915_v55  ;;  %803 = vmatmul.f32.gmra.mxu0 %v4999_v25  ;;  %981 = vmatmul.f32.gmra.mxu1 %v4997_v26 }
 0x1b5   : > { %6586 = vst [vmem:[#allocation90_spill] sm:$0xff] %v4999_v25 }
 0x1b6   : > { %6587 = vst [vmem:[#allocation91_spill] sm:$0xff] %v5002_v19  ;;  %v5006_v32 = vadd.f32 %v1259_v12, %v1072_v18  ;;  %1155 = vmatmul.f32.gmra.mxu2 %v5002_v19  ;;  %v5010_v29 = vand.u32 4294901760, %v5002_v19 }
 0x1b8   : > { %6588 = vst [vmem:[#allocation92_spill] sm:$0xff] %v5006_v32  ;;  %1360 = vmatmul.f32.gmra.mxu3 %v5010_v29  ;;  %v479_v28 = vpop.trf.xlu0  ;;  %v809_v56 = vsub.f32 %v5002_v19, %v5010_v29 }
 0x1b9   : > { %6589 = vst [vmem:[#allocation93_spill] sm:$0xff] %v5010_v29  ;;  %v567_v21 = vsel %vm484_vm0, %v479_v28, 0  ;;  %v684_v55 = vpop.f32.mrf.mxu0  ;;  %v922_v15 = vpop.f32.mrf.mxu1 }
 0x1ba   : > { %v5016_v11 = vand.u32 4294901760, %v567_v21  ;;  %v919_v35 = vadd.f32 %v918_v43, %v684_v55  ;;  %v1076_v12 = vpop.f32.mrf.mxu2  ;;  %v5018_v18 = vand.u32 4294901760, %v809_v56 }
 0x1bb   : > { %v1265_v26 = vpop.f32.mrf.mxu3 }
 0x1bc   : > { %6590 = vst [vmem:[#allocation94_spill] sm:$0xff] %v5016_v11  ;;  %v5021_v32 = vsub.f32 %v567_v21, %v5016_v11  ;;  %v1077_v25 = vadd.f32 %v1076_v12, %v919_v35  ;;  %811 = vmatmul.f32.gmra.mxu0 %v5018_v18  ;;  %985 = vmatmul.f32.gmra.mxu1 %v5016_v11 }
 0x1bd   : > { %6591 = vst [vmem:[#allocation95_spill] sm:$0xff] %v5018_v18 }
 0x1be   : > { %6592 = vst [vmem:[#allocation96_spill] sm:$0xff] %v5021_v32  ;;  %v5025_v19 = vadd.f32 %v1265_v26, %v1077_v25  ;;  %1160 = vmatmul.f32.gmra.mxu2 %v5021_v32  ;;  %v5029_v28 = vand.u32 4294901760, %v5021_v32 }
 0x1c0   : > { %6593 = vst [vmem:[#allocation97_spill] sm:$0xff] %v5025_v19  ;;  %1366 = vmatmul.f32.gmra.mxu3 %v5029_v28  ;;  %v480_v43 = vpop.trf.xlu0  ;;  %v817_v56 = vsub.f32 %v5021_v32, %v5029_v28 }
 0x1c1   : > { %6594 = vst [vmem:[#allocation98_spill] sm:$0xff] %v5029_v28  ;;  %v570_v21 = vsel %vm484_vm0, %v480_v43, 0  ;;  %v692_v35 = vpop.f32.mrf.mxu0  ;;  %v926_v55 = vpop.f32.mrf.mxu1 }
 0x1c2   : > { %v5035_v12 = vand.u32 4294901760, %v570_v21  ;;  %v923_v29 = vadd.f32 %v922_v15, %v692_v35  ;;  %v1081_v26 = vpop.f32.mrf.mxu2  ;;  %v5037_v25 = vand.u32 4294901760, %v817_v56 }
 0x1c3   : > { %v1271_v11 = vpop.f32.mrf.mxu3 }
 0x1c4   : > { %6595 = vst [vmem:[#allocation99_spill] sm:$0xff] %v5035_v12  ;;  %v5040_v19 = vsub.f32 %v570_v21, %v5035_v12  ;;  %v1082_v18 = vadd.f32 %v1081_v26, %v923_v29  ;;  %819 = vmatmul.f32.gmra.mxu0 %v5037_v25  ;;  %989 = vmatmul.f32.gmra.mxu1 %v5035_v12 }
 0x1c5   : > { %6596 = vst [vmem:[#allocation100_spill] sm:$0xff] %v5037_v25 }
 0x1c6   : > { %6597 = vst [vmem:[#allocation101_spill] sm:$0xff] %v5040_v19  ;;  %v5044_v32 = vadd.f32 %v1271_v11, %v1082_v18  ;;  %1165 = vmatmul.f32.gmra.mxu2 %v5040_v19  ;;  %v5048_v43 = vand.u32 4294901760, %v5040_v19 }
 0x1c8   : > { %6598 = vst [vmem:[#allocation102_spill] sm:$0xff] %v5044_v32  ;;  %1372 = vmatmul.f32.gmra.mxu3 %v5048_v43  ;;  %v481_v15 = vpop.trf.xlu0  ;;  %v825_v56 = vsub.f32 %v5040_v19, %v5048_v43 }
 0x1c9   : > { %6599 = vst [vmem:[#allocation103_spill] sm:$0xff] %v5048_v43  ;;  %v573_v21 = vsel %vm484_vm0, %v481_v15, 0  ;;  %v700_v29 = vpop.f32.mrf.mxu0  ;;  %v930_v35 = vpop.f32.mrf.mxu1 }
 0x1ca   : > { %v5054_v26 = vand.u32 4294901760, %v573_v21  ;;  %v927_v28 = vadd.f32 %v926_v55, %v700_v29  ;;  %v1086_v11 = vpop.f32.mrf.mxu2  ;;  %v5056_v18 = vand.u32 4294901760, %v825_v56 }
 0x1cb   : > { %v1277_v12 = vpop.f32.mrf.mxu3 }
 0x1cc   : > { %6600 = vst [vmem:[#allocation104_spill] sm:$0xff] %v5054_v26  ;;  %v5059_v32 = vsub.f32 %v573_v21, %v5054_v26  ;;  %v1087_v25 = vadd.f32 %v1086_v11, %v927_v28  ;;  %827 = vmatmul.f32.gmra.mxu0 %v5056_v18  ;;  %993 = vmatmul.f32.gmra.mxu1 %v5054_v26 }
 0x1cd   : > { %6601 = vst [vmem:[#allocation105_spill] sm:$0xff] %v5056_v18 }
 0x1ce   : > { %6602 = vst [vmem:[#allocation106_spill] sm:$0xff] %v5059_v32  ;;  %v5063_v19 = vadd.f32 %v1277_v12, %v1087_v25  ;;  %1170 = vmatmul.f32.gmra.mxu2 %v5059_v32  ;;  %v5067_v15 = vand.u32 4294901760, %v5059_v32 }
 0x1d0   : > { %6603 = vst [vmem:[#allocation107_spill] sm:$0xff] %v5063_v19  ;;  %1378 = vmatmul.f32.gmra.mxu3 %v5067_v15  ;;  %v482_v55 = vpop.trf.xlu0  ;;  %v833_v56 = vsub.f32 %v5059_v32, %v5067_v15 }
 0x1d1   : > { %6604 = vst [vmem:[#allocation108_spill] sm:$0xff] %v5067_v15  ;;  %v576_v21 = vsel %vm484_vm0, %v482_v55, 0  ;;  %v708_v28 = vpop.f32.mrf.mxu0  ;;  %v934_v29 = vpop.f32.mrf.mxu1 }
 0x1d2   : > { %v5073_v11 = vand.u32 4294901760, %v576_v21  ;;  %v931_v43 = vadd.f32 %v930_v35, %v708_v28  ;;  %v1091_v12 = vpop.f32.mrf.mxu2  ;;  %v5075_v25 = vand.u32 4294901760, %v833_v56 }
 0x1d3   : > { %v1283_v26 = vpop.f32.mrf.mxu3 }
 0x1d4   : > { %6605 = vst [vmem:[#allocation109_spill] sm:$0xff] %v5073_v11  ;;  %v5078_v19 = vsub.f32 %v576_v21, %v5073_v11  ;;  %v1092_v18 = vadd.f32 %v1091_v12, %v931_v43  ;;  %835 = vmatmul.f32.gmra.mxu0 %v5075_v25  ;;  %997 = vmatmul.f32.gmra.mxu1 %v5073_v11 }
 0x1d5   : > { %6606 = vst [vmem:[#allocation110_spill] sm:$0xff] %v5075_v25 }
 0x1d6   : > { %6607 = vst [vmem:[#allocation111_spill] sm:$0xff] %v5078_v19  ;;  %v5082_v32 = vadd.f32 %v1283_v26, %v1092_v18  ;;  %1175 = vmatmul.f32.gmra.mxu2 %v5078_v19  ;;  %v5086_v55 = vand.u32 4294901760, %v5078_v19 }
 0x1d8   : > { %6608 = vst [vmem:[#allocation112_spill] sm:$0xff] %v5082_v32  ;;  %1384 = vmatmul.f32.gmra.mxu3 %v5086_v55  ;;  %v483_v35 = vpop.trf.xlu0  ;;  %v841_v56 = vsub.f32 %v5078_v19, %v5086_v55 }
 0x1d9   : > { %6609 = vst [vmem:[#allocation113_spill] sm:$0xff] %v5086_v55  ;;  %v579_v21 = vsel %vm484_vm0, %v483_v35, 0  ;;  %v716_v43 = vpop.f32.mrf.mxu0  ;;  %v938_v28 = vpop.f32.mrf.mxu1 }
 0x1da   : > { %v5092_v12 = vand.u32 4294901760, %v579_v21  ;;  %v935_v15 = vadd.f32 %v934_v29, %v716_v43  ;;  %v1096_v26 = vpop.f32.mrf.mxu2  ;;  %v5094_v18 = vand.u32 4294901760, %v841_v56 }
 0x1db   : > { %v1289_v11 = vpop.f32.mrf.mxu3 }
 0x1dc   : > { %6610 = vst [vmem:[#allocation114_spill] sm:$0xff] %v5092_v12  ;;  %v5097_v32 = vsub.f32 %v579_v21, %v5092_v12  ;;  %v1097_v25 = vadd.f32 %v1096_v26, %v935_v15  ;;  %843 = vmatmul.f32.gmra.mxu0 %v5094_v18  ;;  %1001 = vmatmul.f32.gmra.mxu1 %v5092_v12 }
 0x1de   : > { %6611 = vst [vmem:[#allocation115_spill] sm:$0xff] %v5097_v32  ;;  %v5101_v19 = vadd.f32 %v1289_v11, %v1097_v25  ;;  %1180 = vmatmul.f32.gmra.mxu2 %v5097_v32  ;;  %v5105_v35 = vand.u32 4294901760, %v5097_v32 }
 0x1e0   : > { %6612 = vst [vmem:[#allocation116_spill] sm:$0xff] %v5101_v19  ;;  %1390 = vmatmul.f32.gmra.mxu3 %v5105_v35  ;;  %v849_v29 = vsub.f32 %v5097_v32, %v5105_v35 }
 0x1e1   : > { %6613 = vst [vmem:[#allocation117_spill] sm:$0xff] %v5105_v35  ;;  %v724_v56 = vpop.f32.mrf.mxu0  ;;  %v942_v21 = vpop.f32.mrf.mxu1 }
 0x1e2   : > { %v939_v43 = vadd.f32 %v938_v28, %v724_v56  ;;  %v1101_v15 = vpop.f32.mrf.mxu2  ;;  %v5110_v26 = vand.u32 4294901760, %v849_v29 }
 0x1e3   : > { %v1295_v55 = vpop.f32.mrf.mxu3 }
 0x1e4   : > { %v1102_v12 = vadd.f32 %v1101_v15, %v939_v43  ;;  %851 = vmatmul.f32.gmra.mxu0 %v5110_v26  ;;  %1560 = vmatmul.f32.vlgmr.msrb.gmra.mxu1 %v4539_v10 }
 0x1e6   : > { %v5114_v11 = vadd.f32 %v1295_v55, %v1102_v12  ;;  %1710 = vmatmul.f32.vlgmr.msrb.gmra.mxu2 %v4555_v17 }
 0x1e8   : > { %6614 = vst [vmem:[#allocation118_spill] sm:$0xff] %v5114_v11  ;;  %1984 = vmatmul.f32.vlgmr.msrb.gmra.mxu3 %v4539_v10 }
 0x1e9   : > { %v732_v25 = vpop.f32.mrf.mxu0  ;;  %v946_v32 = vpop.f32.mrf.mxu1 }
 0x1ea   : > { %v943_v35 = vadd.f32 %v942_v21, %v732_v25  ;;  %v1106_v19 = vpop.f32.mrf.mxu2 }
 0x1eb   : > { %v1301_v28 = vpop.f32.mrf.mxu3 }
 0x1ec   : > { %v1107_v56 = vadd.f32 %v1106_v19, %v943_v35  ;;  %1414 = vmatmul.f32.vlgmr.msrb.gmra.mxu0 %v4539_v10  ;;  %1564 = vmatmul.f32.gmra.mxu1 %v4553_v16 }
 0x1ee   : > { %v5120_v29 = vadd.f32 %v1301_v28, %v1107_v56  ;;  %1718 = vmatmul.f32.gmra.mxu2 %v4572_v24 }
 0x1f0   : > { %1988 = vmatmul.f32.gmra.mxu3 %v4553_v16 }
 0x1f1   : > { %v740_v55 = vpop.f32.mrf.mxu0  ;;  %v950_v17 = vpop.f32.mrf.mxu1 }
 0x1f2   : > { %v947_v12 = vadd.f32 %v946_v32, %v740_v55  ;;  %v1111_v43 = vpop.f32.mrf.mxu2 }
 0x1f3   : > { %v1307_v15 = vpop.f32.mrf.mxu3 }
 0x1f4   : > { %v1112_v11 = vadd.f32 %v1111_v43, %v947_v12  ;;  %1418 = vmatmul.f32.gmra.mxu0 %v4553_v16  ;;  %1568 = vmatmul.f32.gmra.mxu1 %v4570_v23 }
 0x1f6   : > { %v5126_v19 = vadd.f32 %v1307_v15, %v1112_v11  ;;  %1726 = vmatmul.f32.gmra.mxu2 %v4589_v31 }
 0x1f8   : > { %1992 = vmatmul.f32.gmra.mxu3 %v4570_v23 }
 0x1f9   : > { %v748_v35 = vpop.f32.mrf.mxu0  ;;  %v954_v24 = vpop.f32.mrf.mxu1 }
 0x1fa   : > { %v951_v21 = vadd.f32 %v950_v17, %v748_v35  ;;  %v1116_v25 = vpop.f32.mrf.mxu2 }
 0x1fb   : > { %v1313_v28 = vpop.f32.mrf.mxu3 }
 0x1fc   : > { %v1117_v56 = vadd.f32 %v1116_v25, %v951_v21  ;;  %1422 = vmatmul.f32.gmra.mxu0 %v4570_v23  ;;  %1572 = vmatmul.f32.gmra.mxu1 %v4587_v30 }
 0x1fe   : > { %v5132_v32 = vadd.f32 %v1313_v28, %v1117_v56  ;;  %1734 = vmatmul.f32.gmra.mxu2 %v4606_v38 }
 0x200   : > { %1996 = vmatmul.f32.gmra.mxu3 %v4587_v30 }
 0x201   : > { %v756_v11 = vpop.f32.mrf.mxu0  ;;  %v958_v31 = vpop.f32.mrf.mxu1 }
 0x202   : > { %v955_v55 = vadd.f32 %v954_v24, %v756_v11  ;;  %v1121_v12 = vpop.f32.mrf.mxu2 }
 0x203   : > { %v1319_v43 = vpop.f32.mrf.mxu3 }
 0x204   : > { %v1122_v15 = vadd.f32 %v1121_v12, %v955_v55  ;;  %1426 = vmatmul.f32.gmra.mxu0 %v4587_v30  ;;  %1576 = vmatmul.f32.gmra.mxu1 %v4604_v37 }
 0x206   : > { %v5138_v17 = vadd.f32 %v1319_v43, %v1122_v15  ;;  %1742 = vmatmul.f32.gmra.mxu2 %v4623_v45 }
 0x208   : > { %2000 = vmatmul.f32.gmra.mxu3 %v4604_v37 }
 0x209   : > { %v764_v35 = vpop.f32.mrf.mxu0  ;;  %v962_v38 = vpop.f32.mrf.mxu1 }
 0x20a   : > { %v959_v21 = vadd.f32 %v958_v31, %v764_v35  ;;  %v1126_v25 = vpop.f32.mrf.mxu2 }
 0x20b   : > { %v1325_v28 = vpop.f32.mrf.mxu3 }
 0x20c   : > { %v1127_v56 = vadd.f32 %v1126_v25, %v959_v21  ;;  %1430 = vmatmul.f32.gmra.mxu0 %v4604_v37  ;;  %1580 = vmatmul.f32.gmra.mxu1 %v4621_v44 }
 0x20e   : > { %v5144_v24 = vadd.f32 %v1325_v28, %v1127_v56  ;;  %1750 = vmatmul.f32.gmra.mxu2 %v4640_v52 }
 0x210   : > { %2004 = vmatmul.f32.gmra.mxu3 %v4621_v44 }
 0x211   : > { %v772_v11 = vpop.f32.mrf.mxu0  ;;  %v966_v45 = vpop.f32.mrf.mxu1 }
 0x212   : > { %v963_v55 = vadd.f32 %v962_v38, %v772_v11  ;;  %v1131_v12 = vpop.f32.mrf.mxu2 }
 0x213   : > { %v1331_v43 = vpop.f32.mrf.mxu3 }
 0x214   : > { %v1132_v15 = vadd.f32 %v1131_v12, %v963_v55  ;;  %1434 = vmatmul.f32.gmra.mxu0 %v4621_v44  ;;  %1584 = vmatmul.f32.gmra.mxu1 %v4638_v51 }
 0x216   : > { %v5150_v31 = vadd.f32 %v1331_v43, %v1132_v15  ;;  %1758 = vmatmul.f32.gmra.mxu2 %v4657_v59 }
 0x218   : > { %2008 = vmatmul.f32.gmra.mxu3 %v4638_v51 }
 0x219   : > { %v780_v35 = vpop.f32.mrf.mxu0  ;;  %v970_v52 = vpop.f32.mrf.mxu1 }
 0x21a   : > { %v967_v21 = vadd.f32 %v966_v45, %v780_v35  ;;  %v1136_v25 = vpop.f32.mrf.mxu2 }
 0x21b   : > { %v1337_v28 = vpop.f32.mrf.mxu3 }
 0x21c   : > { %v1137_v56 = vadd.f32 %v1136_v25, %v967_v21  ;;  %1438 = vmatmul.f32.gmra.mxu0 %v4638_v51  ;;  %1588 = vmatmul.f32.gmra.mxu1 %v4655_v58 }
 0x21e   : > { %v5156_v38 = vadd.f32 %v1337_v28, %v1137_v56  ;;  %1766 = vmatmul.f32.gmra.mxu2 %v4674_v2 }
 0x220   : > { %2012 = vmatmul.f32.gmra.mxu3 %v4655_v58 }
 0x221   : > { %v788_v11 = vpop.f32.mrf.mxu0  ;;  %v974_v59 = vpop.f32.mrf.mxu1 }
 0x222   : > { %v971_v55 = vadd.f32 %v970_v52, %v788_v11  ;;  %v1141_v12 = vpop.f32.mrf.mxu2 }
 0x223   : > { %v1343_v43 = vpop.f32.mrf.mxu3 }
 0x224   : > { %v1142_v15 = vadd.f32 %v1141_v12, %v971_v55  ;;  %1442 = vmatmul.f32.gmra.mxu0 %v4655_v58  ;;  %1592 = vmatmul.f32.gmra.mxu1 %v4672_v1 }
 0x226   : > { %v5162_v45 = vadd.f32 %v1343_v43, %v1142_v15  ;;  %1774 = vmatmul.f32.gmra.mxu2 %v4691_v9 }
 0x228   : > { %2016 = vmatmul.f32.gmra.mxu3 %v4672_v1 }
 0x229   : > { %v796_v35 = vpop.f32.mrf.mxu0  ;;  %v978_v2 = vpop.f32.mrf.mxu1 }
 0x22a   : > { %v975_v21 = vadd.f32 %v974_v59, %v796_v35  ;;  %v1146_v25 = vpop.f32.mrf.mxu2 }
 0x22b   : > { %v1349_v28 = vpop.f32.mrf.mxu3 }
 0x22c   : > { %v1147_v56 = vadd.f32 %v1146_v25, %v975_v21  ;;  %1446 = vmatmul.f32.gmra.mxu0 %v4672_v1  ;;  %1596 = vmatmul.f32.gmra.mxu1 %v4689_v8 }
 0x22e   : > { %v5168_v52 = vadd.f32 %v1349_v28, %v1147_v56  ;;  %1782 = vmatmul.f32.gmra.mxu2 %v4708_v27 }
 0x230   : > { %2020 = vmatmul.f32.gmra.mxu3 %v4689_v8 }
 0x231   : > { %v804_v11 = vpop.f32.mrf.mxu0  ;;  %v982_v9 = vpop.f32.mrf.mxu1 }
 0x232   : > { %v979_v55 = vadd.f32 %v978_v2, %v804_v11  ;;  %v1151_v12 = vpop.f32.mrf.mxu2 }
 0x233   : > { %v1355_v43 = vpop.f32.mrf.mxu3 }
 0x234   : > { %v1152_v15 = vadd.f32 %v1151_v12, %v979_v55  ;;  %1450 = vmatmul.f32.gmra.mxu0 %v4689_v8  ;;  %1600 = vmatmul.f32.gmra.mxu1 %v4706_v22 }
 0x236   : > { %v5174_v59 = vadd.f32 %v1355_v43, %v1152_v15  ;;  %1790 = vmatmul.f32.gmra.mxu2 %v4725_v42 }
 0x238   : > { %2024 = vmatmul.f32.gmra.mxu3 %v4706_v22 }
 0x239   : > { %v812_v35 = vpop.f32.mrf.mxu0  ;;  %v986_v27 = vpop.f32.mrf.mxu1 }
 0x23a   : > { %v983_v21 = vadd.f32 %v982_v9, %v812_v35  ;;  %v1156_v25 = vpop.f32.mrf.mxu2 }
 0x23b   : > { %v1361_v28 = vpop.f32.mrf.mxu3 }
 0x23c   : > { %v1157_v56 = vadd.f32 %v1156_v25, %v983_v21  ;;  %1454 = vmatmul.f32.gmra.mxu0 %v4706_v22  ;;  %1604 = vmatmul.f32.gmra.mxu1 %v4723_v41 }
 0x23e   : > { %v5180_v2 = vadd.f32 %v1361_v28, %v1157_v56  ;;  %1798 = vmatmul.f32.gmra.mxu2 %v4743_v5 }
 0x240   : > { %2028 = vmatmul.f32.gmra.mxu3 %v4723_v41 }
 0x241   : > { %v820_v11 = vpop.f32.mrf.mxu0  ;;  %v990_v42 = vpop.f32.mrf.mxu1 }
 0x242   : > { %v987_v55 = vadd.f32 %v986_v27, %v820_v11  ;;  %v1161_v12 = vpop.f32.mrf.mxu2 }
 0x243   : > { %v1367_v43 = vpop.f32.mrf.mxu3 }
 0x244   : > { %v1162_v15 = vadd.f32 %v1161_v12, %v987_v55  ;;  %1458 = vmatmul.f32.gmra.mxu0 %v4723_v41  ;;  %1608 = vmatmul.f32.gmra.mxu1 %v4741_v0 }
 0x246   : > { %v5186_v9 = vadd.f32 %v1367_v43, %v1162_v15  ;;  %1806 = vmatmul.f32.gmra.mxu2 %v4760_v48 }
 0x248   : > { %2032 = vmatmul.f32.gmra.mxu3 %v4741_v0 }
 0x249   : > { %v828_v35 = vpop.f32.mrf.mxu0  ;;  %v994_v5 = vpop.f32.mrf.mxu1 }
 0x24a   : > { %v991_v21 = vadd.f32 %v990_v42, %v828_v35  ;;  %v1166_v25 = vpop.f32.mrf.mxu2 }
 0x24b   : > { %v1373_v28 = vpop.f32.mrf.mxu3 }
 0x24c   : > { %v1167_v56 = vadd.f32 %v1166_v25, %v991_v21  ;;  %1462 = vmatmul.f32.gmra.mxu0 %v4741_v0  ;;  %1612 = vmatmul.f32.gmra.mxu1 %v4758_v36 }
 0x24e   : > { %v5192_v27 = vadd.f32 %v1373_v28, %v1167_v56  ;;  %1814 = vmatmul.f32.gmra.mxu2 %v4777_v6 }
 0x250   : > { %2036 = vmatmul.f32.gmra.mxu3 %v4758_v36 }
 0x251   : > { %v836_v11 = vpop.f32.mrf.mxu0  ;;  %v998_v48 = vpop.f32.mrf.mxu1 }
 0x252   : > { %v995_v55 = vadd.f32 %v994_v5, %v836_v11  ;;  %v1171_v12 = vpop.f32.mrf.mxu2 }
 0x253   : > { %v1379_v43 = vpop.f32.mrf.mxu3 }
 0x254   : > { %v1172_v15 = vadd.f32 %v1171_v12, %v995_v55  ;;  %1466 = vmatmul.f32.gmra.mxu0 %v4758_v36  ;;  %1616 = vmatmul.f32.gmra.mxu1 %v4775_v63 }
 0x256   : > { %v5198_v42 = vadd.f32 %v1379_v43, %v1172_v15  ;;  %1822 = vmatmul.f32.gmra.mxu2 %v4794_v62 }
 0x258   : > { %2040 = vmatmul.f32.gmra.mxu3 %v4775_v63 }
 0x259   : > { %v844_v35 = vpop.f32.mrf.mxu0  ;;  %v1002_v6 = vpop.f32.mrf.mxu1 }
 0x25a   : > { %v999_v21 = vadd.f32 %v998_v48, %v844_v35  ;;  %v1176_v25 = vpop.f32.mrf.mxu2 }
 0x25b   : > { %v1385_v28 = vpop.f32.mrf.mxu3 }
 0x25c   : > { %v1177_v56 = vadd.f32 %v1176_v25, %v999_v21  ;;  %1470 = vmatmul.f32.gmra.mxu0 %v4775_v63  ;;  %1620 = vmatmul.f32.gmra.mxu1 %v4792_v49 }
 0x25e   : > { %v5204_v5 = vadd.f32 %v1385_v28, %v1177_v56  ;;  %1830 = vmatmul.f32.gmra.mxu2 %v4811_v7 }
 0x260   : > { %2044 = vmatmul.f32.gmra.mxu3 %v4792_v49 }
 0x261   : > { %v852_v11 = vpop.f32.mrf.mxu0  ;;  %v1561_v62 = vpop.f32.mrf.mxu1 }
 0x262   : > { %v1003_v55 = vadd.f32 %v1002_v6, %v852_v11  ;;  %v1181_v12 = vpop.f32.mrf.mxu2 }
 0x263   : > { %v1391_v43 = vpop.f32.mrf.mxu3 }
 0x264   : > { %v1182_v15 = vadd.f32 %v1181_v12, %v1003_v55  ;;  %1474 = vmatmul.f32.gmra.mxu0 %v4792_v49  ;;  %1624 = vmatmul.f32.gmra.mxu1 %v4809_v57 }
 0x266   : > { %v5210_v48 = vadd.f32 %v1391_v43, %v1182_v15  ;;  %1838 = vmatmul.f32.gmra.mxu2 %v4828_v13 }
 0x268   : > { %2048 = vmatmul.f32.gmra.mxu3 %v4809_v57 }
 0x269   : > { %v1415_v35 = vpop.f32.mrf.mxu0  ;;  %v1565_v7 = vpop.f32.mrf.mxu1 }
 0x26a   : > { %v1416_v21 = vadd.f32 %v1415_v35, %v4835_v20  ;;  %v1711_v25 = vpop.f32.mrf.mxu2 }
 0x26b   : > { %v1985_v28 = vpop.f32.mrf.mxu3 }
 0x26c   : > { %v5215_v6 = vadd.f32 %v1985_v28, %v1711_v25  ;;  %1478 = vmatmul.f32.gmra.mxu0 %v4809_v57  ;;  %1628 = vmatmul.f32.gmra.mxu1 %v4826_v50  ;;  %v5219_v56 = vadd.f32 %v1561_v62, %v1416_v21 }
 0x26e   : > { %6615 = vst [vmem:[#allocation119_spill] sm:$0xff] %v5215_v6  ;;  %1846 = vmatmul.f32.gmra.mxu2 %v4847_v14 }
 0x270   : > { %2052 = vmatmul.f32.gmra.mxu3 %v4826_v50 }
 0x271   : > { %v1419_v13 = vpop.f32.mrf.mxu0  ;;  %v1569_v11 = vpop.f32.mrf.mxu1 }
 0x272   : > { %v1420_v55 = vadd.f32 %v1419_v13, %v4854_v3  ;;  %v1719_v12 = vpop.f32.mrf.mxu2 }
 0x273   : > { %v1989_v20 = vpop.f32.mrf.mxu3 }
 0x274   : > { %v5224_v43 = vadd.f32 %v1565_v7, %v1420_v55  ;;  %v5226_v15 = vadd.f32 %v1989_v20, %v1719_v12  ;;  %1482 = vmatmul.f32.gmra.mxu0 %v4826_v50  ;;  %1632 = vmatmul.f32.gmra.mxu1 %v4845_v34 }
 0x276   : > { %6616 = vst [vmem:[#allocation120_spill] sm:$0xff] %v5226_v15  ;;  %1854 = vmatmul.f32.gmra.mxu2 %v4866_v60 }
 0x278   : > { %2056 = vmatmul.f32.gmra.mxu3 %v4845_v34 }
 0x279   : > { %v1423_v14 = vpop.f32.mrf.mxu0  ;;  %v1573_v62 = vpop.f32.mrf.mxu1 }
 0x27a   : > { %v1424_v35 = vadd.f32 %v1423_v14, %v4873_v61  ;;  %v1727_v21 = vpop.f32.mrf.mxu2 }
 0x27b   : > { %v1993_v3 = vpop.f32.mrf.mxu3 }
 0x27c   : > { %v5233_v25 = vadd.f32 %v1569_v11, %v1424_v35  ;;  %v5235_v7 = vadd.f32 %v1993_v3, %v1727_v21  ;;  %1486 = vmatmul.f32.gmra.mxu0 %v4845_v34  ;;  %1636 = vmatmul.f32.gmra.mxu1 %v4864_v4 }
 0x27e   : > { %6617 = vst [vmem:[#allocation121_spill] sm:$0xff] %v5235_v7  ;;  %1862 = vmatmul.f32.gmra.mxu2 %v4885_v54 }
 0x280   : > { %2060 = vmatmul.f32.gmra.mxu3 %v4864_v4 }
 0x281   : > { %v1427_v60 = vpop.f32.mrf.mxu0  ;;  %v1577_v28 = vpop.f32.mrf.mxu1 }
 0x282   : > { %v1428_v13 = vadd.f32 %v1427_v60, %v4892_v46  ;;  %v1735_v55 = vpop.f32.mrf.mxu2  ;;  %v6620_v60 = vld [vmem:[#allocation72_spill] sm:$0xff] }
 0x283   : > { %v1997_v61 = vpop.f32.mrf.mxu3 }
 0x284   : > { %v5242_v12 = vadd.f32 %v1573_v62, %v1428_v13  ;;  %v5244_v11 = vadd.f32 %v1997_v61, %v1735_v55  ;;  %1490 = vmatmul.f32.gmra.mxu0 %v4864_v4  ;;  %1640 = vmatmul.f32.gmra.mxu1 %v4883_v53 }
 0x286   : > { %6618 = vst [vmem:[#allocation122_spill] sm:$0xff] %v5244_v11  ;;  %1870 = vmatmul.f32.gmra.mxu2 %v4904_v39 }
 0x288   : > { %2064 = vmatmul.f32.gmra.mxu3 %v4883_v53 }
 0x289   : > { %v1431_v54 = vpop.f32.mrf.mxu0  ;;  %v1581_v20 = vpop.f32.mrf.mxu1 }
 0x28a   : > { %v1432_v14 = vadd.f32 %v1431_v54, %v4911_v40  ;;  %v1743_v35 = vpop.f32.mrf.mxu2 }
 0x28b   : > { %v2001_v46 = vpop.f32.mrf.mxu3 }
 0x28c   : > { %v5251_v21 = vadd.f32 %v1577_v28, %v1432_v14  ;;  %v5253_v62 = vadd.f32 %v2001_v46, %v1743_v35  ;;  %1494 = vmatmul.f32.gmra.mxu0 %v4883_v53  ;;  %1644 = vmatmul.f32.gmra.mxu1 %v4902_v47  ;;  %v6622_v28 = vld [vmem:[#allocation70_spill] sm:$0xff]  ;;  %v6623_v14 = vld [vmem:[#allocation75_spill] sm:$0xff]  ;;  %v6624_v46 = vld [vmem:[#allocation77_spill] sm:$0xff] }
 0x28e   : > { %6619 = vst [vmem:[#allocation123_spill] sm:$0xff] %v5253_v62  ;;  %1878 = vmatmul.f32.gmra.mxu2 %v4923_v33 }
 0x290   : > { %2068 = vmatmul.f32.gmra.mxu3 %v4902_v47 }
 0x291   : > { %v1435_v39 = vpop.f32.mrf.mxu0  ;;  %v1585_v3 = vpop.f32.mrf.mxu1 }
 0x292   : > { %v1436_v13 = vadd.f32 %v1435_v39, %v6620_v60  ;;  %v1751_v55 = vpop.f32.mrf.mxu2 }
 0x293   : > { %v2005_v40 = vpop.f32.mrf.mxu3 }
 0x294   : > { %v5260_v61 = vadd.f32 %v2005_v40, %v1751_v55  ;;  %1498 = vmatmul.f32.gmra.mxu0 %v4902_v47  ;;  %1648 = vmatmul.f32.gmra.mxu1 %v6622_v28  ;;  %v5264_v54 = vadd.f32 %v1581_v20, %v1436_v13  ;;  %v6626_v40 = vld [vmem:[#allocation74_spill] sm:$0xff]  ;;  %v6627_v20 = vld [vmem:[#allocation80_spill] sm:$0xff] }
 0x296   : > { %6621 = vst [vmem:[#allocation72_spill] sm:$0xff] %v5260_v61  ;;  %1886 = vmatmul.f32.gmra.mxu2 %v6623_v14  ;;  %v6628_v61 = vld [vmem:[#allocation82_spill] sm:$0xff] }
 0x298   : > { %2072 = vmatmul.f32.gmra.mxu3 %v6622_v28 }
 0x299   : > { %v1439_v33 = vpop.f32.mrf.mxu0  ;;  %v1589_v35 = vpop.f32.mrf.mxu1 }
 0x29a   : > { %v1440_v62 = vadd.f32 %v1439_v33, %v6624_v46  ;;  %v1759_v53 = vpop.f32.mrf.mxu2 }
 0x29b   : > { %v2009_v39 = vpop.f32.mrf.mxu3 }
 0x29c   : > { %v5269_v60 = vadd.f32 %v1585_v3, %v1440_v62  ;;  %v5271_v55 = vadd.f32 %v2009_v39, %v1759_v53  ;;  %1502 = vmatmul.f32.gmra.mxu0 %v6622_v28  ;;  %1652 = vmatmul.f32.gmra.mxu1 %v6626_v40  ;;  %v6630_v53 = vld [vmem:[#allocation79_spill] sm:$0xff]  ;;  %v6631_v3 = vld [vmem:[#allocation85_spill] sm:$0xff] }
 0x29e   : > { %6625 = vst [vmem:[#allocation75_spill] sm:$0xff] %v5271_v55  ;;  %1894 = vmatmul.f32.gmra.mxu2 %v6627_v20  ;;  %v6632_v55 = vld [vmem:[#allocation87_spill] sm:$0xff] }
 0x2a0   : > { %2076 = vmatmul.f32.gmra.mxu3 %v6626_v40 }
 0x2a1   : > { %v1443_v13 = vpop.f32.mrf.mxu0  ;;  %v1593_v14 = vpop.f32.mrf.mxu1 }
 0x2a2   : > { %v1444_v47 = vadd.f32 %v1443_v13, %v6628_v61  ;;  %v1767_v11 = vpop.f32.mrf.mxu2 }
 0x2a3   : > { %v2013_v33 = vpop.f32.mrf.mxu3 }
 0x2a4   : > { %v5278_v46 = vadd.f32 %v1589_v35, %v1444_v47  ;;  %v5280_v62 = vadd.f32 %v2013_v33, %v1767_v11  ;;  %1506 = vmatmul.f32.gmra.mxu0 %v6626_v40  ;;  %1656 = vmatmul.f32.gmra.mxu1 %v6630_v53  ;;  %v6634_v11 = vld [vmem:[#allocation84_spill] sm:$0xff]  ;;  %v6635_v35 = vld [vmem:[#allocation90_spill] sm:$0xff] }
 0x2a6   : > { %6629 = vst [vmem:[#allocation77_spill] sm:$0xff] %v5280_v62  ;;  %1902 = vmatmul.f32.gmra.mxu2 %v6631_v3  ;;  %v6636_v62 = vld [vmem:[#allocation92_spill] sm:$0xff] }
 0x2a8   : > { %2080 = vmatmul.f32.gmra.mxu3 %v6630_v53 }
 0x2a9   : > { %v1447_v39 = vpop.f32.mrf.mxu0  ;;  %v1597_v20 = vpop.f32.mrf.mxu1 }
 0x2aa   : > { %v1448_v28 = vadd.f32 %v1447_v39, %v6632_v55  ;;  %v1775_v4 = vpop.f32.mrf.mxu2 }
 0x2ab   : > { %v2017_v61 = vpop.f32.mrf.mxu3 }
 0x2ac   : > { %v5287_v13 = vadd.f32 %v1593_v14, %v1448_v28  ;;  %v5289_v47 = vadd.f32 %v2017_v61, %v1775_v4  ;;  %1510 = vmatmul.f32.gmra.mxu0 %v6630_v53  ;;  %1660 = vmatmul.f32.gmra.mxu1 %v6634_v11  ;;  %v6638_v4 = vld [vmem:[#allocation89_spill] sm:$0xff]  ;;  %v6639_v14 = vld [vmem:[#allocation95_spill] sm:$0xff] }
 0x2ae   : > { %6633 = vst [vmem:[#allocation80_spill] sm:$0xff] %v5289_v47  ;;  %1910 = vmatmul.f32.gmra.mxu2 %v6635_v35  ;;  %v6640_v47 = vld [vmem:[#allocation97_spill] sm:$0xff] }
 0x2b0   : > { %2084 = vmatmul.f32.gmra.mxu3 %v6634_v11 }
 0x2b1   : > { %v1451_v33 = vpop.f32.mrf.mxu0  ;;  %v1601_v3 = vpop.f32.mrf.mxu1 }
 0x2b2   : > { %v1452_v40 = vadd.f32 %v1451_v33, %v6636_v62  ;;  %v1783_v7 = vpop.f32.mrf.mxu2 }
 0x2b3   : > { %v2021_v55 = vpop.f32.mrf.mxu3 }
 0x2b4   : > { %v5296_v39 = vadd.f32 %v1597_v20, %v1452_v40  ;;  %v5298_v28 = vadd.f32 %v2021_v55, %v1783_v7  ;;  %1514 = vmatmul.f32.gmra.mxu0 %v6634_v11  ;;  %1664 = vmatmul.f32.gmra.mxu1 %v6638_v4  ;;  %v6642_v7 = vld [vmem:[#allocation94_spill] sm:$0xff]  ;;  %v6643_v20 = vld [vmem:[#allocation100_spill] sm:$0xff] }
 0x2b6   : > { %6637 = vst [vmem:[#allocation82_spill] sm:$0xff] %v5298_v28  ;;  %1918 = vmatmul.f32.gmra.mxu2 %v6639_v14  ;;  %v6644_v28 = vld [vmem:[#allocation102_spill] sm:$0xff] }
 0x2b8   : > { %2088 = vmatmul.f32.gmra.mxu3 %v6638_v4 }
 0x2b9   : > { %v1455_v61 = vpop.f32.mrf.mxu0  ;;  %v1605_v35 = vpop.f32.mrf.mxu1 }
 0x2ba   : > { %v1456_v53 = vadd.f32 %v1455_v61, %v6640_v47  ;;  %v1791_v34 = vpop.f32.mrf.mxu2 }
 0x2bb   : > { %v2025_v62 = vpop.f32.mrf.mxu3 }
 0x2bc   : > { %v5305_v33 = vadd.f32 %v1601_v3, %v1456_v53  ;;  %v5307_v40 = vadd.f32 %v2025_v62, %v1791_v34  ;;  %1518 = vmatmul.f32.gmra.mxu0 %v6638_v4  ;;  %1668 = vmatmul.f32.gmra.mxu1 %v6642_v7  ;;  %v6646_v34 = vld [vmem:[#allocation99_spill] sm:$0xff]  ;;  %v6647_v3 = vld [vmem:[#allocation105_spill] sm:$0xff] }
 0x2be   : > { %6641 = vst [vmem:[#allocation85_spill] sm:$0xff] %v5307_v40  ;;  %1926 = vmatmul.f32.gmra.mxu2 %v6643_v20  ;;  %v6648_v40 = vld [vmem:[#allocation107_spill] sm:$0xff] }
 0x2c0   : > { %2092 = vmatmul.f32.gmra.mxu3 %v6642_v7 }
 0x2c1   : > { %v1459_v55 = vpop.f32.mrf.mxu0  ;;  %v1609_v14 = vpop.f32.mrf.mxu1 }
 0x2c2   : > { %v1460_v11 = vadd.f32 %v1459_v55, %v6644_v28  ;;  %v1799_v15 = vpop.f32.mrf.mxu2 }
 0x2c3   : > { %v2029_v47 = vpop.f32.mrf.mxu3 }
 0x2c4   : > { %v5314_v61 = vadd.f32 %v1605_v35, %v1460_v11  ;;  %v5316_v53 = vadd.f32 %v2029_v47, %v1799_v15  ;;  %1522 = vmatmul.f32.gmra.mxu0 %v6642_v7  ;;  %1672 = vmatmul.f32.gmra.mxu1 %v6646_v34  ;;  %v6650_v15 = vld [vmem:[#allocation104_spill] sm:$0xff]  ;;  %v6651_v35 = vld [vmem:[#allocation110_spill] sm:$0xff] }
 0x2c6   : > { %6645 = vst [vmem:[#allocation87_spill] sm:$0xff] %v5316_v53  ;;  %1934 = vmatmul.f32.gmra.mxu2 %v6647_v3  ;;  %v6652_v53 = vld [vmem:[#allocation112_spill] sm:$0xff] }
 0x2c8   : > { %2096 = vmatmul.f32.gmra.mxu3 %v6646_v34 }
 0x2c9   : > { %v1463_v62 = vpop.f32.mrf.mxu0  ;;  %v1613_v20 = vpop.f32.mrf.mxu1 }
 0x2ca   : > { %v1464_v4 = vadd.f32 %v1463_v62, %v6648_v40  ;;  %v1807_v50 = vpop.f32.mrf.mxu2 }
 0x2cb   : > { %v2033_v28 = vpop.f32.mrf.mxu3 }
 0x2cc   : > { %v5323_v55 = vadd.f32 %v1609_v14, %v1464_v4  ;;  %v5325_v11 = vadd.f32 %v2033_v28, %v1807_v50  ;;  %1526 = vmatmul.f32.gmra.mxu0 %v6646_v34  ;;  %1676 = vmatmul.f32.gmra.mxu1 %v6650_v15  ;;  %v6654_v50 = vld [vmem:[#allocation109_spill] sm:$0xff] }
 0x2ce   : > { %6649 = vst [vmem:[#allocation90_spill] sm:$0xff] %v5325_v11  ;;  %1942 = vmatmul.f32.gmra.mxu2 %v6651_v35  ;;  %v6655_v35 = vld [vmem:[#allocation116_spill] sm:$0xff] }
 0x2d0   : > { %2100 = vmatmul.f32.gmra.mxu3 %v6650_v15 }
 0x2d1   : > { %v1467_v47 = vpop.f32.mrf.mxu0  ;;  %v1617_v3 = vpop.f32.mrf.mxu1 }
 0x2d2   : > { %v1468_v7 = vadd.f32 %v1467_v47, %v6652_v53  ;;  %v1815_v6 = vpop.f32.mrf.mxu2 }
 0x2d3   : > { %v2037_v40 = vpop.f32.mrf.mxu3 }
 0x2d4   : > { %v5332_v62 = vadd.f32 %v1613_v20, %v1468_v7  ;;  %v5334_v4 = vadd.f32 %v2037_v40, %v1815_v6  ;;  %1530 = vmatmul.f32.gmra.mxu0 %v6650_v15  ;;  %1680 = vmatmul.f32.gmra.mxu1 %v6654_v50  ;;  %v6657_v6 = vld [vmem:[#allocation114_spill] sm:$0xff] }
 0x2d5   : > { %v6658_v40 = vld [vmem:[#allocation118_spill] sm:$0xff] }
 0x2d6   : > { %6653 = vst [vmem:[#allocation92_spill] sm:$0xff] %v5334_v4  ;;  %1950 = vmatmul.f32.gmra.mxu2 %v5094_v18 }
 0x2d8   : > { %2104 = vmatmul.f32.gmra.mxu3 %v6654_v50 }
 0x2d9   : > { %v1471_v14 = vpop.f32.mrf.mxu0  ;;  %v1621_v28 = vpop.f32.mrf.mxu1 }
 0x2da   : > { %v1472_v11 = vadd.f32 %v1471_v14, %v6655_v35  ;;  %v1823_v34 = vpop.f32.mrf.mxu2 }
 0x2db   : > { %v2041_v53 = vpop.f32.mrf.mxu3 }
 0x2dc   : > { %v5341_v47 = vadd.f32 %v1617_v3, %v1472_v11  ;;  %v5343_v7 = vadd.f32 %v2041_v53, %v1823_v34  ;;  %1534 = vmatmul.f32.gmra.mxu0 %v6654_v50  ;;  %1684 = vmatmul.f32.gmra.mxu1 %v6657_v6  ;;  %v6660_v34 = vld [vmem:[#allocation22_spill] sm:$0xff] }
 0x2de   : > { %6656 = vst [vmem:[#allocation95_spill] sm:$0xff] %v5343_v7  ;;  %1958 = vmatmul.f32.gmra.mxu2 %v5110_v26 }
 0x2e0   : > { %2108 = vmatmul.f32.gmra.mxu3 %v6657_v6 }
 0x2e1   : > { %v1475_v18 = vpop.f32.mrf.mxu0  ;;  %v1625_v20 = vpop.f32.mrf.mxu1 }
 0x2e2   : > { %v1476_v4 = vadd.f32 %v1475_v18, %v6658_v40  ;;  %v1831_v15 = vpop.f32.mrf.mxu2 }
 0x2e3   : > { %v2045_v14 = vpop.f32.mrf.mxu3 }
 0x2e4   : > { %v5350_v35 = vadd.f32 %v1621_v28, %v1476_v4  ;;  %v5352_v11 = vadd.f32 %v2045_v14, %v1831_v15  ;;  %1538 = vmatmul.f32.gmra.mxu0 %v6657_v6  ;;  %2311 = vmatmul.f32.vlgmr.msra.gmra.mxu1 %v6660_v34  ;;  %v6661_v15 = vld [vmem:[#allocation21_spill] sm:$0xff]  ;;  %v6662_v28 = vld [vmem:[#allocation24_spill] sm:$0xff] }
 0x2e6   : > { %6659 = vst [vmem:[#allocation97_spill] sm:$0xff] %v5352_v11  ;;  %2521 = vmatmul.f32.vlgmr.msra.gmra.mxu2 %v4539_v10 }
 0x2e8   : > { %2667 = vmatmul.f32.vlgmr.msra.gmra.mxu3 %v4539_v10 }
 0x2e9   : > { %v1479_v26 = vpop.f32.mrf.mxu0  ;;  %v1629_v3 = vpop.f32.mrf.mxu1 }
 0x2ea   : > { %v1480_v53 = vadd.f32 %v1479_v26, %v5120_v29  ;;  %v1839_v7 = vpop.f32.mrf.mxu2 }
 0x2eb   : > { %v2049_v18 = vpop.f32.mrf.mxu3 }
 0x2ec   : > { %v5359_v40 = vadd.f32 %v1625_v20, %v1480_v53  ;;  %v5361_v4 = vadd.f32 %v2049_v18, %v1839_v7  ;;  %2132 = vmatmul.f32.vlgmr.msra.gmra.mxu0 %v6661_v15  ;;  %2317 = vmatmul.f32.gmra.mxu1 %v6662_v28  ;;  %v6664_v7 = vld [vmem:[#allocation23_spill] sm:$0xff]  ;;  %v6665_v53 = vld [vmem:[#allocation26_spill] sm:$0xff] }
 0x2ee   : > { %2525 = vmatmul.f32.gmra.mxu2 %v4553_v16 }
 0x2f0   : > { %2671 = vmatmul.f32.gmra.mxu3 %v4553_v16 }
 0x2f1   : > { %v1483_v14 = vpop.f32.mrf.mxu0  ;;  %v1633_v10 = vpop.f32.mrf.mxu1 }
 0x2f2   : > { %v1484_v34 = vadd.f32 %v1483_v14, %v5126_v19  ;;  %v1847_v11 = vpop.f32.mrf.mxu2 }
 0x2f3   : > { %v2053_v29 = vpop.f32.mrf.mxu3 }
 0x2f4   : > { %v5368_v26 = vadd.f32 %v1629_v3, %v1484_v34  ;;  %v5370_v20 = vadd.f32 %v2053_v29, %v1847_v11  ;;  %2137 = vmatmul.f32.gmra.mxu0 %v6664_v7  ;;  %2323 = vmatmul.f32.gmra.mxu1 %v6665_v53  ;;  %v6666_v11 = vld [vmem:[#allocation25_spill] sm:$0xff]  ;;  %v6667_v34 = vld [vmem:[#allocation28_spill] sm:$0xff] }
 0x2f6   : > { %6663 = vst [vmem:[#allocation100_spill] sm:$0xff] %v5368_v26  ;;  %2529 = vmatmul.f32.gmra.mxu2 %v4570_v23 }
 0x2f8   : > { %2675 = vmatmul.f32.gmra.mxu3 %v4570_v23 }
 0x2f9   : > { %v1487_v18 = vpop.f32.mrf.mxu0  ;;  %v1637_v16 = vpop.f32.mrf.mxu1 }
 0x2fa   : > { %v1488_v15 = vadd.f32 %v1487_v18, %v5132_v32  ;;  %v1855_v28 = vpop.f32.mrf.mxu2 }
 0x2fb   : > { %v2057_v19 = vpop.f32.mrf.mxu3 }
 0x2fc   : > { %v5377_v14 = vadd.f32 %v1633_v10, %v1488_v15  ;;  %v5379_v3 = vadd.f32 %v2057_v19, %v1855_v28  ;;  %2142 = vmatmul.f32.gmra.mxu0 %v6666_v11  ;;  %2329 = vmatmul.f32.gmra.mxu1 %v6667_v34  ;;  %v6670_v15 = vld [vmem:[#allocation27_spill] sm:$0xff]  ;;  %v6671_v28 = vld [vmem:[#allocation30_spill] sm:$0xff]  ;;  %v6472_v19 = vmax.f32 %v5368_v26, 0.0 }
 0x2fe   : > { %2533 = vmatmul.f32.gmra.mxu2 %v4587_v30 }
 0x300   : > { %2679 = vmatmul.f32.gmra.mxu3 %v4587_v30 }
 0x301   : > { %v1491_v29 = vpop.f32.mrf.mxu0  ;;  %v1641_v23 = vpop.f32.mrf.mxu1 }
 0x302   : > { %v1492_v7 = vadd.f32 %v1491_v29, %v5138_v17  ;;  %v1863_v53 = vpop.f32.mrf.mxu2 }
 0x303   : > { %v2061_v32 = vpop.f32.mrf.mxu3 }
 0x304   : > { %v5386_v18 = vadd.f32 %v1637_v16, %v1492_v7  ;;  %v5388_v10 = vadd.f32 %v2061_v32, %v1863_v53  ;;  %2147 = vmatmul.f32.gmra.mxu0 %v6670_v15  ;;  %2335 = vmatmul.f32.gmra.mxu1 %v6671_v28  ;;  %v6673_v15 = vld [vmem:[#allocation29_spill] sm:$0xff]  ;;  %v6674_v28 = vld [vmem:[#allocation32_spill] sm:$0xff] }
 0x306   : > { %6668 = vst [vmem:[#allocation102_spill] sm:$0xff] %v5386_v18  ;;  %v6471_v11 = vmax.f32 %v5386_v18, 0.0  ;;  %2537 = vmatmul.f32.gmra.mxu2 %v4604_v37 }
 0x307   : > { %6669 = vst [vmem:[#allocation105_spill] sm:$0xff] %v5388_v10  ;;  %v6480_v10 = vmax.f32 %v5264_v54, 0.0 }
 0x308   : > { %v5399_v30 = vmin.f32 %v6471_v11, %v6472_v19  ;;  %2683 = vmatmul.f32.gmra.mxu3 %v4604_v37 }
 0x309   : > { %v1495_v17 = vpop.f32.mrf.mxu0  ;;  %v1645_v16 = vpop.f32.mrf.mxu1 }
 0x30a   : > { %v1496_v34 = vadd.f32 %v1495_v17, %v5144_v24  ;;  %v1871_v29 = vpop.f32.mrf.mxu2 }
 0x30b   : > { %v2065_v7 = vpop.f32.mrf.mxu3 }
 0x30c   : > { %v5403_v53 = vadd.f32 %v1641_v23, %v1496_v34  ;;  %v5405_v32 = vadd.f32 %v2065_v7, %v1871_v29  ;;  %2152 = vmatmul.f32.gmra.mxu0 %v6673_v15  ;;  %2341 = vmatmul.f32.gmra.mxu1 %v6674_v28  ;;  %v6676_v34 = vld [vmem:[#allocation31_spill] sm:$0xff]  ;;  %v6677_v29 = vld [vmem:[#allocation34_spill] sm:$0xff]  ;;  %v6474_v7 = vmax.f32 %v5233_v25, 0.0 }
 0x30e   : > { %6672 = vst [vmem:[#allocation107_spill] sm:$0xff] %v5405_v32  ;;  %2541 = vmatmul.f32.gmra.mxu2 %v4621_v44 }
 0x310   : > { %2687 = vmatmul.f32.gmra.mxu3 %v4621_v44 }
 0x311   : > { %v1499_v11 = vpop.f32.mrf.mxu0  ;;  %v1649_v37 = vpop.f32.mrf.mxu1 }
 0x312   : > { %v1500_v19 = vadd.f32 %v1499_v11, %v5150_v31  ;;  %v1879_v18 = vpop.f32.mrf.mxu2  ;;  %v6475_v31 = vmax.f32 %v5219_v56, 0.0  ;;  %v6680_v11 = vld [vmem:[#allocation36_spill] sm:$0xff] }
 0x313   : > { %v2069_v24 = vpop.f32.mrf.mxu3 }
 0x314   : > { %v5412_v17 = vadd.f32 %v1645_v16, %v1500_v19  ;;  %v5414_v23 = vadd.f32 %v2069_v24, %v1879_v18  ;;  %2157 = vmatmul.f32.gmra.mxu0 %v6676_v34  ;;  %2347 = vmatmul.f32.gmra.mxu1 %v6677_v29  ;;  %v2987_v28 = vmin.f32 %v6475_v31, %v6474_v7  ;;  %v6476_v24 = vmax.f32 %v5242_v12, 0.0 }
 0x315   : > { %v6478_v34 = vmax.f32 %v5269_v60, 0.0  ;;  %v6483_v7 = vmax.f32 %v5287_v13, 0.0 }
 0x316   : > { %6675 = vst [vmem:[#allocation110_spill] sm:$0xff] %v5414_v23  ;;  %2545 = vmatmul.f32.gmra.mxu2 %v4638_v51  ;;  %v6679_v23 = vld [vmem:[#allocation33_spill] sm:$0xff] }
 0x318   : > { %2691 = vmatmul.f32.gmra.mxu3 %v4638_v51 }
 0x319   : > { %v1503_v44 = vpop.f32.mrf.mxu0  ;;  %v1653_v15 = vpop.f32.mrf.mxu1 }
 0x31a   : > { %v1504_v19 = vadd.f32 %v1503_v44, %v5156_v38  ;;  %v1887_v18 = vpop.f32.mrf.mxu2  ;;  %v6477_v38 = vmax.f32 %v5224_v43, 0.0  ;;  %v6681_v44 = vmax.f32 %v5251_v21, 0.0 }
 0x31b   : > { %v2073_v16 = vpop.f32.mrf.mxu3 }
 0x31c   : > { %v5430_v51 = vadd.f32 %v1649_v37, %v1504_v19  ;;  %v5432_v29 = vadd.f32 %v2073_v16, %v1887_v18  ;;  %2162 = vmatmul.f32.gmra.mxu0 %v6679_v23  ;;  %2353 = vmatmul.f32.gmra.mxu1 %v6680_v11  ;;  %v2989_v32 = vmin.f32 %v2987_v28, %v6681_v44  ;;  %v6501_v11 = vmax.f32 %v5278_v46, 0.0 }
 0x31d   : > { %v2988_v37 = vmin.f32 %v6477_v38, %v6476_v24  ;;  %v6482_v38 = vmax.f32 %v5296_v39, 0.0 }
 0x31e   : > { %6678 = vst [vmem:[#allocation112_spill] sm:$0xff] %v5432_v29  ;;  %2549 = vmatmul.f32.gmra.mxu2 %v4655_v58  ;;  %v2991_v23 = vmin.f32 %v2989_v32, %v6478_v34  ;;  %v6481_v32 = vmax.f32 %v5323_v55, 0.0 }
 0x31f   : > { %v2990_v28 = vmin.f32 %v2988_v37, %v6480_v10  ;;  %v6683_v10 = vld [vmem:[#allocation35_spill] sm:$0xff] }
 0x320   : > { %2695 = vmatmul.f32.gmra.mxu3 %v4655_v58  ;;  %v2993_v44 = vmin.f32 %v2991_v23, %v6483_v7  ;;  %v6682_v58 = vmax.f32 %v5305_v33, 0.0  ;;  %v6684_v23 = vld [vmem:[#allocation38_spill] sm:$0xff] }
 0x321   : > { %v1507_v18 = vpop.f32.mrf.mxu0  ;;  %v1657_v16 = vpop.f32.mrf.mxu1  ;;  %v2992_v19 = vmin.f32 %v2990_v28, %v6501_v11  ;;  %v6708_v11 = vld [vmem:[#allocation56_spill] sm:$0xff] }
 0x322   : > { %v1508_v31 = vadd.f32 %v1507_v18, %v5162_v45  ;;  %v1895_v24 = vpop.f32.mrf.mxu2  ;;  %v2995_v29 = vmin.f32 %v2993_v44, %v6682_v58  ;;  %v6500_v45 = vmax.f32 %v5314_v61, 0.0  ;;  %v6484_v18 = vmax.f32 %v5341_v47, 0.0 }
 0x323   : > { %v2077_v34 = vpop.f32.mrf.mxu3  ;;  %v2994_v28 = vmin.f32 %v2992_v19, %v6482_v38 }
 0x324   : > { %v5462_v26 = vadd.f32 %v1653_v15, %v1508_v31  ;;  %v5464_v37 = vadd.f32 %v2077_v34, %v1895_v24  ;;  %2167 = vmatmul.f32.gmra.mxu0 %v6683_v10  ;;  %2359 = vmatmul.f32.gmra.mxu1 %v6684_v23  ;;  %v2997_v44 = vmin.f32 %v2995_v29, %v6481_v32  ;;  %v6499_v15 = vmax.f32 %v5332_v62, 0.0 }
 0x325   : > { %v2996_v10 = vmin.f32 %v2994_v28, %v6500_v45  ;;  %v6497_v24 = vmax.f32 %v5350_v35, 0.0  ;;  %v6685_v28 = vld [vmem:[#allocation37_spill] sm:$0xff] }
 0x326   : > { %2553 = vmatmul.f32.gmra.mxu2 %v4672_v1  ;;  %v2999_v31 = vmin.f32 %v2997_v44, %v6484_v18  ;;  %v6686_v44 = vld [vmem:[#allocation40_spill] sm:$0xff] }
 0x327   : > { %v2998_v29 = vmin.f32 %v2996_v10, %v6499_v15  ;;  %v6707_v15 = vld [vmem:[#allocation120_spill] sm:$0xff] }
 0x328   : > { %2699 = vmatmul.f32.gmra.mxu3 %v4672_v1  ;;  %v3001_v32 = vmin.f32 %v2999_v31, %v5399_v30 }
 0x329   : > { %v1511_v34 = vpop.f32.mrf.mxu0  ;;  %v1661_v58 = vpop.f32.mrf.mxu1  ;;  %v3000_v18 = vmin.f32 %v2998_v29, %v6497_v24  ;;  %v6687_v29 = vld [vmem:[#allocation39_spill] sm:$0xff] }
 0x32a   : > { %v1512_v23 = vadd.f32 %v1511_v34, %v5168_v52  ;;  %v1903_v19 = vpop.f32.mrf.mxu2  ;;  %v6706_v24 = vld [vmem:[#allocation55_spill] sm:$0xff] }
 0x32b   : > { %v2081_v38 = vpop.f32.mrf.mxu3  ;;  %v3003_v52 = vmin.f32 %v3001_v32, %v3000_v18  ;;  %v6688_v32 = vld [vmem:[#allocation42_spill] sm:$0xff] }
 0x32c   : > { %v5486_v1 = vadd.f32 %v1657_v16, %v1512_v23  ;;  %v5488_v7 = vadd.f32 %v2081_v38, %v1903_v19  ;;  %2172 = vmatmul.f32.gmra.mxu0 %v6685_v28  ;;  %2365 = vmatmul.f32.gmra.mxu1 %v6686_v44 }
 0x32e   : > { %2557 = vmatmul.f32.gmra.mxu2 %v4689_v8  ;;  %v6488_v34 = vmax.f32 %v5486_v1, 0.0 }
 0x330   : > { %2703 = vmatmul.f32.gmra.mxu3 %v4689_v8  ;;  %v3005_v30 = vmin.f32 %v3003_v52, %v6488_v34  ;;  %v6695_v34 = vld [vmem:[#allocation47_spill] sm:$0xff] }
 0x331   : > { %v1515_v16 = vpop.f32.mrf.mxu0  ;;  %v1665_v38 = vpop.f32.mrf.mxu1 }
 0x332   : > { %v1516_v10 = vadd.f32 %v1515_v16, %v5174_v59  ;;  %v1911_v31 = vpop.f32.mrf.mxu2 }
 0x333   : > { %v2085_v23 = vpop.f32.mrf.mxu3 }
 0x334   : > { %v5500_v19 = vadd.f32 %v1661_v58, %v1516_v10  ;;  %v5502_v28 = vadd.f32 %v2085_v23, %v1911_v31  ;;  %2177 = vmatmul.f32.gmra.mxu0 %v6687_v29  ;;  %2371 = vmatmul.f32.gmra.mxu1 %v6688_v32  ;;  %v6689_v23 = vld [vmem:[#allocation41_spill] sm:$0xff]  ;;  %v6690_v29 = vld [vmem:[#allocation44_spill] sm:$0xff] }
 0x336   : > { %2561 = vmatmul.f32.gmra.mxu2 %v4706_v22  ;;  %v6486_v8 = vmax.f32 %v5500_v19, 0.0 }
 0x338   : > { %2707 = vmatmul.f32.gmra.mxu3 %v4706_v22  ;;  %v3007_v18 = vmin.f32 %v3005_v30, %v6486_v8  ;;  %v6693_v8 = vld [vmem:[#allocation45_spill] sm:$0xff] }
 0x339   : > { %v1519_v59 = vpop.f32.mrf.mxu0  ;;  %v1669_v44 = vpop.f32.mrf.mxu1 }
 0x33a   : > { %v1520_v58 = vadd.f32 %v1519_v59, %v5180_v2  ;;  %v1919_v52 = vpop.f32.mrf.mxu2 }
 0x33b   : > { %v2089_v16 = vpop.f32.mrf.mxu3 }
 0x33c   : > { %v5512_v10 = vadd.f32 %v1665_v38, %v1520_v58  ;;  %v5514_v31 = vadd.f32 %v2089_v16, %v1919_v52  ;;  %2182 = vmatmul.f32.gmra.mxu0 %v6689_v23  ;;  %2377 = vmatmul.f32.gmra.mxu1 %v6690_v29  ;;  %v6691_v23 = vld [vmem:[#allocation43_spill] sm:$0xff]  ;;  %v6692_v29 = vld [vmem:[#allocation46_spill] sm:$0xff] }
 0x33e   : > { %2565 = vmatmul.f32.gmra.mxu2 %v4723_v41  ;;  %v6485_v22 = vmax.f32 %v5512_v10, 0.0 }
 0x340   : > { %2711 = vmatmul.f32.gmra.mxu3 %v4723_v41  ;;  %v3009_v30 = vmin.f32 %v3007_v18, %v6485_v22 }
 0x341   : > { %v1523_v2 = vpop.f32.mrf.mxu0  ;;  %v1673_v32 = vpop.f32.mrf.mxu1 }
 0x342   : > { %v1524_v38 = vadd.f32 %v1523_v2, %v5186_v9  ;;  %v1927_v59 = vpop.f32.mrf.mxu2  ;;  %v6490_v9 = vmax.f32 %v5430_v51, 0.0 }
 0x343   : > { %v2093_v58 = vpop.f32.mrf.mxu3 }
 0x344   : > { %v5524_v52 = vadd.f32 %v1669_v44, %v1524_v38  ;;  %v5526_v16 = vadd.f32 %v2093_v58, %v1927_v59  ;;  %2187 = vmatmul.f32.gmra.mxu0 %v6691_v23  ;;  %2383 = vmatmul.f32.gmra.mxu1 %v6692_v29 }
 0x346   : > { %2569 = vmatmul.f32.gmra.mxu2 %v4741_v0  ;;  %v6487_v41 = vmax.f32 %v5524_v52, 0.0 }
 0x348   : > { %2715 = vmatmul.f32.gmra.mxu3 %v4741_v0  ;;  %v3011_v18 = vmin.f32 %v3009_v30, %v6487_v41  ;;  %v6694_v0 = vld [vmem:[#allocation48_spill] sm:$0xff] }
 0x349   : > { %v1527_v2 = vpop.f32.mrf.mxu0  ;;  %v1677_v44 = vpop.f32.mrf.mxu1 }
 0x34a   : > { %v1528_v38 = vadd.f32 %v1527_v2, %v5192_v27  ;;  %v1935_v59 = vpop.f32.mrf.mxu2  ;;  %v3013_v58 = vmin.f32 %v3011_v18, %v6490_v9  ;;  %v6492_v18 = vmax.f32 %v5403_v53, 0.0  ;;  %v6697_v9 = vld [vmem:[#allocation49_spill] sm:$0xff] }
 0x34b   : > { %v2097_v23 = vpop.f32.mrf.mxu3 }
 0x34c   : > { %v5539_v29 = vadd.f32 %v1673_v32, %v1528_v38  ;;  %v5541_v22 = vadd.f32 %v2097_v23, %v1935_v59  ;;  %2192 = vmatmul.f32.gmra.mxu0 %v6693_v8  ;;  %2389 = vmatmul.f32.gmra.mxu1 %v6694_v0 }
 0x34e   : > { %2573 = vmatmul.f32.gmra.mxu2 %v4758_v36  ;;  %v6489_v30 = vmax.f32 %v5539_v29, 0.0 }
 0x350   : > { %2719 = vmatmul.f32.gmra.mxu3 %v4758_v36  ;;  %v3015_v27 = vmin.f32 %v3013_v58, %v6489_v30  ;;  %v6696_v36 = vld [vmem:[#allocation50_spill] sm:$0xff] }
 0x351   : > { %v1531_v2 = vpop.f32.mrf.mxu0  ;;  %v1681_v32 = vpop.f32.mrf.mxu1 }
 0x352   : > { %v1532_v38 = vadd.f32 %v1531_v2, %v5198_v42  ;;  %v1943_v59 = vpop.f32.mrf.mxu2  ;;  %v3004_v8 = vmin.f32 %v6492_v18, %v3015_v27  ;;  %v6494_v27 = vmax.f32 %v5377_v14, 0.0  ;;  %v6700_v18 = vld [vmem:[#allocation51_spill] sm:$0xff] }
 0x353   : > { %v2101_v23 = vpop.f32.mrf.mxu3 }
 0x354   : > { %v5554_v0 = vadd.f32 %v1677_v44, %v1532_v38  ;;  %v5556_v41 = vadd.f32 %v2101_v23, %v1943_v59  ;;  %2197 = vmatmul.f32.gmra.mxu0 %v6695_v34  ;;  %2395 = vmatmul.f32.gmra.mxu1 %v6696_v36 }
 0x356   : > { %2577 = vmatmul.f32.gmra.mxu2 %v4775_v63  ;;  %v6491_v58 = vmax.f32 %v5554_v0, 0.0 }
 0x358   : > { %2723 = vmatmul.f32.gmra.mxu3 %v4775_v63  ;;  %v3006_v42 = vmin.f32 %v3004_v8, %v6491_v58  ;;  %v6698_v63 = vld [vmem:[#allocation52_spill] sm:$0xff] }
 0x359   : > { %v1535_v2 = vpop.f32.mrf.mxu0  ;;  %v1685_v44 = vpop.f32.mrf.mxu1 }
 0x35a   : > { %v1536_v38 = vadd.f32 %v1535_v2, %v5204_v5  ;;  %v1951_v59 = vpop.f32.mrf.mxu2  ;;  %v3008_v34 = vmin.f32 %v3006_v42, %v6494_v27  ;;  %v6495_v42 = vmax.f32 %v5359_v40, 0.0 }
 0x35b   : > { %v2105_v23 = vpop.f32.mrf.mxu3 }
 0x35c   : > { %v5569_v36 = vadd.f32 %v1681_v32, %v1536_v38  ;;  %v5571_v30 = vadd.f32 %v2105_v23, %v1951_v59  ;;  %2202 = vmatmul.f32.gmra.mxu0 %v6697_v9  ;;  %2401 = vmatmul.f32.gmra.mxu1 %v6698_v63 }
 0x35e   : > { %2581 = vmatmul.f32.gmra.mxu2 %v4792_v49  ;;  %v6493_v8 = vmax.f32 %v5569_v36, 0.0 }
 0x360   : > { %2727 = vmatmul.f32.gmra.mxu3 %v4792_v49  ;;  %v3010_v5 = vmin.f32 %v3008_v34, %v6493_v8  ;;  %v6701_v49 = vld [vmem:[#allocation54_spill] sm:$0xff] }
 0x361   : > { %v1539_v2 = vpop.f32.mrf.mxu0  ;;  %v2312_v32 = vpop.f32.mrf.mxu1 }
 0x362   : > { %v1540_v38 = vadd.f32 %v1539_v2, %v5210_v48  ;;  %v1959_v59 = vpop.f32.mrf.mxu2  ;;  %v3012_v9 = vmin.f32 %v3010_v5, %v6495_v42  ;;  %v6498_v5 = vmax.f32 %v5462_v26, 0.0  ;;  %v6703_v42 = vld [vmem:[#allocation53_spill] sm:$0xff] }
 0x363   : > { %v2109_v23 = vpop.f32.mrf.mxu3 }
 0x364   : > { %v5584_v63 = vadd.f32 %v1685_v44, %v1540_v38  ;;  %v5586_v58 = vadd.f32 %v2109_v23, %v1959_v59  ;;  %2207 = vmatmul.f32.gmra.mxu0 %v6700_v18  ;;  %2407 = vmatmul.f32.gmra.mxu1 %v6701_v49  ;;  %v6702_v38 = vld [vmem:[#allocation119_spill] sm:$0xff]  ;;  %v6502_v49 = vmax.f32 %v5412_v17, 0.0 }
 0x366   : > { %6699 = vst [vmem:[#allocation109_spill] sm:$0xff] %v5584_v63  ;;  %2585 = vmatmul.f32.gmra.mxu2 %v4809_v57  ;;  %v6496_v34 = vmax.f32 %v5584_v63, 0.0 }
 0x368   : > { %2731 = vmatmul.f32.gmra.mxu3 %v4809_v57  ;;  %v3014_v48 = vmin.f32 %v3012_v9, %v6496_v34  ;;  %v6704_v57 = vld [vmem:[#allocation57_spill] sm:$0xff] }
 0x369   : > { %v2133_v2 = vpop.f32.mrf.mxu0  ;;  %v2318_v44 = vpop.f32.mrf.mxu1 }
 0x36a   : > { %v2134_v59 = vadd.f32 %v2133_v2, %v6702_v38  ;;  %v2522_v23 = vpop.f32.mrf.mxu2  ;;  %v3016_v18 = vmin.f32 %v3014_v48, %v6498_v5 }
 0x36b   : > { %v2668_v8 = vpop.f32.mrf.mxu3 }
 0x36c   : > { %v2313_v27 = vadd.f32 %v2312_v32, %v2134_v59  ;;  %2212 = vmatmul.f32.gmra.mxu0 %v6703_v42  ;;  %2413 = vmatmul.f32.gmra.mxu1 %v6704_v57  ;;  %v5604_v9 = vmin.f32 %v6502_v49, %v3016_v18  ;;  %v6709_v57 = vld [vmem:[#allocation60_spill] sm:$0xff]  ;;  %v6710_v18 = vmax.f32 %v5219_v56, 0.0  ;;  %v6711_v49 = vld [vmem:[#allocation58_spill] sm:$0xff]  ;;  %v6714_v56 = vld [vmem:[#allocation63_spill] sm:$0xff] }
 0x36e   : > { %6705 = vst [vmem:[#allocation116_spill] sm:$0xff] %v5604_v9  ;;  %v2523_v34 = vadd.f32 %v2522_v23, %v2313_v27  ;;  %2589 = vmatmul.f32.gmra.mxu2 %v6706_v24  ;;  %v6718_v9 = vld [vmem:[#allocation62_spill] sm:$0xff] }
 0x370   : > { %v2669_v2 = vadd.f32 %v2668_v8, %v2523_v34  ;;  %2735 = vmatmul.f32.gmra.mxu3 %v6706_v24 }
 0x371   : > { %v2138_v38 = vpop.f32.mrf.mxu0  ;;  %v2324_v48 = vpop.f32.mrf.mxu1 }
 0x372   : > { %v2796_v5 = vmax.f32 %v2669_v2, 0.0  ;;  %v2139_v45 = vadd.f32 %v2138_v38, %v6707_v15  ;;  %v2526_v32 = vpop.f32.mrf.mxu2  ;;  %v6712_v38 = vld [vmem:[#allocation121_spill] sm:$0xff] }
 0x373   : > { %v2672_v59 = vpop.f32.mrf.mxu3 }
 0x374   : > { %v2319_v42 = vadd.f32 %v2318_v44, %v2139_v45  ;;  %2217 = vmatmul.f32.gmra.mxu0 %v6708_v11  ;;  %2419 = vmatmul.f32.gmra.mxu1 %v6709_v57  ;;  %v2859_v27 = vmin.f32 %v6710_v18, %v2796_v5  ;;  %v6713_v57 = vld [vmem:[#allocation59_spill] sm:$0xff] }
 0x376   : > { %v2527_v23 = vadd.f32 %v2526_v32, %v2319_v42  ;;  %2593 = vmatmul.f32.gmra.mxu2 %v6711_v49  ;;  %v2923_v8 = vmin.f32 %v2859_v27, 1e+30  ;;  %v6715_v32 = vmax.f32 %v5224_v43, 0.0  ;;  %v6719_v43 = vld [vmem:[#allocation66_spill] sm:$0xff] }
 0x378   : > { %v2673_v24 = vadd.f32 %v2672_v59, %v2527_v23  ;;  %2739 = vmatmul.f32.gmra.mxu3 %v6711_v49  ;;  %3109 = vmin.xlane.f32.xlu2 %v2923_v8  ;;  %v6716_v59 = vld [vmem:[#allocation61_spill] sm:$0xff] }
 0x379   : > { %v2143_v34 = vpop.f32.mrf.mxu0  ;;  %v2330_v15 = vpop.f32.mrf.mxu1 }
 0x37a   : > { %v2798_v2 = vmax.f32 %v2673_v24, 0.0  ;;  %v2144_v45 = vadd.f32 %v2143_v34, %v6712_v38  ;;  %v2530_v44 = vpop.f32.mrf.mxu2  ;;  %v6717_v34 = vld [vmem:[#allocation122_spill] sm:$0xff] }
 0x37b   : > { %v2676_v11 = vpop.f32.mrf.mxu3 }
 0x37c   : > { %v2325_v63 = vadd.f32 %v2324_v48, %v2144_v45  ;;  %2222 = vmatmul.f32.gmra.mxu0 %v6713_v57  ;;  %2425 = vmatmul.f32.gmra.mxu1 %v6714_v56  ;;  %v2860_v42 = vmin.f32 %v6715_v32, %v2798_v2  ;;  %v6721_v32 = vld [vmem:[#allocation64_spill] sm:$0xff] }
 0x37e   : > { %v2531_v18 = vadd.f32 %v2530_v44, %v2325_v63  ;;  %2597 = vmatmul.f32.gmra.mxu2 %v6716_v59  ;;  %v2924_v49 = vmin.f32 %v2860_v42, 1e+30  ;;  %v6720_v63 = vmax.f32 %v5233_v25, 0.0  ;;  %v6724_v25 = vld [vmem:[#allocation69_spill] sm:$0xff] }
 0x380   : > { %v2677_v27 = vadd.f32 %v2676_v11, %v2531_v18  ;;  %2743 = vmatmul.f32.gmra.mxu3 %v6716_v59  ;;  %3111 = vmin.xlane.f32.xlu2 %v2924_v49 }
 0x381   : > { %v2148_v23 = vpop.f32.mrf.mxu0  ;;  %v2336_v8 = vpop.f32.mrf.mxu1 }
 0x382   : > { %v2800_v24 = vmax.f32 %v2677_v27, 0.0  ;;  %v2149_v48 = vadd.f32 %v2148_v23, %v6717_v34  ;;  %v2534_v38 = vpop.f32.mrf.mxu2 }
 0x383   : > { %v2680_v45 = vpop.f32.mrf.mxu3 }
 0x384   : > { %v3024_v57 = vmin.f32 %v2796_v5, %v2800_v24  ;;  %v2331_v56 = vadd.f32 %v2330_v15, %v2149_v48  ;;  %2227 = vmatmul.f32.gmra.mxu0 %v6718_v9  ;;  %2431 = vmatmul.f32.gmra.mxu1 %v6719_v43  ;;  %v2861_v44 = vmin.f32 %v6720_v63, %v2800_v24  ;;  %v6722_v5 = vld [vmem:[#allocation123_spill] sm:$0xff]  ;;  %v6723_v43 = vld [vmem:[#allocation65_spill] sm:$0xff]  ;;  %v6725_v24 = vmax.f32 %v5242_v12, 0.0 }
 0x385   : > { %v6729_v12 = vld [vmem:[#allocation73_spill] sm:$0xff] }
 0x386   : > { %v2535_v11 = vadd.f32 %v2534_v38, %v2331_v56  ;;  %2601 = vmatmul.f32.gmra.mxu2 %v6721_v32  ;;  %v2925_v42 = vmin.f32 %v2861_v44, 1e+30  ;;  %v6726_v56 = vld [vmem:[#allocation67_spill] sm:$0xff] }
 0x388   : > { %v2681_v18 = vadd.f32 %v2680_v45, %v2535_v11  ;;  %2747 = vmatmul.f32.gmra.mxu3 %v6721_v32  ;;  %3113 = vmin.xlane.f32.xlu2 %v2925_v42 }
 0x389   : > { %v2153_v59 = vpop.f32.mrf.mxu0  ;;  %v2342_v49 = vpop.f32.mrf.mxu1 }
 0x38a   : > { %v2802_v27 = vmax.f32 %v2681_v18, 0.0  ;;  %v2154_v15 = vadd.f32 %v2153_v59, %v6722_v5  ;;  %v2538_v23 = vpop.f32.mrf.mxu2 }
 0x38b   : > { %v2684_v9 = vpop.f32.mrf.mxu3 }
 0x38c   : > { %v3025_v34 = vmin.f32 %v2798_v2, %v2802_v27  ;;  %v2337_v48 = vadd.f32 %v2336_v8, %v2154_v15  ;;  %2232 = vmatmul.f32.gmra.mxu0 %v6723_v43  ;;  %2437 = vmatmul.f32.gmra.mxu1 %v6724_v25  ;;  %v2862_v38 = vmin.f32 %v6725_v24, %v2802_v27  ;;  %v6727_v2 = vld [vmem:[#allocation72_spill] sm:$0xff]  ;;  %v6730_v27 = vmax.f32 %v5251_v21, 0.0  ;;  %v6734_v21 = vld [vmem:[#allocation78_spill] sm:$0xff] }
 0x38d   : > { %v6728_v43 = vld [vmem:[#allocation68_spill] sm:$0xff] }
 0x38e   : > { %v2539_v45 = vadd.f32 %v2538_v23, %v2337_v48  ;;  %2605 = vmatmul.f32.gmra.mxu2 %v6726_v56  ;;  %v2926_v63 = vmin.f32 %v2862_v38, 1e+30  ;;  %v6731_v48 = vld [vmem:[#allocation70_spill] sm:$0xff] }
 0x390   : > { %v2685_v44 = vadd.f32 %v2684_v9, %v2539_v45  ;;  %2751 = vmatmul.f32.gmra.mxu3 %v6726_v56  ;;  %3115 = vmin.xlane.f32.xlu2 %v2926_v63 }
 0x391   : > { %v2158_v11 = vpop.f32.mrf.mxu0  ;;  %v2348_v32 = vpop.f32.mrf.mxu1 }
 0x392   : > { %v2804_v42 = vmax.f32 %v2685_v44, 0.0  ;;  %v2159_v8 = vadd.f32 %v2158_v11, %v6727_v2  ;;  %v2542_v18 = vpop.f32.mrf.mxu2 }
 0x393   : > { %v2688_v59 = vpop.f32.mrf.mxu3 }
 0x394   : > { %v3026_v5 = vmin.f32 %v3024_v57, %v2804_v42  ;;  %v2343_v15 = vadd.f32 %v2342_v49, %v2159_v8  ;;  %2237 = vmatmul.f32.gmra.mxu0 %v6728_v43  ;;  %2443 = vmatmul.f32.gmra.mxu1 %v6729_v12  ;;  %v2863_v23 = vmin.f32 %v6730_v27, %v2804_v42  ;;  %v6732_v57 = vld [vmem:[#allocation75_spill] sm:$0xff]  ;;  %v6735_v42 = vmax.f32 %v5264_v54, 0.0 }
 0x395   : > { %v6733_v8 = vld [vmem:[#allocation71_spill] sm:$0xff] }
 0x396   : > { %v2543_v9 = vadd.f32 %v2542_v18, %v2343_v15  ;;  %2609 = vmatmul.f32.gmra.mxu2 %v6731_v48  ;;  %v2927_v25 = vmin.f32 %v2863_v23, 1e+30  ;;  %v6736_v15 = vld [vmem:[#allocation74_spill] sm:$0xff]  ;;  %v6739_v54 = vld [vmem:[#allocation83_spill] sm:$0xff] }
 0x398   : > { %v2689_v24 = vadd.f32 %v2688_v59, %v2543_v9  ;;  %2755 = vmatmul.f32.gmra.mxu3 %v6731_v48  ;;  %3117 = vmin.xlane.f32.xlu2 %v2927_v25 }
 0x399   : > { %v2163_v38 = vpop.f32.mrf.mxu0  ;;  %v2354_v45 = vpop.f32.mrf.mxu1 }
 0x39a   : > { %v2806_v56 = vmax.f32 %v2689_v24, 0.0  ;;  %v2164_v49 = vadd.f32 %v2163_v38, %v6732_v57  ;;  %v2546_v63 = vpop.f32.mrf.mxu2  ;;  %v6738_v57 = vld [vmem:[#allocation76_spill] sm:$0xff] }
 0x39b   : > { %v2692_v44 = vpop.f32.mrf.mxu3 }
 0x39c   : > { %v3027_v11 = vmin.f32 %v3025_v34, %v2806_v56  ;;  %v2349_v2 = vadd.f32 %v2348_v32, %v2164_v49  ;;  %2242 = vmatmul.f32.gmra.mxu0 %v6733_v8  ;;  %2449 = vmatmul.f32.gmra.mxu1 %v6734_v21  ;;  %v2864_v18 = vmin.f32 %v6735_v42, %v2806_v56  ;;  %v6737_v34 = vld [vmem:[#allocation77_spill] sm:$0xff]  ;;  %v6740_v56 = vmax.f32 %v5269_v60, 0.0  ;;  %v6744_v60 = vld [vmem:[#allocation88_spill] sm:$0xff] }
 0x39e   : > { %v2547_v59 = vadd.f32 %v2546_v63, %v2349_v2  ;;  %2613 = vmatmul.f32.gmra.mxu2 %v6736_v15  ;;  %v2928_v43 = vmin.f32 %v2864_v18, 1e+30 }
 0x3a0   : > { %v2693_v12 = vadd.f32 %v2692_v44, %v2547_v59  ;;  %2759 = vmatmul.f32.gmra.mxu3 %v6736_v15  ;;  %3119 = vmin.xlane.f32.xlu1 %v2928_v43  ;;  %v6741_v44 = vld [vmem:[#allocation79_spill] sm:$0xff] }
 0x3a1   : > { %v2168_v27 = vpop.f32.mrf.mxu0  ;;  %v2360_v23 = vpop.f32.mrf.mxu1 }
 0x3a2   : > { %v2808_v9 = vmax.f32 %v2693_v12, 0.0  ;;  %v2169_v32 = vadd.f32 %v2168_v27, %v6737_v34  ;;  %v2550_v48 = vpop.f32.mrf.mxu2  ;;  %v6743_v27 = vld [vmem:[#allocation81_spill] sm:$0xff] }
 0x3a3   : > { %v2696_v25 = vpop.f32.mrf.mxu3 }
 0x3a4   : > { %v3028_v24 = vmin.f32 %v3026_v5, %v2808_v9  ;;  %v2355_v38 = vadd.f32 %v2354_v45, %v2169_v32  ;;  %2247 = vmatmul.f32.gmra.mxu0 %v6738_v57  ;;  %2455 = vmatmul.f32.gmra.mxu1 %v6739_v54  ;;  %v2865_v49 = vmin.f32 %v6740_v56, %v2808_v9  ;;  %v6742_v5 = vld [vmem:[#allocation80_spill] sm:$0xff]  ;;  %v6745_v9 = vmax.f32 %v5278_v46, 0.0  ;;  %v6749_v46 = vld [vmem:[#allocation93_spill] sm:$0xff] }
 0x3a6   : > { %v2551_v63 = vadd.f32 %v2550_v48, %v2355_v38  ;;  %2617 = vmatmul.f32.gmra.mxu2 %v6741_v44  ;;  %v2929_v2 = vmin.f32 %v2865_v49, 1e+30  ;;  %v6746_v48 = vld [vmem:[#allocation84_spill] sm:$0xff] }
 0x3a8   : > { %v2697_v8 = vadd.f32 %v2696_v25, %v2551_v63  ;;  %2763 = vmatmul.f32.gmra.mxu3 %v6741_v44  ;;  %3121 = vmin.xlane.f32.xlu2 %v2929_v2 }
 0x3a9   : > { %v2173_v21 = vpop.f32.mrf.mxu0  ;;  %v2366_v42 = vpop.f32.mrf.mxu1 }
 0x3aa   : > { %v2810_v18 = vmax.f32 %v2697_v8, 0.0  ;;  %v2174_v45 = vadd.f32 %v2173_v21, %v6742_v5  ;;  %v2554_v59 = vpop.f32.mrf.mxu2  ;;  %v6748_v8 = vld [vmem:[#allocation86_spill] sm:$0xff]  ;;  %v6750_v21 = vmax.f32 %v5287_v13, 0.0 }
 0x3ab   : > { %v2700_v15 = vpop.f32.mrf.mxu3  ;;  %v6754_v13 = vld [vmem:[#allocation98_spill] sm:$0xff] }
 0x3ac   : > { %v3029_v43 = vmin.f32 %v3027_v11, %v2810_v18  ;;  %v2361_v12 = vadd.f32 %v2360_v23, %v2174_v45  ;;  %2252 = vmatmul.f32.gmra.mxu0 %v6743_v27  ;;  %2461 = vmatmul.f32.gmra.mxu1 %v6744_v60  ;;  %v2866_v34 = vmin.f32 %v6745_v9, %v2810_v18  ;;  %v6747_v11 = vld [vmem:[#allocation82_spill] sm:$0xff]  ;;  %v6751_v45 = vld [vmem:[#allocation89_spill] sm:$0xff] }
 0x3ae   : > { %v2555_v32 = vadd.f32 %v2554_v59, %v2361_v12  ;;  %2621 = vmatmul.f32.gmra.mxu2 %v6746_v48  ;;  %v2930_v25 = vmin.f32 %v2866_v34, 1e+30 }
 0x3b0   : > { %v2701_v38 = vadd.f32 %v2700_v15, %v2555_v32  ;;  %2767 = vmatmul.f32.gmra.mxu3 %v6746_v48  ;;  %3123 = vmin.xlane.f32.xlu1 %v2930_v25  ;;  %v6753_v25 = vld [vmem:[#allocation91_spill] sm:$0xff] }
 0x3b1   : > { %v2178_v57 = vpop.f32.mrf.mxu0  ;;  %v2372_v54 = vpop.f32.mrf.mxu1 }
 0x3b2   : > { %v2812_v56 = vmax.f32 %v2701_v38, 0.0  ;;  %v2179_v23 = vadd.f32 %v2178_v57, %v6747_v11  ;;  %v2558_v49 = vpop.f32.mrf.mxu2  ;;  %v6755_v38 = vmax.f32 %v5296_v39, 0.0  ;;  %v6756_v11 = vld [vmem:[#allocation94_spill] sm:$0xff]  ;;  %v6759_v39 = vld [vmem:[#allocation103_spill] sm:$0xff] }
 0x3b3   : > { %v2704_v63 = vpop.f32.mrf.mxu3 }
 0x3b4   : > { %v3030_v44 = vmin.f32 %v3028_v24, %v2812_v56  ;;  %v2367_v2 = vadd.f32 %v2366_v42, %v2179_v23  ;;  %2257 = vmatmul.f32.gmra.mxu0 %v6748_v8  ;;  %2467 = vmatmul.f32.gmra.mxu1 %v6749_v46  ;;  %v2867_v18 = vmin.f32 %v6750_v21, %v2812_v56  ;;  %v6752_v24 = vld [vmem:[#allocation85_spill] sm:$0xff] }
 0x3b6   : > { %v2559_v5 = vadd.f32 %v2558_v49, %v2367_v2  ;;  %2625 = vmatmul.f32.gmra.mxu2 %v6751_v45  ;;  %v2931_v59 = vmin.f32 %v2867_v18, 1e+30 }
 0x3b8   : > { %v2705_v15 = vadd.f32 %v2704_v63, %v2559_v5  ;;  %2771 = vmatmul.f32.gmra.mxu3 %v6751_v45  ;;  %3125 = vmin.xlane.f32.xlu2 %v2931_v59  ;;  %v6758_v45 = vld [vmem:[#allocation96_spill] sm:$0xff]  ;;  %v6760_v59 = vmax.f32 %v5305_v33, 0.0 }
 0x3b9   : > { %v2183_v12 = vpop.f32.mrf.mxu0  ;;  %v2378_v27 = vpop.f32.mrf.mxu1  ;;  %v6764_v33 = vld [vmem:[#allocation108_spill] sm:$0xff] }
 0x3ba   : > { %v2814_v60 = vmax.f32 %v2705_v15, 0.0  ;;  %v2184_v42 = vadd.f32 %v2183_v12, %v6752_v24  ;;  %v2562_v9 = vpop.f32.mrf.mxu2 }
 0x3bb   : > { %v2708_v34 = vpop.f32.mrf.mxu3 }
 0x3bc   : > { %v3031_v32 = vmin.f32 %v3029_v43, %v2814_v60  ;;  %v2373_v48 = vadd.f32 %v2372_v54, %v2184_v42  ;;  %2262 = vmatmul.f32.gmra.mxu0 %v6753_v25  ;;  %2473 = vmatmul.f32.gmra.mxu1 %v6754_v13  ;;  %v2868_v57 = vmin.f32 %v6755_v38, %v2814_v60  ;;  %v6757_v43 = vld [vmem:[#allocation87_spill] sm:$0xff] }
 0x3bd   : > { %v6761_v60 = vld [vmem:[#allocation99_spill] sm:$0xff] }
 0x3be   : > { %v2563_v56 = vadd.f32 %v2562_v9, %v2373_v48  ;;  %2629 = vmatmul.f32.gmra.mxu2 %v6756_v11  ;;  %v2932_v23 = vmin.f32 %v2868_v57, 1e+30 }
 0x3c0   : > { %v2709_v49 = vadd.f32 %v2708_v34, %v2563_v56  ;;  %2775 = vmatmul.f32.gmra.mxu3 %v6756_v11  ;;  %3127 = vmin.xlane.f32.xlu1 %v2932_v23  ;;  %v6763_v56 = vld [vmem:[#allocation101_spill] sm:$0xff]  ;;  %v6765_v11 = vmax.f32 %v5314_v61, 0.0 }
 0x3c1   : > { %v2188_v63 = vpop.f32.mrf.mxu0  ;;  %v2384_v2 = vpop.f32.mrf.mxu1  ;;  %v6769_v61 = vld [vmem:[#allocation113_spill] sm:$0xff] }
 0x3c2   : > { %v2816_v8 = vmax.f32 %v2709_v49, 0.0  ;;  %v2189_v54 = vadd.f32 %v2188_v63, %v6757_v43  ;;  %v2566_v46 = vpop.f32.mrf.mxu2  ;;  %v6766_v63 = vld [vmem:[#allocation104_spill] sm:$0xff] }
 0x3c3   : > { %v2712_v21 = vpop.f32.mrf.mxu3 }
 0x3c4   : > { %v3032_v18 = vmin.f32 %v3030_v44, %v2816_v8  ;;  %v2379_v5 = vadd.f32 %v2378_v27, %v2189_v54  ;;  %2267 = vmatmul.f32.gmra.mxu0 %v6758_v45  ;;  %2479 = vmatmul.f32.gmra.mxu1 %v6759_v39  ;;  %v2869_v15 = vmin.f32 %v6760_v59, %v2816_v8  ;;  %v6762_v44 = vld [vmem:[#allocation90_spill] sm:$0xff] }
 0x3c6   : > { %v2567_v12 = vadd.f32 %v2566_v46, %v2379_v5  ;;  %2633 = vmatmul.f32.gmra.mxu2 %v6761_v60  ;;  %v2933_v24 = vmin.f32 %v2869_v15, 1e+30  ;;  %v6768_v15 = vld [vmem:[#allocation106_spill] sm:$0xff] }
 0x3c8   : > { %v2713_v42 = vadd.f32 %v2712_v21, %v2567_v12  ;;  %2779 = vmatmul.f32.gmra.mxu3 %v6761_v60  ;;  %3129 = vmin.xlane.f32.xlu2 %v2933_v24  ;;  %v6770_v12 = vmax.f32 %v5323_v55, 0.0  ;;  %v6773_v55 = vld [vmem:[#allocation117_spill] sm:$0xff] }
 0x3c9   : > { %v2193_v9 = vpop.f32.mrf.mxu0  ;;  %v2390_v34 = vpop.f32.mrf.mxu1 }
 0x3ca   : > { %v2818_v48 = vmax.f32 %v2713_v42, 0.0  ;;  %v2194_v27 = vadd.f32 %v2193_v9, %v6762_v44  ;;  %v2570_v25 = vpop.f32.mrf.mxu2 }
 0x3cb   : > { %v2716_v13 = vpop.f32.mrf.mxu3 }
 0x3cc   : > { %v3033_v38 = vmin.f32 %v3031_v32, %v2818_v48  ;;  %v2385_v57 = vadd.f32 %v2384_v2, %v2194_v27  ;;  %2272 = vmatmul.f32.gmra.mxu0 %v6763_v56  ;;  %2485 = vmatmul.f32.gmra.mxu1 %v6764_v33  ;;  %v2870_v23 = vmin.f32 %v6765_v11, %v2818_v48  ;;  %v6767_v32 = vld [vmem:[#allocation92_spill] sm:$0xff]  ;;  %v6772_v33 = vld [vmem:[#allocation111_spill] sm:$0xff]  ;;  %v6774_v11 = vmax.f32 %v5332_v62, 0.0 }
 0x3cd   : > { %v6777_v62 = vmax.f32 %v5341_v47, 0.0 }
 0x3ce   : > { %v2571_v49 = vadd.f32 %v2570_v25, %v2385_v57  ;;  %2637 = vmatmul.f32.gmra.mxu2 %v6766_v63  ;;  %v2934_v8 = vmin.f32 %v2870_v23, 1e+30 }
 0x3d0   : > { %v2717_v43 = vadd.f32 %v2716_v13, %v2571_v49  ;;  %2783 = vmatmul.f32.gmra.mxu3 %v6766_v63  ;;  %3131 = vmin.xlane.f32.xlu1 %v2934_v8 }
 0x3d1   : > { %v2198_v54 = vpop.f32.mrf.mxu0  ;;  %v2396_v46 = vpop.f32.mrf.mxu1 }
 0x3d2   : > { %v2820_v21 = vmax.f32 %v2717_v43, 0.0  ;;  %v2199_v2 = vadd.f32 %v2198_v54, %v6767_v32  ;;  %v2574_v5 = vpop.f32.mrf.mxu2 }
 0x3d3   : > { %v2720_v45 = vpop.f32.mrf.mxu3 }
 0x3d4   : > { %v3034_v39 = vmin.f32 %v3032_v18, %v2820_v21  ;;  %v2391_v59 = vadd.f32 %v2390_v34, %v2199_v2  ;;  %2277 = vmatmul.f32.gmra.mxu0 %v6768_v15  ;;  %2491 = vmatmul.f32.gmra.mxu1 %v6769_v61  ;;  %v2871_v60 = vmin.f32 %v6770_v12, %v2820_v21  ;;  %v6771_v18 = vld [vmem:[#allocation95_spill] sm:$0xff] }
 0x3d6   : > { %v2575_v24 = vadd.f32 %v2574_v5, %v2391_v59  ;;  %2641 = vmatmul.f32.gmra.mxu2 %v6654_v50  ;;  %v2935_v42 = vmin.f32 %v2871_v60, 1e+30 }
 0x3d8   : > { %v2721_v9 = vadd.f32 %v2720_v45, %v2575_v24  ;;  %2787 = vmatmul.f32.gmra.mxu3 %v6654_v50  ;;  %3133 = vmin.xlane.f32.xlu2 %v2935_v42  ;;  %v6776_v45 = vld [vmem:[#allocation115_spill] sm:$0xff] }
 0x3d9   : > { %v2203_v48 = vpop.f32.mrf.mxu0  ;;  %v2402_v44 = vpop.f32.mrf.mxu1 }
 0x3da   : > { %v2822_v27 = vmax.f32 %v2721_v9, 0.0  ;;  %v2204_v34 = vadd.f32 %v2203_v48, %v6771_v18  ;;  %v2578_v25 = vpop.f32.mrf.mxu2 }
 0x3db   : > { %v2724_v13 = vpop.f32.mrf.mxu3 }
 0x3dc   : > { %v3035_v57 = vmin.f32 %v3033_v38, %v2822_v27  ;;  %v2397_v56 = vadd.f32 %v2396_v46, %v2204_v34  ;;  %2282 = vmatmul.f32.gmra.mxu0 %v6772_v33  ;;  %2497 = vmatmul.f32.gmra.mxu1 %v6773_v55  ;;  %v2872_v23 = vmin.f32 %v6774_v11, %v2822_v27  ;;  %v6775_v38 = vld [vmem:[#allocation97_spill] sm:$0xff] }
 0x3de   : > { %v2579_v49 = vadd.f32 %v2578_v25, %v2397_v56  ;;  %2645 = vmatmul.f32.gmra.mxu2 %v6657_v6  ;;  %v2936_v50 = vmin.f32 %v2872_v23, 1e+30 }
 0x3e0   : > { %v2725_v63 = vadd.f32 %v2724_v13, %v2579_v49  ;;  %2791 = vmatmul.f32.gmra.mxu3 %v6657_v6  ;;  %3135 = vmin.xlane.f32.xlu2 %v2936_v50  ;;  %v6779_v50 = vmax.f32 %v5359_v40, 0.0 }
 0x3e1   : > { %v2208_v8 = vpop.f32.mrf.mxu0  ;;  %v2408_v43 = vpop.f32.mrf.mxu1 }
 0x3e2   : > { %v2824_v54 = vmax.f32 %v2725_v63, 0.0  ;;  %v2209_v46 = vadd.f32 %v2208_v8, %v6775_v38  ;;  %v2582_v21 = vpop.f32.mrf.mxu2 }
 0x3e3   : > { %v2728_v32 = vpop.f32.mrf.mxu3 }
 0x3e4   : > { %v3036_v2 = vmin.f32 %v3034_v39, %v2824_v54  ;;  %v2403_v5 = vadd.f32 %v2402_v44, %v2209_v46  ;;  %2287 = vmatmul.f32.gmra.mxu0 %v6776_v45  ;;  %v2873_v59 = vmin.f32 %v6777_v62, %v2824_v54  ;;  %v6778_v39 = vmax.f32 %v5350_v35, 0.0 }
 0x3e6   : > { %v2583_v15 = vadd.f32 %v2582_v21, %v2403_v5  ;;  %v2937_v61 = vmin.f32 %v2873_v59, 1e+30 }
 0x3e8   : > { %v2729_v12 = vadd.f32 %v2728_v32, %v2583_v15  ;;  %3137 = vmin.xlane.f32.xlu1 %v2937_v61 }
 0x3e9   : > { %v2213_v6 = vpop.f32.mrf.mxu0  ;;  %v2414_v60 = vpop.f32.mrf.mxu1 }
 0x3ea   : > { %v2826_v24 = vmax.f32 %v2729_v12, 0.0  ;;  %v2214_v42 = vadd.f32 %v2213_v6, %v5361_v4  ;;  %v2586_v9 = vpop.f32.mrf.mxu2  ;;  %v6782_v12 = vld [vmem:[#allocation105_spill] sm:$0xff] }
 0x3eb   : > { %v2732_v48 = vpop.f32.mrf.mxu3 }
 0x3ec   : > { %v3037_v27 = vmin.f32 %v3035_v57, %v2826_v24  ;;  %v2409_v18 = vadd.f32 %v2408_v43, %v2214_v42  ;;  %v2874_v44 = vmin.f32 %v6778_v39, %v2826_v24 }
 0x3ee   : > { %v2587_v34 = vadd.f32 %v2586_v9, %v2409_v18  ;;  %v2938_v25 = vmin.f32 %v2874_v44, 1e+30 }
 0x3f0   : > { %v2733_v47 = vadd.f32 %v2732_v48, %v2587_v34  ;;  %3139 = vmin.xlane.f32.xlu1 %v2938_v25  ;;  %v6784_v25 = vld [vmem:[#allocation107_spill] sm:$0xff] }
 0x3f1   : > { %v2218_v13 = vpop.f32.mrf.mxu0  ;;  %v2420_v56 = vpop.f32.mrf.mxu1 }
 0x3f2   : > { %v2828_v33 = vmax.f32 %v2733_v47, 0.0  ;;  %v2219_v55 = vadd.f32 %v2218_v13, %v5370_v20  ;;  %v2590_v11 = vpop.f32.mrf.mxu2  ;;  %v6780_v20 = vld [vmem:[#allocation100_spill] sm:$0xff] }
 0x3f3   : > { %v2736_v23 = vpop.f32.mrf.mxu3  ;;  %v6781_v45 = vmax.f32 %v6780_v20, 0.0  ;;  %v6788_v20 = vmax.f32 %v5403_v53, 0.0 }
 0x3f4   : > { %v3038_v49 = vmin.f32 %v3036_v2, %v2828_v33  ;;  %v2415_v4 = vadd.f32 %v2414_v60, %v2219_v55  ;;  %v5716_v57 = vmin.f32 %v6779_v50, %v2828_v33  ;;  %v5729_v33 = vpop.xlane.xlu2 %3109 }
 0x3f6   : > { %v2591_v63 = vadd.f32 %v2590_v11, %v2415_v4 }
 0x3f8   : > { %v2737_v35 = vadd.f32 %v2736_v23, %v2591_v63  ;;  %v6785_v23 = vld [vmem:[#allocation102_spill] sm:$0xff] }
 0x3f9   : > { %v2223_v8 = vpop.f32.mrf.mxu0  ;;  %v2426_v43 = vpop.f32.mrf.mxu1 }
 0x3fa   : > { %v2830_v54 = vmax.f32 %v2737_v35, 0.0  ;;  %v2224_v38 = vadd.f32 %v2223_v8, %v5379_v3  ;;  %v2594_v46 = vpop.f32.mrf.mxu2  ;;  %v6783_v3 = vmax.f32 %v5377_v14, 0.0 }
 0x3fb   : > { %v2740_v21 = vpop.f32.mrf.mxu3 }
 0x3fc   : > { %v3039_v32 = vmin.f32 %v3037_v27, %v2830_v54  ;;  %v2421_v5 = vadd.f32 %v2420_v56, %v2224_v38  ;;  %v5721_v62 = vmin.f32 %v6781_v45, %v2830_v54 }
 0x3fe   : > { %v2595_v2 = vadd.f32 %v2594_v46, %v2421_v5 }
 0x400   : > { %v2741_v59 = vadd.f32 %v2740_v21, %v2595_v2 }
 0x401   : > { %v2228_v40 = vpop.f32.mrf.mxu0  ;;  %v2432_v15 = vpop.f32.mrf.mxu1 }
 0x402   : > { %v2832_v61 = vmax.f32 %v2741_v59, 0.0  ;;  %v2229_v6 = vadd.f32 %v2228_v40, %v6782_v12  ;;  %v2598_v60 = vpop.f32.mrf.mxu2  ;;  %v6789_v12 = vld [vmem:[#allocation112_spill] sm:$0xff] }
 0x403   : > { %v2744_v24 = vpop.f32.mrf.mxu3 }
 0x404   : > { %v3040_v42 = vmin.f32 %v3038_v49, %v2832_v61  ;;  %v2427_v9 = vadd.f32 %v2426_v43, %v2229_v6  ;;  %v5726_v48 = vmin.f32 %v6783_v3, %v2832_v61  ;;  %v6786_v49 = vmax.f32 %v6785_v23, 0.0  ;;  %v6787_v43 = vld [vmem:[#allocation110_spill] sm:$0xff] }
 0x406   : > { %v2599_v27 = vadd.f32 %v2598_v60, %v2427_v9 }
 0x408   : > { %v2745_v18 = vadd.f32 %v2744_v24, %v2599_v27 }
 0x409   : > { %v2233_v39 = vpop.f32.mrf.mxu0  ;;  %v2438_v44 = vpop.f32.mrf.mxu1 }
 0x40a   : > { %v2834_v34 = vmax.f32 %v2745_v18, 0.0  ;;  %v2234_v47 = vadd.f32 %v2233_v39, %v6784_v25  ;;  %v2602_v13 = vpop.f32.mrf.mxu2 }
 0x40b   : > { %v2748_v56 = vpop.f32.mrf.mxu3 }
 0x40c   : > { %v3041_v55 = vmin.f32 %v3039_v32, %v2834_v34  ;;  %v2433_v11 = vadd.f32 %v2432_v15, %v2234_v47  ;;  %v5733_v4 = vmin.f32 %v6786_v49, %v2834_v34  ;;  %v5740_v32 = vpop.xlane.xlu2 %3111 }
 0x40e   : > { %v2603_v14 = vadd.f32 %v2602_v13, %v2433_v11 }
 0x410   : > { %v2749_v50 = vadd.f32 %v2748_v56, %v2603_v14 }
 0x411   : > { %v2238_v63 = vpop.f32.mrf.mxu0  ;;  %v2444_v35 = vpop.f32.mrf.mxu1 }
 0x412   : > { %v2836_v8 = vmax.f32 %v2749_v50, 0.0  ;;  %v2239_v54 = vadd.f32 %v2238_v63, %v6787_v43  ;;  %v2606_v38 = vpop.f32.mrf.mxu2 }
 0x413   : > { %v2752_v46 = vpop.f32.mrf.mxu3 }
 0x414   : > { %v3042_v21 = vmin.f32 %v3040_v42, %v2836_v8  ;;  %v2439_v5 = vadd.f32 %v2438_v44, %v2239_v54  ;;  %v5738_v45 = vmin.f32 %v6788_v20, %v2836_v8  ;;  %v6790_v42 = vmax.f32 %v5412_v17, 0.0  ;;  %v5747_v18 = vpop.xlane.xlu2 %3113 }
 0x416   : > { %v2607_v2 = vadd.f32 %v2606_v38, %v2439_v5 }
 0x418   : > { %v2753_v59 = vadd.f32 %v2752_v46, %v2607_v2 }
 0x419   : > { %v2243_v40 = vpop.f32.mrf.mxu0  ;;  %v2450_v15 = vpop.f32.mrf.mxu1 }
 0x41a   : > { %v2838_v61 = vmax.f32 %v2753_v59, 0.0  ;;  %v2244_v6 = vadd.f32 %v2243_v40, %v6789_v12  ;;  %v2610_v60 = vpop.f32.mrf.mxu2 }
 0x41b   : > { %v2756_v24 = vpop.f32.mrf.mxu3 }
 0x41c   : > { %v3043_v9 = vmin.f32 %v3041_v55, %v2838_v61  ;;  %v2445_v3 = vadd.f32 %v2444_v35, %v2244_v6  ;;  %v5745_v27 = vmin.f32 %v6790_v42, %v2838_v61  ;;  %v6791_v55 = vmax.f32 %v5430_v51, 0.0  ;;  %v5754_v35 = vpop.xlane.xlu2 %3115 }
 0x41e   : > { %v2611_v53 = vadd.f32 %v2610_v60, %v2445_v3 }
 0x420   : > { %v2757_v39 = vadd.f32 %v2756_v24, %v2611_v53  ;;  %v6793_v24 = vmax.f32 %v5486_v1, 0.0  ;;  %v6794_v1 = vmax.f32 %v5500_v19, 0.0 }
 0x421   : > { %v2248_v44 = vpop.f32.mrf.mxu0  ;;  %v2456_v34 = vpop.f32.mrf.mxu1 }
 0x422   : > { %v2840_v25 = vmax.f32 %v2757_v39, 0.0  ;;  %v2249_v47 = vadd.f32 %v2248_v44, %v5464_v37  ;;  %v2614_v13 = vpop.f32.mrf.mxu2  ;;  %v5766_v39 = vpop.xlane.xlu1 %3119 }
 0x423   : > { %v2760_v56 = vpop.f32.mrf.mxu3 }
 0x424   : > { %v3044_v11 = vmin.f32 %v3042_v21, %v2840_v25  ;;  %v2451_v23 = vadd.f32 %v2450_v15, %v2249_v47  ;;  %v5752_v49 = vmin.f32 %v6791_v55, %v2840_v25  ;;  %v6792_v21 = vmax.f32 %v5462_v26, 0.0  ;;  %v5762_v6 = vpop.xlane.xlu2 %3117 }
 0x426   : > { %v2615_v17 = vadd.f32 %v2614_v13, %v2451_v23 }
 0x428   : > { %v2761_v14 = vadd.f32 %v2760_v56, %v2615_v17 }
 0x429   : > { %v2253_v50 = vpop.f32.mrf.mxu0  ;;  %v2462_v63 = vpop.f32.mrf.mxu1 }
 0x42a   : > { %v2842_v8 = vmax.f32 %v2761_v14, 0.0  ;;  %v2254_v43 = vadd.f32 %v2253_v50, %v5488_v7  ;;  %v2618_v54 = vpop.f32.mrf.mxu2 }
 0x42b   : > { %v2764_v38 = vpop.f32.mrf.mxu3 }
 0x42c   : > { %v3045_v37 = vmin.f32 %v3043_v9, %v2842_v8  ;;  %v2457_v46 = vadd.f32 %v2456_v34, %v2254_v43  ;;  %v5759_v5 = vmin.f32 %v6792_v21, %v2842_v8  ;;  %v5769_v13 = vpop.xlane.xlu2 %3121  ;;  %v6795_v21 = vmax.f32 %v5512_v10, 0.0 }
 0x42d   : > { %v6796_v10 = vmax.f32 %v5524_v52, 0.0 }
 0x42e   : > { %v2619_v51 = vadd.f32 %v2618_v54, %v2457_v46 }
 0x430   : > { %v2765_v20 = vadd.f32 %v2764_v38, %v2619_v51 }
 0x431   : > { %v2258_v2 = vpop.f32.mrf.mxu0  ;;  %v2468_v59 = vpop.f32.mrf.mxu1 }
 0x432   : > { %v2844_v40 = vmax.f32 %v2765_v20, 0.0  ;;  %v2259_v15 = vadd.f32 %v2258_v2, %v5502_v28  ;;  %v2622_v61 = vpop.f32.mrf.mxu2 }
 0x433   : > { %v2768_v12 = vpop.f32.mrf.mxu3 }
 0x434   : > { %v3046_v7 = vmin.f32 %v3044_v11, %v2844_v40  ;;  %v2463_v60 = vadd.f32 %v2462_v63, %v2259_v15  ;;  %v2883_v9 = vmin.f32 %v6793_v24, %v2844_v40  ;;  %v5776_v38 = vpop.xlane.xlu2 %3125 }
 0x436   : > { %v2623_v3 = vadd.f32 %v2622_v61, %v2463_v60  ;;  %v2947_v26 = vmin.f32 %v2883_v9, 1e+30 }
 0x438   : > { %v2769_v42 = vadd.f32 %v2768_v12, %v2623_v3  ;;  %3157 = vmin.xlane.f32.xlu2 %v2947_v26 }
 0x439   : > { %v2263_v53 = vpop.f32.mrf.mxu0  ;;  %v2474_v25 = vpop.f32.mrf.mxu1 }
 0x43a   : > { %v2846_v44 = vmax.f32 %v2769_v42, 0.0  ;;  %v2264_v34 = vadd.f32 %v2263_v53, %v5514_v31  ;;  %v2626_v28 = vpop.f32.mrf.mxu2  ;;  %v5774_v31 = vpop.xlane.xlu1 %3123  ;;  %v2945_v53 = vmin.f32 %v5752_v49, 1e+30 }
 0x43b   : > { %v2772_v47 = vpop.f32.mrf.mxu3 }
 0x43c   : > { %v3047_v56 = vmin.f32 %v3045_v37, %v2846_v44  ;;  %v2469_v11 = vadd.f32 %v2468_v59, %v2264_v34  ;;  %v2884_v23 = vmin.f32 %v6794_v1, %v2846_v44  ;;  %v5783_v24 = vpop.xlane.xlu2 %3129 }
 0x43e   : > { %v2627_v55 = vadd.f32 %v2626_v28, %v2469_v11  ;;  %v2948_v17 = vmin.f32 %v2884_v23, 1e+30 }
 0x440   : > { %v2773_v14 = vadd.f32 %v2772_v47, %v2627_v55  ;;  %3159 = vmin.xlane.f32.xlu1 %v2948_v17  ;;  %v6797_v55 = vmax.f32 %v5539_v29, 0.0 }
 0x441   : > { %v2268_v50 = vpop.f32.mrf.mxu0  ;;  %v2480_v51 = vpop.f32.mrf.mxu1 }
 0x442   : > { %v2848_v63 = vmax.f32 %v2773_v14, 0.0  ;;  %v2269_v8 = vadd.f32 %v2268_v50, %v5526_v16  ;;  %v2630_v43 = vpop.f32.mrf.mxu2  ;;  %v5781_v12 = vpop.xlane.xlu1 %3127  ;;  %v2943_v50 = vmin.f32 %v5738_v45, 1e+30 }
 0x443   : > { %v2776_v54 = vpop.f32.mrf.mxu3 }
 0x444   : > { %v3048_v46 = vmin.f32 %v3046_v7, %v2848_v63  ;;  %v2475_v37 = vadd.f32 %v2474_v25, %v2269_v8  ;;  %v2885_v19 = vmin.f32 %v6795_v21, %v2848_v63  ;;  %v376_v63 = vlaneseq }
 0x445   : > { %v4371_v21 = vmov 1e+30  }
 0x446   : > { %v2631_v20 = vadd.f32 %v2630_v43, %v2475_v37  ;;  %v2949_v2 = vmin.f32 %v2885_v19, 1e+30  ;;  %vm5794_vm1 = vcmp.lt.s32.totalorder %v376_v63, 256 }
 0x447   : > { %380 = vst.msk [vmem:[#allocation3] sm:$0x3] %vm5794_vm1, %v4371_v21 }
 0x448   : > { %v2777_v59 = vadd.f32 %v2776_v54, %v2631_v20  ;;  %3161 = vmin.xlane.f32.xlu2 %v2949_v2  ;;  %v6800_v20 = vmax.f32 %v5554_v0, 0.0 }
 0x449   : > { %v2273_v40 = vpop.f32.mrf.mxu0  ;;  %v2486_v44 = vpop.f32.mrf.mxu1 }
 0x44a   : > { %v2850_v15 = vmax.f32 %v2777_v59, 0.0  ;;  %v2274_v16 = vadd.f32 %v2273_v40, %v5541_v22  ;;  %v2634_v61 = vpop.f32.mrf.mxu2  ;;  %v5789_v11 = vpop.xlane.xlu1 %3131 }
 0x44b   : > { %v2780_v60 = vpop.f32.mrf.mxu3  ;;  %v3134_v23 = vpop.xlane.xlu2 %3133 }
 0x44c   : > { %v3049_v7 = vmin.f32 %v3047_v56, %v2850_v15  ;;  %v2481_v9 = vadd.f32 %v2480_v51, %v2274_v16  ;;  %v2886_v3 = vmin.f32 %v6796_v10, %v2850_v15 }
 0x44e   : > { %v2635_v26 = vadd.f32 %v2634_v61, %v2481_v9  ;;  %v2950_v42 = vmin.f32 %v2886_v3, 1e+30 }
 0x450   : > { %v2781_v34 = vadd.f32 %v2780_v60, %v2635_v26  ;;  %3163 = vmin.xlane.f32.xlu1 %v2950_v42  ;;  %3153 = vmin.xlane.f32.xlu2 %v2945_v53  ;;  %v2941_v60 = vmin.f32 %v5726_v48, 1e+30  ;;  %v5812_v26 = vand.u32 4294901760, %v3134_v23  ;;  %v6801_v48 = vmax.f32 %v5569_v36, 0.0 }
 0x451   : > { %v2278_v22 = vpop.f32.mrf.mxu0  ;;  %v2492_v43 = vpop.f32.mrf.mxu1 }
 0x452   : > { %v2852_v28 = vmax.f32 %v2781_v34, 0.0  ;;  %v2279_v25 = vadd.f32 %v2278_v22, %v5556_v41  ;;  %v2638_v47 = vpop.f32.mrf.mxu2 }
 0x453   : > { %v2784_v56 = vpop.f32.mrf.mxu3  ;;  %v3136_v40 = vpop.xlane.xlu2 %3135 }
 0x454   : > { %v3050_v1 = vmin.f32 %v3048_v46, %v2852_v28  ;;  %v2487_v52 = vadd.f32 %v2486_v44, %v2279_v25  ;;  %v2887_v17 = vmin.f32 %v6797_v55, %v2852_v28  ;;  %v5806_v9 = vand.u32 4294901760, %v3136_v40 }
 0x455   : > { %v5819_v25 = vand.u32 4294901760, %v5789_v11 }
 0x456   : > { %v2639_v14 = vadd.f32 %v2638_v47, %v2487_v52  ;;  %v2951_v49 = vmin.f32 %v2887_v17, 1e+30  ;;  %v5822_v47 = vsub.f32 %v3136_v40, %v5806_v9  ;;  %v6802_v52 = vld [vmem:[#allocation116_spill] sm:$0xff] }
 0x458   : > { %v2785_v8 = vadd.f32 %v2784_v56, %v2639_v14  ;;  %3165 = vmin.xlane.f32.xlu1 %v2951_v49  ;;  %3149 = vmin.xlane.f32.xlu2 %v2943_v50  ;;  %v5832_v14 = vand.u32 4294901760, %v5783_v24  ;;  %v5835_v49 = vsub.f32 %v3134_v23, %v5812_v26 }
 0x459   : > { %v2283_v41 = vpop.f32.mrf.mxu0  ;;  %v2498_v42 = vpop.f32.mrf.mxu1 }
 0x45a   : > { %v2854_v46 = vmax.f32 %v2785_v8, 0.0  ;;  %v2284_v37 = vadd.f32 %v2283_v41, %v5571_v30  ;;  %v2642_v29 = vpop.f32.mrf.mxu2  ;;  %v5841_v41 = vand.u32 4294901760, %v5781_v12 }
 0x45b   : > { %v3138_v19 = vpop.xlane.xlu1 %3137  ;;  %v2788_v59 = vpop.f32.mrf.mxu3 }
 0x45c   : > { %v3051_v45 = vmin.f32 %v3049_v7, %v2854_v46  ;;  %v2493_v51 = vadd.f32 %v2492_v43, %v2284_v37  ;;  %v2888_v2 = vmin.f32 %v6800_v20, %v2854_v46  ;;  %v5803_v16 = vand.u32 4294901760, %v3138_v19 }
 0x45d   : > { %v2939_v43 = vmin.f32 %v5716_v57, 1e+30  ;;  %v5845_v46 = vsub.f32 %v5789_v11, %v5819_v25  ;;  %v3234_v37 = vand.u32 4294901760, %v5822_v47 }
 0x45e   : > { %v2643_v15 = vadd.f32 %v2642_v29, %v2493_v51  ;;  %v2952_v61 = vmin.f32 %v2888_v2, 1e+30  ;;  %v5809_v7 = vsub.f32 %v3138_v19, %v5803_v16  ;;  %v5859_v29 = vand.u32 4294901760, %v5776_v38 }
 0x45f   : > { %v5863_v19 = vsub.f32 %v5783_v24, %v5832_v14  ;;  %v3240_v51 = vand.u32 4294901760, %v5835_v49  ;;  %v5876_v24 = vsub.f32 %v5781_v12, %v5841_v41  ;;  %v5886_v12 = vand.u32 4294901760, %v5769_v13 }
 0x460   : > { %v2789_v30 = vadd.f32 %v2788_v59, %v2643_v15  ;;  %3167 = vmin.xlane.f32.xlu1 %v2952_v61  ;;  %3145 = vmin.xlane.f32.xlu2 %v2941_v60  ;;  %v3228_v55 = vand.u32 4294901760, %v5809_v7  ;;  %v6803_v59 = vld [vmem:[#allocation109_spill] sm:$0xff]  ;;  %v5872_v61 = vand.u32 4294901760, %v5774_v31  ;;  %v3246_v60 = vand.u32 4294901760, %v5845_v46 }
 0x461   : > { %v2288_v10 = vpop.f32.mrf.mxu0  ;;  %v6804_v40 = vmax.f32 %v6803_v59, 0.0 }
 0x462   : > { %v2856_v3 = vmax.f32 %v2789_v30, 0.0  ;;  %v2289_v0 = vadd.f32 %v2288_v10, %v5586_v58  ;;  %v2646_v56 = vpop.f32.mrf.mxu2  ;;  %v3018_v58 = vrot.slane %v6802_v52, 4  ;;  %v3229_v57 = vsub.f32 %v5809_v7, %v3228_v55 }
 0x463   : > { %v3140_v53 = vpop.xlane.xlu1 %3139  ;;  %v2792_v50 = vpop.f32.mrf.mxu3 }
 0x464   : > { %v3052_v44 = vmin.f32 %v3050_v1, %v2856_v3  ;;  %v2499_v34 = vadd.f32 %v2498_v42, %v2289_v0  ;;  %v5814_v22 = vand.u32 4294901760, %v3140_v53  ;;  %v2889_v28 = vmin.f32 %v6801_v48, %v2856_v3 }
 0x465   : > { %v3019_v11 = vmin.f32 %v6802_v52, %v3018_v58  ;;  %v3230_v10 = vand.u32 4294901760, %v3229_v57  ;;  %v5890_v42 = vsub.f32 %v5776_v38, %v5859_v29  ;;  %v5901_v48 = vsub.f32 %v5774_v31, %v5872_v61 }
 0x466   : > { %v2647_v17 = vadd.f32 %v2646_v56, %v2499_v34  ;;  %v5827_v1 = vsub.f32 %v3140_v53, %v5814_v22  ;;  %3180 = vmatpush.msrb.mxu0 %v5814_v22  ;;  %3376 = vmatpush.msrb.mxu3 %v5814_v22  ;;  %v2953_v36 = vmin.f32 %v2889_v28, 1e+30  ;;  %v3252_v53 = vand.u32 4294901760, %v5863_v19 }
 0x467   : > { %v3020_v0 = vrot.slane %v3019_v11, 2  ;;  %v3258_v38 = vand.u32 4294901760, %v5876_v24  ;;  %v3247_v56 = vsub.f32 %v5845_v46, %v3246_v60  ;;  %v5910_v52 = vand.u32 4294901760, %v5766_v39 }
 0x468   : > { %v2793_v63 = vadd.f32 %v2792_v50, %v2647_v17  ;;  %v3222_v8 = vand.u32 4294901760, %v5827_v1  ;;  %3169 = vmin.xlane.f32.xlu1 %v2953_v36  ;;  %3182 = vmatpush.msrb.mxu0 %v5803_v16  ;;  %v5915_v17 = vsub.f32 %v5769_v13, %v5886_v12  ;;  %v3264_v36 = vand.u32 4294901760, %v5890_v42 }
 0x469   : > { %3323 = vmatpush.msrb.mxu2 %v5827_v1  ;;  %3378 = vmatpush.msrb.mxu3 %v5803_v16  ;;  %v3021_v31 = vmin.f32 %v3019_v11, %v3020_v0  ;;  %v3270_v13 = vand.u32 4294901760, %v5901_v48  ;;  %v3259_v57 = vsub.f32 %v5876_v24, %v3258_v38  ;;  %v5933_v11 = vand.u32 4294901760, %v5754_v35 }
 0x46a   : > { %v2858_v23 = vmax.f32 %v2793_v63, 0.0  ;;  %v3223_v21 = vsub.f32 %v5827_v1, %v3222_v8  ;;  %3141 = vmin.xlane.f32.xlu2 %v2939_v43  ;;  %3184 = vmatpush.msrb.mxu0 %v5806_v9  ;;  %v3253_v63 = vsub.f32 %v5863_v19, %v3252_v53  ;;  %v5923_v43 = vand.u32 4294901760, %v5762_v6 }
 0x46b   : > { %3326 = vmatpush.msrb.mxu2 %v5809_v7  ;;  %3380 = vmatpush.msrb.mxu3 %v5806_v9  ;;  %v3276_v59 = vand.u32 4294901760, %v5915_v17  ;;  %v5957_v0 = vand.u32 4294901760, %v5740_v32 }
 0x46c   : > { %v3053_v20 = vmin.f32 %v3051_v45, %v2858_v23  ;;  %v3224_v2 = vand.u32 4294901760, %v3223_v21  ;;  %3186 = vmatpush.msrb.mxu0 %v5812_v26  ;;  %v2890_v15 = vmin.f32 %v6804_v40, %v2858_v23  ;;  %v3235_v45 = vsub.f32 %v5822_v47, %v3234_v37 }
 0x46d   : > { %3329 = vmatpush.msrb.mxu2 %v5822_v47  ;;  %3382 = vmatpush.msrb.mxu3 %v5812_v26  ;;  %v3248_v21 = vand.u32 4294901760, %v3247_v56  ;;  %v3254_v40 = vand.u32 4294901760, %v3253_v63 }
 0x46e   : > { %v3054_v30 = vmin.f32 %v3052_v44, %v3053_v20  ;;  %3188 = vmatpush.msrb.mxu0 %v5819_v25  ;;  %3225 = vmatpush.msrb.mxu1 %v3224_v2  ;;  %v2954_v3 = vmin.f32 %v2890_v15, 1e+30  ;;  %v3241_v44 = vsub.f32 %v5835_v49, %v3240_v51  ;;  %v3236_v28 = vand.u32 4294901760, %v3235_v45 }
 0x46f   : > { %3332 = vmatpush.msrb.mxu2 %v5835_v49  ;;  %3384 = vmatpush.msrb.mxu3 %v5819_v25  ;;  %v5937_v20 = vsub.f32 %v5766_v39, %v5910_v52  ;;  %v3265_v15 = vsub.f32 %v5890_v42, %v3264_v36  ;;  %v3022_v45 = vrot.slane %v3021_v31, 1  ;;  %v5951_v39 = vsub.f32 %v5762_v6, %v5923_v43 }
 0x470   : > { %v3055_v34 = vrot.slane %v3054_v30, 4  ;;  %3190 = vmatpush.msrb.mxu0 %v5832_v14  ;;  %3231 = vmatpush.msrb.mxu1 %v3230_v10  ;;  %v3242_v50 = vand.u32 4294901760, %v3241_v44  ;;  %v3260_v44 = vand.u32 4294901760, %v3259_v57  ;;  %v3271_v6 = vsub.f32 %v5901_v48, %v3270_v13  ;;  %v3061_v57 = vld [vmem:[#allocation3] sm:$0x3] }
 0x471   : > { %3335 = vmatpush.msrb.mxu2 %v5845_v46  ;;  %3386 = vmatpush.msrb.mxu3 %v5832_v14 }
 0x472   : > { %v3056_v58 = vmin.f32 %v3054_v30, %v3055_v34  ;;  %3171 = vmin.xlane.f32.xlu1 %v2954_v3  ;;  %3192 = vmatpush.msrb.mxu0 %v5841_v41  ;;  %v5947_v30 = vand.u32 4294901760, %v5747_v18  ;;  %v2946_v3 = vmin.f32 %v5759_v5, 1e+30  ;;  %v5965_v34 = vsub.f32 %v5754_v35, %v5933_v11  ;;  %v3872_v35 = vld [vmem:[%s4531_s26] sm:$0x3] }
 0x473   : > { %3237 = vmatpush.msrb.mxu1 %v3236_v28  ;;  %3338 = vmatpush.msrb.mxu2 %v5863_v19  ;;  %v3282_v28 = vand.u32 4294901760, %v5937_v20  ;;  %v5970_v5 = vand.u32 4294901760, %v5729_v33  ;;  %vm3873_vm3 = vcmp.gt.f32.partialorder %v3872_v35, 0.0 }
 0x474   : > { %v3057_v23 = vrot.slane %v3056_v58, 2  ;;  %3388 = vmatpush.msrb.mxu3 %v5841_v41  ;;  %3194 = vmatpush.msrb.mxu0 %v5859_v29  ;;  %v5979_v63 = vsub.f32 %v5747_v18, %v5947_v30  ;;  %v3294_v18 = vand.u32 4294901760, %v5965_v34 }
 0x475   : > { %3243 = vmatpush.msrb.mxu1 %v3242_v50  ;;  %3341 = vmatpush.msrb.mxu2 %v5876_v24  ;;  %v3277_v50 = vsub.f32 %v5915_v17, %v3276_v59 }
 0x476   : > { %v3058_v2 = vmin.f32 %v3056_v58, %v3057_v23  ;;  %3390 = vmatpush.msrb.mxu3 %v5859_v29  ;;  %3196 = vmatpush.msrb.mxu0 %v5872_v61  ;;  %v3266_v58 = vand.u32 4294901760, %v3265_v15  ;;  %v3288_v23 = vand.u32 4294901760, %v5951_v39  ;;  %v3272_v15 = vand.u32 4294901760, %v3271_v6 }
 0x477   : > { %3249 = vmatpush.msrb.mxu1 %v3248_v21  ;;  %3344 = vmatpush.msrb.mxu2 %v5890_v42  ;;  %v3023_v21 = vmin.f32 %v3021_v31, %v3022_v45  ;;  %v3283_v31 = vsub.f32 %v5937_v20, %v3282_v28  ;;  %v3295_v35 = vsub.f32 %v5965_v34, %v3294_v18 }
 0x478   : > { %v3059_v10 = vrot.slane %v3058_v2, 1  ;;  %3392 = vmatpush.msrb.mxu3 %v5872_v61  ;;  %3198 = vmatpush.msrb.mxu0 %v5886_v12  ;;  %v3289_v6 = vsub.f32 %v5951_v39, %v3288_v23 }
 0x479   : > { %3255 = vmatpush.msrb.mxu1 %v3254_v40  ;;  %3347 = vmatpush.msrb.mxu2 %v5901_v48  ;;  %v5986_v40 = vsub.f32 %v5740_v32, %v5957_v0  ;;  %v5998_v32 = vsub.f32 %v5729_v33, %v5970_v5  ;;  %v2944_v33 = vmin.f32 %v5745_v27, 1e+30 }
 0x47a   : > { %v3060_v56 = vmin.f32 %v3058_v2, %v3059_v10  ;;  %3394 = vmatpush.msrb.mxu3 %v5886_v12  ;;  %3155 = vmin.xlane.f32.xlu1 %v2946_v3  ;;  %v3278_v10 = vand.u32 4294901760, %v3277_v50  ;;  %v3284_v50 = vand.u32 4294901760, %v3283_v31  ;;  %v3290_v27 = vand.u32 4294901760, %v3289_v6 }
 0x47b   : > { %3200 = vmatpush.msrb.mxu0 %v5910_v52  ;;  %3261 = vmatpush.msrb.mxu1 %v3260_v44  ;;  %v3300_v44 = vand.u32 4294901760, %v5979_v63 }
 0x47c   : > { %3350 = vmatpush.msrb.mxu2 %v5915_v17  ;;  %3396 = vmatpush.msrb.mxu3 %v5910_v52  ;;  %v3064_v2 = vrot.slane %v3060_v56, 7  ;;  %v3306_v56 = vand.u32 4294901760, %v5986_v40 }
 0x47d   : > { %3202 = vmatpush.msrb.mxu0 %v5923_v43  ;;  %3267 = vmatpush.msrb.mxu1 %v3266_v58  ;;  %v3301_v31 = vsub.f32 %v5979_v63, %v3300_v44 }
 0x47e   : > { %3353 = vmatpush.msrb.mxu2 %v5937_v20  ;;  %3398 = vmatpush.msrb.mxu3 %v5923_v43  ;;  %v3066_v45 = vsel %vm3065_vm2, %v3023_v21, %v3064_v2  ;;  %v3312_v2 = vand.u32 4294901760, %v5998_v32 }
 0x47f   : > { %3204 = vmatpush.msrb.mxu0 %v5933_v11  ;;  %3273 = vmatpush.msrb.mxu1 %v3272_v15  ;;  %v3068_v3 = vmin.f32 %v3061_v57, %v3066_v45  ;;  %v3302_v6 = vand.u32 4294901760, %v3301_v31 }
 0x480   : > { %3356 = vmatpush.msrb.mxu2 %v5951_v39  ;;  %3400 = vmatpush.msrb.mxu3 %v5933_v11 }
 0x481   : > { %3206 = vmatpush.msrb.mxu0 %v5947_v30  ;;  %3279 = vmatpush.msrb.mxu1 %v3278_v10  ;;  %v3874_v58 = vsel %vm3873_vm3, %v3068_v3, 0.0  ;;  %3073 = vst.msk [vmem:[#allocation3] sm:$0x3] %vm5794_vm1, %v3068_v3  ;;  %v3296_v10 = vand.u32 4294901760, %v3295_v35  ;;  %v3307_v3 = vsub.f32 %v5986_v40, %v3306_v56 }
 0x482   : > { %3359 = vmatpush.msrb.mxu2 %v5965_v34  ;;  %3402 = vmatpush.msrb.mxu3 %v5947_v30  ;;  %v3876_v21 = vperm.slane %v3874_v58, 0  ;;  %v3877_v57 = vperm.slane %v3874_v58, 1  ;;  %v2942_v58 = vmin.f32 %v5733_v4, 1e+30  ;;  %v2940_v4 = vmin.f32 %v5721_v62, 1e+30 }
 0x483   : > { %3151 = vmin.xlane.f32.xlu1 %v2944_v33  ;;  %3208 = vmatpush.msrb.mxu0 %v5957_v0  ;;  %v3313_v33 = vsub.f32 %v5998_v32, %v3312_v2 }
 0x484   : > { %3285 = vmatpush.msrb.mxu1 %v3284_v50  ;;  %3362 = vmatpush.msrb.mxu2 %v5979_v63  ;;  %v3880_v54 = vsel %vm3065_vm2, %v3876_v21, 0.0  ;;  %v3881_v15 = vsel %vm3065_vm2, %v3877_v57, 0.0  ;;  %v3308_v50 = vand.u32 4294901760, %v3307_v3 }
 0x485   : > { %3404 = vmatpush.msrb.mxu3 %v5957_v0  ;;  %3210 = vmatpush.msrb.mxu0 %v5970_v5  ;;  %v3882_v45 = vadd.f32 %v3881_v15, %v3880_v54  ;;  %v3314_v1 = vand.u32 4294901760, %v3313_v33 }
 0x486   : > { %3291 = vmatpush.msrb.mxu1 %v3290_v27  ;;  %3365 = vmatpush.msrb.mxu2 %v5986_v40 }
 0x487   : > { %3406 = vmatpush.msrb.mxu3 %v5970_v5  ;;  %3417 = vmatpush.msra.mxu0 %v3222_v8 }
 0x488   : > { %3297 = vmatpush.msrb.mxu1 %v3296_v10  ;;  %3368 = vmatpush.msrb.mxu2 %v5998_v32 }
 0x489   : > { %3421 = vmatpush.msra.mxu0 %v3228_v55  ;;  %3883 = vadd.xlane.f32.xlu2 %v3882_v45 }
 0x48a   : > { %3303 = vmatpush.msrb.mxu1 %v3302_v6 }
 0x48b   : > { %3147 = vmin.xlane.f32.xlu1 %v2942_v58  ;;  %3425 = vmatpush.msra.mxu0 %v3234_v37 }
 0x48c   : > { %3309 = vmatpush.msrb.mxu1 %v3308_v50 }
 0x48d   : > { %3429 = vmatpush.msra.mxu0 %v3240_v51 }
 0x48e   : > { %3315 = vmatpush.msrb.mxu1 %v3314_v1 }
 0x48f   : > { %3433 = vmatpush.msra.mxu0 %v3246_v60 }
 0x490   : > { %3484 = vmatpush.msra.mxu1 %v5814_v22 }
 0x491   : > { %3437 = vmatpush.msra.mxu0 %v3252_v53 }
 0x492   : > { %3486 = vmatpush.msra.mxu1 %v5803_v16  ;;  %v6083_v16 = vld [vmem:[%s4528_s13] sm:$0x3] }
 0x493   : > { %3143 = vmin.xlane.f32.xlu1 %v2940_v4  ;;  %3441 = vmatpush.msra.mxu0 %v3258_v38  ;;  %v3176_v6 = vperm.slane %v6083_v16, 1 }
 0x494   : > { %3488 = vmatpush.msra.mxu1 %v5806_v9  ;;  %v3175_v9 = vperm.slane %v6083_v16, 0 }
 0x495   : > { %3445 = vmatpush.msra.mxu0 %v3264_v36 }
 0x496   : > { %3490 = vmatpush.msra.mxu1 %v5812_v26  ;;  %v3211_v7 = vand.u32 4294901760, %v3175_v9 }
 0x497   : > { %3449 = vmatpush.msra.mxu0 %v3270_v13 }
 0x498   : > { %3492 = vmatpush.msra.mxu1 %v5819_v25  ;;  %v3212_v22 = vsub.f32 %v3175_v9, %v3211_v7 }
 0x499   : > { %3453 = vmatpush.msra.mxu0 %v3276_v59  ;;  %3317 = vmatmul.f32.vlgmr.msrb.gmra.mxu1 %v3211_v7 }
 0x49a   : > { %3494 = vmatpush.msra.mxu1 %v5832_v14  ;;  %v3213_v25 = vand.u32 4294901760, %v3212_v22  ;;  %3371 = vmatmul.f32.vlgmr.msrb.gmra.mxu2 %v3212_v22 }
 0x49b   : > { %3457 = vmatpush.msra.mxu0 %v3282_v28 }
 0x49c   : > { %3496 = vmatpush.msra.mxu1 %v5841_v41  ;;  %v3214_v47 = vsub.f32 %v3212_v22, %v3213_v25  ;;  %3410 = vmatmul.f32.vlgmr.msrb.gmra.mxu3 %v3213_v25  ;;  %v6209_v25 = vand.u32 4294901760, %v3176_v6 }
 0x49d   : > { %3461 = vmatpush.msra.mxu0 %v3288_v23 }
 0x49e   : > { %3498 = vmatpush.msra.mxu1 %v5859_v29  ;;  %v3215_v55 = vand.u32 4294901760, %v3214_v47 }
 0x49f   : > { %3465 = vmatpush.msra.mxu0 %v3294_v18 }
 0x4a0   : > { %3500 = vmatpush.msra.mxu1 %v5872_v61  ;;  %3216 = vmatmul.f32.vlgmr.msrb.gmra.mxu0 %v3215_v55 }
 0x4a1   : > { %3469 = vmatpush.msra.mxu0 %v3300_v44 }
 0x4a2   : > { %3502 = vmatpush.msra.mxu1 %v5886_v12 }
 0x4a3   : > { %3473 = vmatpush.msra.mxu0 %v3306_v56 }
 0x4a4   : > { %3504 = vmatpush.msra.mxu1 %v5910_v52 }
 0x4a5   : > { %3477 = vmatpush.msra.mxu0 %v3312_v2 }
 0x4a6   : > { %3506 = vmatpush.msra.mxu1 %v5923_v43 }
 0x4a8   : > { %3508 = vmatpush.msra.mxu1 %v5933_v11  ;;  %3479 = vmatmul.f32.vlgmr.msra.gmra.mxu0 %v3211_v7 }
 0x4aa   : > { %3510 = vmatpush.msra.mxu1 %v5947_v30 }
 0x4ab   : > { %v3158_v49 = vpop.xlane.xlu2 %3157 }
 0x4ac   : > { %3512 = vmatpush.msra.mxu1 %v5957_v0  ;;  %v6122_v20 = vand.u32 4294901760, %v3158_v49 }
 0x4ae   : > { %3514 = vmatpush.msra.mxu1 %v5970_v5  ;;  %v6150_v18 = vsub.f32 %v3158_v49, %v6122_v20 }
 0x4af   : > { %3516 = vmatmul.f32.vlgmr.msra.gmra.mxu1 %v3211_v7 }
 0x4b0   : > { %v3605_v54 = vand.u32 4294901760, %v6150_v18 }
 0x4b2   : > { %v3606_v7 = vsub.f32 %v6150_v18, %v3605_v54 }
 0x4b3   : > { %v3160_v62 = vpop.xlane.xlu1 %3159 }
 0x4b4   : > { %v6113_v17 = vand.u32 4294901760, %v3160_v62 }
 0x4b6   : > { %v6138_v34 = vsub.f32 %v3160_v62, %v6113_v17 }
 0x4b8   : > { %v3599_v21 = vand.u32 4294901760, %v6138_v34 }
 0x4ba   : > { %v3600_v1 = vsub.f32 %v6138_v34, %v3599_v21 }
 0x4bb   : > { %v3162_v41 = vpop.xlane.xlu2 %3161 }
 0x4bc   : > { %v6102_v53 = vand.u32 4294901760, %v3162_v41  ;;  %v3601_v47 = vand.u32 4294901760, %v3600_v1 }
 0x4be   : > { %v6126_v59 = vsub.f32 %v3162_v41, %v6102_v53 }
 0x4c0   : > { %v3593_v32 = vand.u32 4294901760, %v6126_v59 }
 0x4c2   : > { %v3594_v3 = vsub.f32 %v6126_v59, %v3593_v32 }
 0x4c3   : > { %v3164_v26 = vpop.xlane.xlu1 %3163  ;;  %v3154_v37 = vpop.xlane.xlu2 %3153 }
 0x4c4   : > { %v6095_v60 = vand.u32 4294901760, %v3164_v26  ;;  %v6154_v44 = vand.u32 4294901760, %v3154_v37  ;;  %v3595_v9 = vand.u32 4294901760, %v3594_v3 }
 0x4c6   : > { %v6116_v36 = vsub.f32 %v3164_v26, %v6095_v60  ;;  %v6174_v15 = vsub.f32 %v3154_v37, %v6154_v44 }
 0x4c8   : > { %v3587_v5 = vand.u32 4294901760, %v6116_v36  ;;  %v3617_v62 = vand.u32 4294901760, %v6174_v15 }
 0x4ca   : > { %v3588_v27 = vsub.f32 %v6116_v36, %v3587_v5  ;;  %v3618_v41 = vsub.f32 %v6174_v15, %v3617_v62 }
 0x4cb   : > { %v3166_v14 = vpop.xlane.xlu1 %3165  ;;  %v3150_v43 = vpop.xlane.xlu2 %3149 }
 0x4cc   : > { %v6090_v51 = vand.u32 4294901760, %v3166_v14  ;;  %v6176_v31 = vand.u32 4294901760, %v3150_v43  ;;  %v3589_v50 = vand.u32 4294901760, %v3588_v27 }
 0x4ce   : > { %v6105_v48 = vsub.f32 %v3166_v14, %v6090_v51  ;;  %v6196_v16 = vsub.f32 %v3150_v43, %v6176_v31 }
 0x4d0   : > { %v3581_v30 = vand.u32 4294901760, %v6105_v48  ;;  %v3629_v49 = vand.u32 4294901760, %v6196_v16 }
 0x4d2   : > { %v3582_v35 = vsub.f32 %v6105_v48, %v3581_v30 }
 0x4d3   : > { %v3168_v8 = vpop.xlane.xlu1 %3167  ;;  %v3146_v45 = vpop.xlane.xlu2 %3145 }
 0x4d4   : > { %v6088_v19 = vand.u32 4294901760, %v3168_v8  ;;  %v3583_v10 = vand.u32 4294901760, %v3582_v35  ;;  %v6202_v26 = vand.u32 4294901760, %v3146_v45 }
 0x4d6   : > { %v6098_v12 = vsub.f32 %v3168_v8, %v6088_v19  ;;  %v3607_v8 = vand.u32 4294901760, %v3606_v7 }
 0x4d8   : > { %v3575_v13 = vand.u32 4294901760, %v6098_v12 }
 0x4da   : > { %v3576_v40 = vsub.f32 %v6098_v12, %v3575_v13 }
 0x4db   : > { %v3170_v46 = vpop.xlane.xlu1 %3169 }
 0x4dc   : > { %v6086_v29 = vand.u32 4294901760, %v3170_v46  ;;  %v3577_v2 = vand.u32 4294901760, %v3576_v40  ;;  %v3630_v40 = vsub.f32 %v6196_v16, %v3629_v49 }
 0x4dd   : > { %v3142_v37 = vpop.xlane.xlu2 %3141 }
 0x4de   : > { %v6093_v61 = vsub.f32 %v3170_v46, %v6086_v29  ;;  %v6224_v46 = vsub.f32 %v3146_v45, %v6202_v26  ;;  %v6241_v35 = vand.u32 4294901760, %v3142_v37  ;;  %v3631_v3 = vand.u32 4294901760, %v3630_v40 }
 0x4e0   : > { %v3569_v38 = vand.u32 4294901760, %v6093_v61 }
 0x4e2   : > { %v3570_v0 = vsub.f32 %v6093_v61, %v3569_v38 }
 0x4e4   : > { %v3571_v56 = vand.u32 4294901760, %v3570_v0  ;;  %v3553_v0 = vsub.f32 %v3176_v6, %v6209_v25  ;;  %v3652_v6 = vsub.f32 %v3142_v37, %v6241_v35 }
 0x4e5   : > { %v3172_v24 = vpop.xlane.xlu1 %3171 }
 0x4e6   : > { %v6100_v42 = vand.u32 4294901760, %v3172_v24  ;;  %v3554_v45 = vand.u32 4294901760, %v3553_v0 }
 0x4e8   : > { %v6109_v52 = vsub.f32 %v3172_v24, %v6100_v42  ;;  %3521 = vmatpush.msra.mxu2 %v6100_v42  ;;  %3717 = vmatpush.msrb.mxu1 %v6100_v42 }
 0x4ea   : > { %v3563_v11 = vand.u32 4294901760, %v6109_v52  ;;  %3523 = vmatpush.msra.mxu2 %v6086_v29  ;;  %3664 = vmatpush.msrb.mxu0 %v6109_v52 }
 0x4eb   : > { %3719 = vmatpush.msrb.mxu1 %v6086_v29 }
 0x4ec   : > { %v3564_v39 = vsub.f32 %v6109_v52, %v3563_v11  ;;  %3525 = vmatpush.msra.mxu2 %v6088_v19  ;;  %3667 = vmatpush.msrb.mxu0 %v6093_v61 }
 0x4ed   : > { %3721 = vmatpush.msrb.mxu1 %v6088_v19  ;;  %v3156_v28 = vpop.xlane.xlu1 %3155 }
 0x4ee   : > { %v3565_v63 = vand.u32 4294901760, %v3564_v39  ;;  %v6142_v23 = vand.u32 4294901760, %v3156_v28  ;;  %3527 = vmatpush.msra.mxu2 %v6090_v51  ;;  %3670 = vmatpush.msrb.mxu0 %v6098_v12 }
 0x4ef   : > { %3723 = vmatpush.msrb.mxu1 %v6090_v51 }
 0x4f0   : > { %3529 = vmatpush.msra.mxu2 %v6095_v60  ;;  %3566 = vmatpush.msra.mxu3 %v3565_v63  ;;  %v6164_v57 = vsub.f32 %v3156_v28, %v6142_v23  ;;  %v3619_v63 = vand.u32 4294901760, %v3618_v41 }
 0x4f1   : > { %3673 = vmatpush.msrb.mxu0 %v6105_v48  ;;  %3725 = vmatpush.msrb.mxu1 %v6095_v60 }
 0x4f2   : > { %3531 = vmatpush.msra.mxu2 %v6102_v53  ;;  %3572 = vmatpush.msra.mxu3 %v3571_v56  ;;  %v3611_v33 = vand.u32 4294901760, %v6164_v57  ;;  %v3641_v56 = vand.u32 4294901760, %v6224_v46 }
 0x4f3   : > { %3676 = vmatpush.msrb.mxu0 %v6116_v36  ;;  %3727 = vmatpush.msrb.mxu1 %v6102_v53 }
 0x4f4   : > { %3533 = vmatpush.msra.mxu2 %v6113_v17  ;;  %3578 = vmatpush.msra.mxu3 %v3577_v2  ;;  %v3612_v55 = vsub.f32 %v6164_v57, %v3611_v33 }
 0x4f5   : > { %3679 = vmatpush.msrb.mxu0 %v6126_v59  ;;  %3729 = vmatpush.msrb.mxu1 %v6113_v17 }
 0x4f6   : > { %v3152_v58 = vpop.xlane.xlu1 %3151  ;;  %3535 = vmatpush.msra.mxu2 %v6122_v20  ;;  %3584 = vmatpush.msra.mxu3 %v3583_v10  ;;  %v3613_v43 = vand.u32 4294901760, %v3612_v55  ;;  %v3653_v55 = vand.u32 4294901760, %v3652_v6 }
 0x4f7   : > { %v6190_v4 = vand.u32 4294901760, %v3152_v58  ;;  %3682 = vmatpush.msrb.mxu0 %v6138_v34  ;;  %3731 = vmatpush.msrb.mxu1 %v6122_v20 }
 0x4f8   : > { %3537 = vmatpush.msra.mxu2 %v6142_v23  ;;  %3590 = vmatpush.msra.mxu3 %v3589_v50  ;;  %v3642_v50 = vsub.f32 %v6224_v46, %v3641_v56 }
 0x4f9   : > { %v6205_v22 = vsub.f32 %v3152_v58, %v6190_v4  ;;  %3685 = vmatpush.msrb.mxu0 %v6150_v18  ;;  %3733 = vmatpush.msrb.mxu1 %v6142_v23 }
 0x4fa   : > { %3539 = vmatpush.msra.mxu2 %v6154_v44  ;;  %3596 = vmatpush.msra.mxu3 %v3595_v9  ;;  %v3555_v9 = vsub.f32 %v3553_v0, %v3554_v45  ;;  %v3643_v41 = vand.u32 4294901760, %v3642_v50 }
 0x4fb   : > { %v3623_v14 = vand.u32 4294901760, %v6205_v22  ;;  %3688 = vmatpush.msrb.mxu0 %v6164_v57  ;;  %3735 = vmatpush.msrb.mxu1 %v6154_v44 }
 0x4fc   : > { %3541 = vmatpush.msra.mxu2 %v6190_v4  ;;  %3602 = vmatpush.msra.mxu3 %v3601_v47  ;;  %v3556_v37 = vand.u32 4294901760, %v3555_v9 }
 0x4fd   : > { %3691 = vmatpush.msrb.mxu0 %v6174_v15  ;;  %3737 = vmatpush.msrb.mxu1 %v6190_v4  ;;  %v3624_v39 = vsub.f32 %v6205_v22, %v3623_v14 }
 0x4fe   : > { %v3148_v24 = vpop.xlane.xlu1 %3147  ;;  %3543 = vmatpush.msra.mxu2 %v6176_v31  ;;  %3608 = vmatpush.msra.mxu3 %v3607_v8 }
 0x4ff   : > { %v6233_v28 = vand.u32 4294901760, %v3148_v24  ;;  %3694 = vmatpush.msrb.mxu0 %v6205_v22  ;;  %3739 = vmatpush.msrb.mxu1 %v6176_v31  ;;  %v3625_v27 = vand.u32 4294901760, %v3624_v39  ;;  %v3654_v39 = vsub.f32 %v3652_v6, %v3653_v55 }
 0x500   : > { %3614 = vmatpush.msra.mxu3 %v3613_v43 }
 0x501   : > { %v6244_v2 = vsub.f32 %v3148_v24, %v6233_v28  ;;  %3545 = vmatpush.msra.mxu2 %v6233_v28  ;;  %3697 = vmatpush.msrb.mxu0 %v6196_v16  ;;  %v3655_v40 = vand.u32 4294901760, %v3654_v39 }
 0x502   : > { %3741 = vmatpush.msrb.mxu1 %v6233_v28  ;;  %3620 = vmatpush.msra.mxu3 %v3619_v63 }
 0x503   : > { %v3635_v10 = vand.u32 4294901760, %v6244_v2  ;;  %3547 = vmatpush.msra.mxu2 %v6202_v26  ;;  %3700 = vmatpush.msrb.mxu0 %v6244_v2 }
 0x504   : > { %3743 = vmatpush.msrb.mxu1 %v6202_v26  ;;  %3626 = vmatpush.msra.mxu3 %v3625_v27 }
 0x505   : > { %3703 = vmatpush.msrb.mxu0 %v6224_v46  ;;  %v3636_v58 = vsub.f32 %v6244_v2, %v3635_v10 }
 0x506   : > { %v3144_v1 = vpop.xlane.xlu1 %3143  ;;  %3632 = vmatpush.msra.mxu3 %v3631_v3 }
 0x507   : > { %v3548_v7 = vand.u32 4294901760, %v3144_v1  ;;  %v3637_v47 = vand.u32 4294901760, %v3636_v58 }
 0x509   : > { %v3646_v8 = vsub.f32 %v3144_v1, %v3548_v7  ;;  %3549 = vmatpush.msra.mxu2 %v3548_v7  ;;  %3638 = vmatpush.msra.mxu3 %v3637_v47 }
 0x50a   : > { %3745 = vmatpush.msrb.mxu1 %v3548_v7 }
 0x50b   : > { %v3647_v24 = vand.u32 4294901760, %v3646_v8  ;;  %3551 = vmatpush.msra.mxu2 %v6241_v35  ;;  %3644 = vmatpush.msra.mxu3 %v3643_v41 }
 0x50c   : > { %3706 = vmatpush.msrb.mxu0 %v3646_v8  ;;  %3747 = vmatpush.msrb.mxu1 %v6241_v35 }
 0x50d   : > { %3758 = vmatpush.msrb.mxu2 %v3563_v11  ;;  %v3648_v43 = vsub.f32 %v3646_v8, %v3647_v24  ;;  %3751 = vmatmul.f32.vlgmr.msrb.gmra.mxu1 %v3554_v45 }
 0x50e   : > { %3709 = vmatpush.msrb.mxu0 %v3652_v6  ;;  %3557 = vmatmul.f32.vlgmr.msra.gmra.mxu2 %v3556_v37 }
 0x50f   : > { %3762 = vmatpush.msrb.mxu2 %v3569_v38  ;;  %v3649_v63 = vand.u32 4294901760, %v3648_v43  ;;  %3712 = vmatmul.f32.vlgmr.msrb.gmra.mxu0 %v3553_v0 }
 0x511   : > { %3766 = vmatpush.msrb.mxu2 %v3575_v13  ;;  %3650 = vmatpush.msra.mxu3 %v3649_v63 }
 0x513   : > { %3770 = vmatpush.msrb.mxu2 %v3581_v30  ;;  %3656 = vmatpush.msra.mxu3 %v3655_v40 }
 0x514   : > { %3658 = vmatmul.f32.vlgmr.msra.gmra.mxu3 %v6209_v25 }
 0x515   : > { %3825 = vmatpush.msrb.mxu3 %v6100_v42  ;;  %3774 = vmatpush.msrb.mxu2 %v3587_v5  ;;  %v4372_v42 = vmov 0  }
 0x516   : > { %4157 = vset.pattern.permute.xlu1 %v4372_v42  ;;  %4158 = vset.pattern.permute.xlu0 %v4372_v42 }
 0x517   : > { %3827 = vmatpush.msrb.mxu3 %v6086_v29  ;;  %3778 = vmatpush.msrb.mxu2 %v3593_v32  ;;  %v3318_v29 = vpop.f32.mrf.mxu1 }
 0x519   : > { %3829 = vmatpush.msrb.mxu3 %v6088_v19  ;;  %3782 = vmatpush.msrb.mxu2 %v3599_v21 }
 0x51b   : > { %3831 = vmatpush.msrb.mxu3 %v6090_v51  ;;  %3786 = vmatpush.msrb.mxu2 %v3605_v54 }
 0x51d   : > { %3833 = vmatpush.msrb.mxu3 %v6095_v60  ;;  %3790 = vmatpush.msrb.mxu2 %v3611_v33  ;;  %v3217_v19 = vpop.f32.mrf.mxu0  ;;  %v3372_v61 = vpop.f32.mrf.mxu2 }
 0x51e   : > { %v3319_v51 = vadd.f32 %v3318_v29, %v3217_v19 }
 0x51f   : > { %3835 = vmatpush.msrb.mxu3 %v6102_v53  ;;  %3794 = vmatpush.msrb.mxu2 %v3617_v62  ;;  %v3411_v12 = vpop.f32.mrf.mxu3  ;;  %v4373_v53 = vmov 0.0  }
 0x520   : > { %v3373_v60 = vadd.f32 %v3372_v61, %v3319_v51  ;;  %375 = vst [vmem:[%s6306_s21] sm:$0x1] %v4373_v53 }
 0x521   : > { %3837 = vmatpush.msrb.mxu3 %v6113_v17  ;;  %3798 = vmatpush.msrb.mxu2 %v3623_v14 }
 0x522   : > { %v3412_v48 = vadd.f32 %v3411_v12, %v3373_v60 }
 0x523   : > { %3839 = vmatpush.msrb.mxu3 %v6122_v20  ;;  %3802 = vmatpush.msrb.mxu2 %v3629_v49 }
 0x525   : > { %3841 = vmatpush.msrb.mxu3 %v6142_v23  ;;  %3806 = vmatpush.msrb.mxu2 %v3635_v10  ;;  %v3480_v38 = vpop.f32.mrf.mxu0 }
 0x526   : > { %v3481_v52 = vadd.f32 %v3480_v38, %v3412_v48 }
 0x527   : > { %3843 = vmatpush.msrb.mxu3 %v6154_v44  ;;  %3810 = vmatpush.msrb.mxu2 %v3641_v56  ;;  %v3861_v57 = vld [vmem:[%s6306_s21] sm:$0x1] }
 0x529   : > { %3845 = vmatpush.msrb.mxu3 %v6190_v4  ;;  %3814 = vmatpush.msrb.mxu2 %v3647_v24 }
 0x52b   : > { %3847 = vmatpush.msrb.mxu3 %v6176_v31  ;;  %3818 = vmatpush.msrb.mxu2 %v3653_v55  ;;  %v3884_v31 = vpop.xlane.xlu2 %3883 }
 0x52c   : > { %3820 = vmatmul.f32.vlgmr.msrb.gmra.mxu2 %v6209_v25  ;;  %v3517_v17 = vpop.f32.mrf.mxu1 }
 0x52d   : > { %3849 = vmatpush.msrb.mxu3 %v6233_v28  ;;  %v3518_v36 = vadd.f32 %v3517_v17, %v3481_v52 }
 0x52f   : > { %3851 = vmatpush.msrb.mxu3 %v6202_v26 }
 0x531   : > { %3853 = vmatpush.msrb.mxu3 %v3548_v7 }
 0x533   : > { %3855 = vmatpush.msrb.mxu3 %v6241_v35 }
 0x534   : > { %3857 = vmatmul.f32.vlgmr.msrb.gmra.mxu3 %v6209_v25 }
 0x58a   : > { %v3752_v5 = vpop.f32.mrf.mxu1 }
 0x58c   : > { %v3713_v30 = vpop.f32.mrf.mxu0 }
 0x591   : > { %v3558_v13 = vpop.f32.mrf.mxu2 }
 0x592   : > { %v3559_v11 = vadd.f32 %v3558_v13, %v3518_v36 }
 0x597   : > { %v3659_v20 = vpop.f32.mrf.mxu3 }
 0x598   : > { %v3660_v59 = vadd.f32 %v3659_v20, %v3559_v11 }
 0x59a   : > { %v3714_v34 = vadd.f32 %v3713_v30, %v3660_v59 }
 0x59c   : > { %v3753_v18 = vadd.f32 %v3752_v5, %v3714_v34 }
 0x5af   : > { %v3821_v23 = vpop.f32.mrf.mxu2 }
 0x5b0   : > { %v3822_v32 = vadd.f32 %v3821_v23, %v3753_v18 }
 0x5b7   : > { %v3858_v44 = vpop.f32.mrf.mxu3 }
 0x5b8   : > { %v3859_v21 = vadd.f32 %v3858_v44, %v3822_v32 }
 0x5ba   : > { %3864 = vperm.xlu1 %4157, %v3859_v21  }
 0x62c   : > { %v3865_v54 = vpop.permute.xlu1 %3864 }
 0x62d   : > { %v3867_v15 = vadd.f32 %v3865_v54, %v3861_v57 }
 0x62f   : > { %3868 = vst [vmem:[%s6306_s21] sm:$0x1] %v3867_v15 }
 0x636   : > { %v3885_v33 = vld [vmem:[%s6306_s21] sm:$0x1] }
 0x637   : > { %v3886_v4 = vadd.f32 %v3885_v33, %v3884_v31 }
 0x639   : > { %3887 = vst [vmem:[%s6306_s21] sm:$0x1] %v3886_v4 }
 0x63a   : > { %4306 = shalt.err (!%p4303_p13)
}
 0x63b   : > { %4085 = dma.vmem_to_hbm [thread:$0]  (%p4454_p9), %s3900_s10, 16, %s3902_s11, %s3889_s1  }
 0x63c PF: > { %s6805_s17 = sld [smem:[#allocation18_spill]]  ;;  %s3913_s5 = sand.u32 1, %s4349_s15  }
 0x63d   : > { %p4101_p0 = pnand %p4057_p12, %p4461_p11  ;;  %s3914_s8 = scalar_lea.sflag [#allocation6], %s3913_s5 }
 0x63f   : > { %p4102_p1 = pneg %p4101_p0 }
 0x641   : > { %4344 = dma.done.wait (%p4102_p1), %s3914_s8, 16  }
 0x642   : > { %4346 = vsyncadd (%p4102_p1), %s3914_s8, 4294967280  ;;  %s26_s20 = sadd.s32 1, %s6805_s17   ;;  %s6806_s25 = sld [smem:[#allocation17_spill]] }
 0x643   : > { %p23_p2 = scmp.ge.s32.totalorder %s26_s20, 4   ;;  %s6807_s17 = sld [smem:[#allocation20_spill]] }
 0x644   : > { %s6808_s28 = sld [smem:[#allocation19_spill]]  ;;  %s6809_s15 = smov %s4353_s16 }
 0x645   : > { %s6811_s18 = smov %s4365_s19 }
 0x646   :  { %25 = sbr.rel (!%p23_p2) target bundleno = 12 (0xc), region = 134 }
 0x648   : > { %s6810_s16 = smov %s6806_s25 }
 0x64a   : > { %s6812_s19 = smov %s6808_s28 }
 0x64b   :  { %3919 = vsyncpa [#allocation5], 1 }
 0x64c   :  { %3921 = vsyncpa [#allocation5 + $0x1], 1 }
 0x64d   :  { %3922 = vsyncpa [#allocation8], 1 }
 0x64e   :  { %3924 = vsyncpa [#allocation8 + $0x1], 1 }
 0x64f   :  { %3925 = vsyncpa [#allocation11], 1 }
 0x650   :  { %3927 = vsyncpa [#allocation11 + $0x1], 1 }
 0x651   :  { %3928 = vsyncpa [#allocation6], 1 }
 0x652   :  { %3930 = vsyncpa [#allocation6 + $0x1], 1 }

</bundles_post_ra>
